<compile_context>
chip_gen: v7x
topology: tpu7x:2x2x1
jax: 0.10.0
libtpu: 0.0.40
codegen_flags: <defaults>
</compile_context>

<pallas_src>
import jax
import jax.numpy as jnp
from jax.experimental import pallas as pl
from jax.experimental.pallas import tpu as pltpu

# ---------------------------------------------------------------------------
# Scaled-down BERT config (stands in for bert-base-uncased: 768 -> 128, etc.)
# ---------------------------------------------------------------------------
B, S = 2, 8          # batch, sequence length
H = 128              # hidden size (stands in for 768)
NH = 2               # attention heads
DH = H // NH         # head dim
FF = 4 * H           # FFN intermediate
L = 2                # encoder layers
VOCAB = 100
MAX_POS = 16
LN_EPS = 1e-12
ATTN_SCALE = 1.0 / (DH ** 0.5)


# ---------------------------------------------------------------------------
# In-kernel helpers (traced inline inside the fused kernel)
# ---------------------------------------------------------------------------
def _layernorm(x, g, b):
    mu = jnp.mean(x, axis=-1, keepdims=True)
    var = jnp.mean((x - mu) ** 2, axis=-1, keepdims=True)
    return (x - mu) * jax.lax.rsqrt(var + LN_EPS) * g + b


def _gelu(y):
    # TODO(synk): HF BERT uses exact erf GELU; tanh approximation differs by <1e-3 rel.
    return 0.5 * y * (1.0 + jnp.tanh(0.7978845608028654 * (y + 0.044715 * y * y * y)))


# ---------------------------------------------------------------------------
# Single fused kernel: emb-LN -> L x encoder layer -> pooler -> Linear+ReLU
# ---------------------------------------------------------------------------
def _fused_bert_kernel(
        emb_ref, addm_ref, eg_ref, eb_ref,
        wqkv_ref, bqkv_ref, wo_ref, bo_ref, ln1g_ref, ln1b_ref,
        w1_ref, b1_ref, w2_ref, b2_ref, ln2g_ref, ln2b_ref,
        poolw_ref, poolb_ref, headw_ref, headb_ref,
        o_ref):
    # Embedding LayerNorm (no residual).
    h = _layernorm(emb_ref[...], eg_ref[...], eb_ref[...])           # (B*S, H)

    # Additive mask, broadcast once (hoisted out of the layer/head loops).
    addm = jnp.broadcast_to(addm_ref[...], (B, S, S))                 # (B, S, S)

    for l in range(L):                                                # static unroll
        # ---- self attention: fused QKV matmul, per-head batched einsums ----
        qkv = jnp.dot(h, wqkv_ref[l],
                      preferred_element_type=jnp.float32) + bqkv_ref[l]   # (B*S, 3H)
        ctx_heads = []
        for hh in range(NH):                                          # static unroll
            lo = hh * DH
            q = qkv[:, lo:lo + DH].reshape(B, S, DH)
            k = qkv[:, H + lo:H + lo + DH].reshape(B, S, DH)
            v = qkv[:, 2 * H + lo:2 * H + lo + DH].reshape(B, S, DH)
            s = jnp.einsum("bqd,bkd->bqk", q, k,
                           preferred_element_type=jnp.float32) * ATTN_SCALE  # (B,S,S)
            s = s + addm
            s = s - jnp.max(s, axis=-1, keepdims=True)
            p = jnp.exp(s)
            p = p / jnp.sum(p, axis=-1, keepdims=True)
            c = jnp.einsum("bqk,bkd->bqd", p, v,
                           preferred_element_type=jnp.float32)        # (B, S, DH)
            ctx_heads.append(c.reshape(B * S, DH))
        ctx = jnp.concatenate(ctx_heads, axis=-1)                     # (B*S, H)

        attn_out = jnp.dot(ctx, wo_ref[l],
                           preferred_element_type=jnp.float32) + bo_ref[l]
        h = _layernorm(attn_out + h, ln1g_ref[l], ln1b_ref[l])

        # ---- feed-forward ----
        ff = _gelu(jnp.dot(h, w1_ref[l],
                           preferred_element_type=jnp.float32) + b1_ref[l])
        ff = jnp.dot(ff, w2_ref[l],
                     preferred_element_type=jnp.float32) + b2_ref[l]
        h = _layernorm(ff + h, ln2g_ref[l], ln2b_ref[l])

    # ---- BERT pooler over [CLS] rows, fused with Model2 head ----
    cls = jnp.concatenate([h[b * S:b * S + 1, :] for b in range(B)], axis=0)  # (B, H)
    pooled = jnp.tanh(jnp.dot(cls, poolw_ref[...],
                              preferred_element_type=jnp.float32) + poolb_ref[...])
    # TODO(synk): nn.Dropout(0.5) is identity at inference time; not applied.
    out = jnp.dot(pooled, headw_ref[...],
                  preferred_element_type=jnp.float32) + headb_ref[...]
    o_ref[...] = jnp.maximum(out, 0.0)                                # ReLU


# ---------------------------------------------------------------------------
# Wrapper: embedding gather (glue) + one pallas_call
# ---------------------------------------------------------------------------
def pack_params(params):
    """Stack per-layer weights along a leading L axis; fuse Wq|Wk|Wv."""
    ls = params["layers"]
    return {
        "emb_ln_g": params["emb_ln_g"].reshape(1, H),
        "emb_ln_b": params["emb_ln_b"].reshape(1, H),
        "wqkv": jnp.stack([jnp.concatenate([lp["wq"], lp["wk"], lp["wv"]], axis=1)
                           for lp in ls]),                              # (L, H, 3H)
        "bqkv": jnp.stack([jnp.concatenate([lp["bq"], lp["bk"], lp["bv"]]).reshape(1, 3 * H)
                           for lp in ls]),                              # (L, 1, 3H)
        "wo": jnp.stack([lp["wo"] for lp in ls]),                       # (L, H, H)
        "bo": jnp.stack([lp["bo"].reshape(1, H) for lp in ls]),
        "ln1_g": jnp.stack([lp["ln1_g"].reshape(1, H) for lp in ls]),
        "ln1_b": jnp.stack([lp["ln1_b"].reshape(1, H) for lp in ls]),
        "w1": jnp.stack([lp["w1"] for lp in ls]),                       # (L, H, FF)
        "b1": jnp.stack([lp["b1"].reshape(1, FF) for lp in ls]),
        "w2": jnp.stack([lp["w2"] for lp in ls]),                       # (L, FF, H)
        "b2": jnp.stack([lp["b2"].reshape(1, H) for lp in ls]),
        "ln2_g": jnp.stack([lp["ln2_g"].reshape(1, H) for lp in ls]),
        "ln2_b": jnp.stack([lp["ln2_b"].reshape(1, H) for lp in ls]),
        "pool_w": params["pool_w"], "pool_b": params["pool_b"].reshape(1, H),
        "head_w": params["head_w"], "head_b": params["head_b"].reshape(1, H),
    }


def model2_forward(params, packed, input_id, mask):
    # --- BERT embeddings (gather is plain-JAX glue) ---
    we = jnp.take(params["word_emb"], input_id, axis=0)            # (B, S, H)
    pe = params["pos_emb"][:S][None, :, :]                         # (1, S, H)
    te = params["type_emb"][0][None, None, :]                      # (1, 1, H), token_type=0
    emb = (we + pe + te).reshape(B * S, H)

    # Additive attention mask precomputed once.
    addmask = ((1.0 - mask.astype(jnp.float32)) * (-1e9)).reshape(B, 1, S)

    args = (emb, addmask,
            packed["emb_ln_g"], packed["emb_ln_b"],
            packed["wqkv"], packed["bqkv"], packed["wo"], packed["bo"],
            packed["ln1_g"], packed["ln1_b"],
            packed["w1"], packed["b1"], packed["w2"], packed["b2"],
            packed["ln2_g"], packed["ln2_b"],
            packed["pool_w"], packed["pool_b"],
            packed["head_w"], packed["head_b"])

    vmem_spec = pl.BlockSpec(memory_space=pltpu.MemorySpace.VMEM)
    return pl.pallas_call(
        _fused_bert_kernel,
        out_shape=jax.ShapeDtypeStruct((B, H), jnp.float32),
        in_specs=[vmem_spec] * len(args),
        out_specs=vmem_spec,
    )(*args)


# ---------------------------------------------------------------------------
# Deterministic synthetic parameters
# ---------------------------------------------------------------------------
def init_params(key):
    def nrm(k, shape, scale=0.02):
        return (scale * jax.random.normal(k, shape)).astype(jnp.float32)

    keys = iter(jax.random.split(key, 64))
    params = {
        "word_emb": nrm(next(keys), (VOCAB, H)),
        "pos_emb": nrm(next(keys), (MAX_POS, H)),
        "type_emb": nrm(next(keys), (2, H)),
        "emb_ln_g": jnp.ones((H,), jnp.float32),
        "emb_ln_b": jnp.zeros((H,), jnp.float32),
        "pool_w": nrm(next(keys), (H, H)),
        "pool_b": jnp.zeros((H,), jnp.float32),
        "head_w": nrm(next(keys), (H, H)),
        "head_b": jnp.zeros((H,), jnp.float32),
        "layers": [],
    }
    for _ in range(L):
        lp = {
            "wq": nrm(next(keys), (H, H)), "bq": jnp.zeros((H,), jnp.float32),
            "wk": nrm(next(keys), (H, H)), "bk": jnp.zeros((H,), jnp.float32),
            "wv": nrm(next(keys), (H, H)), "bv": jnp.zeros((H,), jnp.float32),
            "wo": nrm(next(keys), (H, H)), "bo": jnp.zeros((H,), jnp.float32),
            "ln1_g": jnp.ones((H,), jnp.float32),
            "ln1_b": jnp.zeros((H,), jnp.float32),
            "w1": nrm(next(keys), (H, FF)), "b1": jnp.zeros((FF,), jnp.float32),
            "w2": nrm(next(keys), (FF, H)), "b2": jnp.zeros((H,), jnp.float32),
            "ln2_g": jnp.ones((H,), jnp.float32),
            "ln2_b": jnp.zeros((H,), jnp.float32),
        }
        params["layers"].append(lp)
    return params


if __name__ == "__main__":
    root = jax.random.PRNGKey(0)
    k_params, k_ids = jax.random.split(root)

    params = init_params(k_params)
    packed = pack_params(params)

    input_id = jax.random.randint(k_ids, (B, S), 0, VOCAB, dtype=jnp.int32)
    # attention mask: second sequence has 3 padding positions
    mask = jnp.array([[1, 1, 1, 1, 1, 1, 1, 1],
                      [1, 1, 1, 1, 1, 0, 0, 0]], dtype=jnp.int32)

    forward = jax.jit(model2_forward)
    out = forward(params, packed, input_id, mask)
    out = jax.block_until_ready(out)

    assert out.shape == (B, H)
    assert bool(jnp.all(out >= 0.0))       # ReLU output is non-negative
    assert bool(jnp.all(jnp.isfinite(out)))
    print("KERNEL_OK")
</pallas_src>

<mosaic_0001>
module attributes {stable_mosaic.version = 11 : i64} {
  func.func @_fused_bert_kernel(%arg0: memref<16x128xf32, #tpu.memory_space<vmem>>, %arg1: memref<2x1x8xf32, #tpu.memory_space<vmem>>, %arg2: memref<1x128xf32, #tpu.memory_space<vmem>>, %arg3: memref<1x128xf32, #tpu.memory_space<vmem>>, %arg4: memref<2x128x384xf32, #tpu.memory_space<vmem>>, %arg5: memref<2x1x384xf32, #tpu.memory_space<vmem>>, %arg6: memref<2x128x128xf32, #tpu.memory_space<vmem>>, %arg7: memref<2x1x128xf32, #tpu.memory_space<vmem>>, %arg8: memref<2x1x128xf32, #tpu.memory_space<vmem>>, %arg9: memref<2x1x128xf32, #tpu.memory_space<vmem>>, %arg10: memref<2x128x512xf32, #tpu.memory_space<vmem>>, %arg11: memref<2x1x512xf32, #tpu.memory_space<vmem>>, %arg12: memref<2x512x128xf32, #tpu.memory_space<vmem>>, %arg13: memref<2x1x128xf32, #tpu.memory_space<vmem>>, %arg14: memref<2x1x128xf32, #tpu.memory_space<vmem>>, %arg15: memref<2x1x128xf32, #tpu.memory_space<vmem>>, %arg16: memref<128x128xf32, #tpu.memory_space<vmem>>, %arg17: memref<1x128xf32, #tpu.memory_space<vmem>>, %arg18: memref<128x128xf32, #tpu.memory_space<vmem>>, %arg19: memref<1x128xf32, #tpu.memory_space<vmem>>, %arg20: memref<2x128xf32, #tpu.memory_space<vmem>>) attributes {dimension_semantics = [], scalar_prefetch = 0 : i64, scratch_operands = 0 : i64, tpu.core_type = #tpu.core_type<tc>} {
    %c0 = arith.constant 0 : index
    %c0_0 = arith.constant 0 : index
    %0 = vector.load %arg0[%c0, %c0_0] : memref<16x128xf32, #tpu.memory_space<vmem>>, vector<16x128xf32>
    %c0_1 = arith.constant 0 : index
    %c0_2 = arith.constant 0 : index
    %1 = vector.load %arg2[%c0_1, %c0_2] : memref<1x128xf32, #tpu.memory_space<vmem>>, vector<1x128xf32>
    %c0_3 = arith.constant 0 : index
    %c0_4 = arith.constant 0 : index
    %2 = vector.load %arg3[%c0_3, %c0_4] : memref<1x128xf32, #tpu.memory_space<vmem>>, vector<1x128xf32>
    %cst = arith.constant dense<0.000000e+00> : vector<16xf32>
    %3 = vector.multi_reduction <add>, %0, %cst [1] : vector<16x128xf32> to vector<16xf32>
    %4 = vector.shape_cast %3 : vector<16xf32> to vector<16x1xf32>
    %cst_5 = arith.constant 1.280000e+02 : f32
    %5 = vector.broadcast %cst_5 : f32 to vector<16x1xf32>
    %6 = arith.divf %4, %5 : vector<16x1xf32>
    %7 = vector.broadcast %6 : vector<16x1xf32> to vector<16x128xf32>
    %8 = arith.subf %0, %7 : vector<16x128xf32>
    %9 = arith.mulf %8, %8 : vector<16x128xf32>
    %cst_6 = arith.constant dense<0.000000e+00> : vector<16xf32>
    %10 = vector.multi_reduction <add>, %9, %cst_6 [1] : vector<16x128xf32> to vector<16xf32>
    %11 = vector.shape_cast %10 : vector<16xf32> to vector<16x1xf32>
    %cst_7 = arith.constant 1.280000e+02 : f32
    %12 = vector.broadcast %cst_7 : f32 to vector<16x1xf32>
    %13 = arith.divf %11, %12 : vector<16x1xf32>
    %14 = vector.broadcast %6 : vector<16x1xf32> to vector<16x128xf32>
    %15 = arith.subf %0, %14 : vector<16x128xf32>
    %cst_8 = arith.constant 9.99999996E-13 : f32
    %16 = vector.broadcast %cst_8 : f32 to vector<16x1xf32>
    %17 = arith.addf %13, %16 : vector<16x1xf32>
    %18 = math.rsqrt %17 : vector<16x1xf32>
    %19 = vector.broadcast %18 : vector<16x1xf32> to vector<16x128xf32>
    %20 = arith.mulf %15, %19 : vector<16x128xf32>
    %21 = vector.broadcast %1 : vector<1x128xf32> to vector<16x128xf32>
    %22 = arith.mulf %20, %21 : vector<16x128xf32>
    %23 = vector.broadcast %2 : vector<1x128xf32> to vector<16x128xf32>
    %24 = arith.addf %22, %23 : vector<16x128xf32>
    %c0_9 = arith.constant 0 : index
    %c0_10 = arith.constant 0 : index
    %c0_11 = arith.constant 0 : index
    %25 = vector.load %arg1[%c0_9, %c0_10, %c0_11] : memref<2x1x8xf32, #tpu.memory_space<vmem>>, vector<2x1x8xf32>
    %26 = vector.shape_cast %25 : vector<2x1x8xf32> to vector<2x1x8xf32>
    %27 = vector.broadcast %26 : vector<2x1x8xf32> to vector<2x8x8xf32>
    %c0_12 = arith.constant 0 : index
    %c0_13 = arith.constant 0 : index
    %c0_14 = arith.constant 0 : index
    %28 = vector.load %arg4[%c0_12, %c0_13, %c0_14] : memref<2x128x384xf32, #tpu.memory_space<vmem>>, vector<1x128x384xf32>
    %29 = vector.shape_cast %28 : vector<1x128x384xf32> to vector<128x384xf32>
    %cst_15 = arith.constant dense<0.000000e+00> : vector<16x384xf32>
    %30 = tpu.matmul %24, %29, %cst_15 {dimension_numbers = #tpu.dot_dimension_numbers<[1], [0], [0], [1], [0, 0, 1, 1], [], []>} : vector<16x128xf32>, vector<128x384xf32>, vector<16x384xf32> -> vector<16x384xf32>
    %c0_16 = arith.constant 0 : index
    %c0_17 = arith.constant 0 : index
    %c0_18 = arith.constant 0 : index
    %31 = vector.load %arg5[%c0_16, %c0_17, %c0_18] : memref<2x1x384xf32, #tpu.memory_space<vmem>>, vector<1x1x384xf32>
    %32 = vector.shape_cast %31 : vector<1x1x384xf32> to vector<1x384xf32>
    %33 = vector.broadcast %32 : vector<1x384xf32> to vector<16x384xf32>
    %34 = arith.addf %30, %33 : vector<16x384xf32>
    %35 = vector.extract_strided_slice %34 {offsets = [0, 0], sizes = [16, 64], strides = [1, 1]} : vector<16x384xf32> to vector<16x64xf32>
    %36 = vector.shape_cast %35 : vector<16x64xf32> to vector<2x8x64xf32>
    %37 = vector.extract_strided_slice %34 {offsets = [0, 128], sizes = [16, 64], strides = [1, 1]} : vector<16x384xf32> to vector<16x64xf32>
    %38 = vector.shape_cast %37 : vector<16x64xf32> to vector<2x8x64xf32>
    %39 = vector.extract_strided_slice %34 {offsets = [0, 256], sizes = [16, 64], strides = [1, 1]} : vector<16x384xf32> to vector<16x64xf32>
    %40 = vector.shape_cast %39 : vector<16x64xf32> to vector<2x8x64xf32>
    "tpu.trace_start"() <{level = 10 : i32, message = "bqd,bkd->bqk"}> : () -> ()
    %cst_19 = arith.constant dense<0.000000e+00> : vector<2x8x8xf32>
    %41 = tpu.matmul %36, %38, %cst_19 {dimension_numbers = #tpu.dot_dimension_numbers<[2], [2], [1], [1], [0, 0, 0, 1, 1, 1], [0], [0]>} : vector<2x8x64xf32>, vector<2x8x64xf32>, vector<2x8x8xf32> -> vector<2x8x8xf32>
    "tpu.trace_stop"() : () -> ()
    %cst_20 = arith.constant 1.250000e-01 : f32
    %42 = vector.broadcast %cst_20 : f32 to vector<2x8x8xf32>
    %43 = arith.mulf %41, %42 : vector<2x8x8xf32>
    %44 = arith.addf %43, %27 : vector<2x8x8xf32>
    %cst_21 = arith.constant dense<0xFF800000> : vector<2x8xf32>
    %45 = vector.multi_reduction <maximumf>, %44, %cst_21 [2] : vector<2x8x8xf32> to vector<2x8xf32>
    %46 = vector.shape_cast %45 : vector<2x8xf32> to vector<2x8x1xf32>
    %47 = vector.broadcast %46 : vector<2x8x1xf32> to vector<2x8x8xf32>
    %48 = arith.subf %44, %47 : vector<2x8x8xf32>
    %49 = math.exp %48 : vector<2x8x8xf32>
    %cst_22 = arith.constant dense<0.000000e+00> : vector<2x8xf32>
    %50 = vector.multi_reduction <add>, %49, %cst_22 [2] : vector<2x8x8xf32> to vector<2x8xf32>
    %51 = vector.shape_cast %50 : vector<2x8xf32> to vector<2x8x1xf32>
    %52 = vector.broadcast %51 : vector<2x8x1xf32> to vector<2x8x8xf32>
    %53 = arith.divf %49, %52 : vector<2x8x8xf32>
    "tpu.trace_start"() <{level = 10 : i32, message = "bqk,bkd->bqd"}> : () -> ()
    %cst_23 = arith.constant dense<0.000000e+00> : vector<2x8x64xf32>
    %54 = tpu.matmul %53, %40, %cst_23 {dimension_numbers = #tpu.dot_dimension_numbers<[2], [1], [1], [2], [0, 0, 0, 1, 1, 2], [0], [0]>} : vector<2x8x8xf32>, vector<2x8x64xf32>, vector<2x8x64xf32> -> vector<2x8x64xf32>
    "tpu.trace_stop"() : () -> ()
    %55 = vector.shape_cast %54 : vector<2x8x64xf32> to vector<16x64xf32>
    %56 = vector.extract_strided_slice %34 {offsets = [0, 64], sizes = [16, 64], strides = [1, 1]} : vector<16x384xf32> to vector<16x64xf32>
    %57 = vector.shape_cast %56 : vector<16x64xf32> to vector<2x8x64xf32>
    %58 = vector.extract_strided_slice %34 {offsets = [0, 192], sizes = [16, 64], strides = [1, 1]} : vector<16x384xf32> to vector<16x64xf32>
    %59 = vector.shape_cast %58 : vector<16x64xf32> to vector<2x8x64xf32>
    %60 = vector.extract_strided_slice %34 {offsets = [0, 320], sizes = [16, 64], strides = [1, 1]} : vector<16x384xf32> to vector<16x64xf32>
    %61 = vector.shape_cast %60 : vector<16x64xf32> to vector<2x8x64xf32>
    "tpu.trace_start"() <{level = 10 : i32, message = "bqd,bkd->bqk"}> : () -> ()
    %cst_24 = arith.constant dense<0.000000e+00> : vector<2x8x8xf32>
    %62 = tpu.matmul %57, %59, %cst_24 {dimension_numbers = #tpu.dot_dimension_numbers<[2], [2], [1], [1], [0, 0, 0, 1, 1, 1], [0], [0]>} : vector<2x8x64xf32>, vector<2x8x64xf32>, vector<2x8x8xf32> -> vector<2x8x8xf32>
    "tpu.trace_stop"() : () -> ()
    %cst_25 = arith.constant 1.250000e-01 : f32
    %63 = vector.broadcast %cst_25 : f32 to vector<2x8x8xf32>
    %64 = arith.mulf %62, %63 : vector<2x8x8xf32>
    %65 = arith.addf %64, %27 : vector<2x8x8xf32>
    %cst_26 = arith.constant dense<0xFF800000> : vector<2x8xf32>
    %66 = vector.multi_reduction <maximumf>, %65, %cst_26 [2] : vector<2x8x8xf32> to vector<2x8xf32>
    %67 = vector.shape_cast %66 : vector<2x8xf32> to vector<2x8x1xf32>
    %68 = vector.broadcast %67 : vector<2x8x1xf32> to vector<2x8x8xf32>
    %69 = arith.subf %65, %68 : vector<2x8x8xf32>
    %70 = math.exp %69 : vector<2x8x8xf32>
    %cst_27 = arith.constant dense<0.000000e+00> : vector<2x8xf32>
    %71 = vector.multi_reduction <add>, %70, %cst_27 [2] : vector<2x8x8xf32> to vector<2x8xf32>
    %72 = vector.shape_cast %71 : vector<2x8xf32> to vector<2x8x1xf32>
    %73 = vector.broadcast %72 : vector<2x8x1xf32> to vector<2x8x8xf32>
    %74 = arith.divf %70, %73 : vector<2x8x8xf32>
    "tpu.trace_start"() <{level = 10 : i32, message = "bqk,bkd->bqd"}> : () -> ()
    %cst_28 = arith.constant dense<0.000000e+00> : vector<2x8x64xf32>
    %75 = tpu.matmul %74, %61, %cst_28 {dimension_numbers = #tpu.dot_dimension_numbers<[2], [1], [1], [2], [0, 0, 0, 1, 1, 2], [0], [0]>} : vector<2x8x8xf32>, vector<2x8x64xf32>, vector<2x8x64xf32> -> vector<2x8x64xf32>
    "tpu.trace_stop"() : () -> ()
    %76 = vector.shape_cast %75 : vector<2x8x64xf32> to vector<16x64xf32>
    %77 = tpu.concatenate %55, %76 in 1 : vector<16x64xf32>, vector<16x64xf32> -> vector<16x128xf32>
    %c0_29 = arith.constant 0 : index
    %c0_30 = arith.constant 0 : index
    %c0_31 = arith.constant 0 : index
    %78 = vector.load %arg6[%c0_29, %c0_30, %c0_31] : memref<2x128x128xf32, #tpu.memory_space<vmem>>, vector<1x128x128xf32>
    %79 = vector.shape_cast %78 : vector<1x128x128xf32> to vector<128x128xf32>
    %cst_32 = arith.constant dense<0.000000e+00> : vector<16x128xf32>
    %80 = tpu.matmul %77, %79, %cst_32 {dimension_numbers = #tpu.dot_dimension_numbers<[1], [0], [0], [1], [0, 0, 1, 1], [], []>} : vector<16x128xf32>, vector<128x128xf32>, vector<16x128xf32> -> vector<16x128xf32>
    %c0_33 = arith.constant 0 : index
    %c0_34 = arith.constant 0 : index
    %c0_35 = arith.constant 0 : index
    %81 = vector.load %arg7[%c0_33, %c0_34, %c0_35] : memref<2x1x128xf32, #tpu.memory_space<vmem>>, vector<1x1x128xf32>
    %82 = vector.shape_cast %81 : vector<1x1x128xf32> to vector<1x128xf32>
    %83 = vector.broadcast %82 : vector<1x128xf32> to vector<16x128xf32>
    %84 = arith.addf %80, %83 : vector<16x128xf32>
    %85 = arith.addf %84, %24 : vector<16x128xf32>
    %c0_36 = arith.constant 0 : index
    %c0_37 = arith.constant 0 : index
    %c0_38 = arith.constant 0 : index
    %86 = vector.load %arg8[%c0_36, %c0_37, %c0_38] : memref<2x1x128xf32, #tpu.memory_space<vmem>>, vector<1x1x128xf32>
    %87 = vector.shape_cast %86 : vector<1x1x128xf32> to vector<1x128xf32>
    %c0_39 = arith.constant 0 : index
    %c0_40 = arith.constant 0 : index
    %c0_41 = arith.constant 0 : index
    %88 = vector.load %arg9[%c0_39, %c0_40, %c0_41] : memref<2x1x128xf32, #tpu.memory_space<vmem>>, vector<1x1x128xf32>
    %89 = vector.shape_cast %88 : vector<1x1x128xf32> to vector<1x128xf32>
    %cst_42 = arith.constant dense<0.000000e+00> : vector<16xf32>
    %90 = vector.multi_reduction <add>, %85, %cst_42 [1] : vector<16x128xf32> to vector<16xf32>
    %91 = vector.shape_cast %90 : vector<16xf32> to vector<16x1xf32>
    %cst_43 = arith.constant 1.280000e+02 : f32
    %92 = vector.broadcast %cst_43 : f32 to vector<16x1xf32>
    %93 = arith.divf %91, %92 : vector<16x1xf32>
    %94 = vector.broadcast %93 : vector<16x1xf32> to vector<16x128xf32>
    %95 = arith.subf %85, %94 : vector<16x128xf32>
    %96 = arith.mulf %95, %95 : vector<16x128xf32>
    %cst_44 = arith.constant dense<0.000000e+00> : vector<16xf32>
    %97 = vector.multi_reduction <add>, %96, %cst_44 [1] : vector<16x128xf32> to vector<16xf32>
    %98 = vector.shape_cast %97 : vector<16xf32> to vector<16x1xf32>
    %cst_45 = arith.constant 1.280000e+02 : f32
    %99 = vector.broadcast %cst_45 : f32 to vector<16x1xf32>
    %100 = arith.divf %98, %99 : vector<16x1xf32>
    %101 = vector.broadcast %93 : vector<16x1xf32> to vector<16x128xf32>
    %102 = arith.subf %85, %101 : vector<16x128xf32>
    %cst_46 = arith.constant 9.99999996E-13 : f32
    %103 = vector.broadcast %cst_46 : f32 to vector<16x1xf32>
    %104 = arith.addf %100, %103 : vector<16x1xf32>
    %105 = math.rsqrt %104 : vector<16x1xf32>
    %106 = vector.broadcast %105 : vector<16x1xf32> to vector<16x128xf32>
    %107 = arith.mulf %102, %106 : vector<16x128xf32>
    %108 = vector.broadcast %87 : vector<1x128xf32> to vector<16x128xf32>
    %109 = arith.mulf %107, %108 : vector<16x128xf32>
    %110 = vector.broadcast %89 : vector<1x128xf32> to vector<16x128xf32>
    %111 = arith.addf %109, %110 : vector<16x128xf32>
    %c0_47 = arith.constant 0 : index
    %c0_48 = arith.constant 0 : index
    %c0_49 = arith.constant 0 : index
    %112 = vector.load %arg10[%c0_47, %c0_48, %c0_49] : memref<2x128x512xf32, #tpu.memory_space<vmem>>, vector<1x128x512xf32>
    %113 = vector.shape_cast %112 : vector<1x128x512xf32> to vector<128x512xf32>
    %cst_50 = arith.constant dense<0.000000e+00> : vector<16x512xf32>
    %114 = tpu.matmul %111, %113, %cst_50 {dimension_numbers = #tpu.dot_dimension_numbers<[1], [0], [0], [1], [0, 0, 1, 1], [], []>} : vector<16x128xf32>, vector<128x512xf32>, vector<16x512xf32> -> vector<16x512xf32>
    %c0_51 = arith.constant 0 : index
    %c0_52 = arith.constant 0 : index
    %c0_53 = arith.constant 0 : index
    %115 = vector.load %arg11[%c0_51, %c0_52, %c0_53] : memref<2x1x512xf32, #tpu.memory_space<vmem>>, vector<1x1x512xf32>
    %116 = vector.shape_cast %115 : vector<1x1x512xf32> to vector<1x512xf32>
    %117 = vector.broadcast %116 : vector<1x512xf32> to vector<16x512xf32>
    %118 = arith.addf %114, %117 : vector<16x512xf32>
    %cst_54 = arith.constant 5.000000e-01 : f32
    %119 = vector.broadcast %cst_54 : f32 to vector<16x512xf32>
    %120 = arith.mulf %119, %118 : vector<16x512xf32>
    %cst_55 = arith.constant 4.471500e-02 : f32
    %121 = vector.broadcast %cst_55 : f32 to vector<16x512xf32>
    %122 = arith.mulf %121, %118 : vector<16x512xf32>
    %123 = arith.mulf %122, %118 : vector<16x512xf32>
    %124 = arith.mulf %123, %118 : vector<16x512xf32>
    %125 = arith.addf %118, %124 : vector<16x512xf32>
    %cst_56 = arith.constant 0.797884583 : f32
    %126 = vector.broadcast %cst_56 : f32 to vector<16x512xf32>
    %127 = arith.mulf %126, %125 : vector<16x512xf32>
    %128 = math.tanh %127 : vector<16x512xf32>
    %cst_57 = arith.constant 1.000000e+00 : f32
    %129 = vector.broadcast %cst_57 : f32 to vector<16x512xf32>
    %130 = arith.addf %129, %128 : vector<16x512xf32>
    %131 = arith.mulf %120, %130 : vector<16x512xf32>
    %c0_58 = arith.constant 0 : index
    %c0_59 = arith.constant 0 : index
    %c0_60 = arith.constant 0 : index
    %132 = vector.load %arg12[%c0_58, %c0_59, %c0_60] : memref<2x512x128xf32, #tpu.memory_space<vmem>>, vector<1x512x128xf32>
    %133 = vector.shape_cast %132 : vector<1x512x128xf32> to vector<512x128xf32>
    %cst_61 = arith.constant dense<0.000000e+00> : vector<16x128xf32>
    %134 = tpu.matmul %131, %133, %cst_61 {dimension_numbers = #tpu.dot_dimension_numbers<[1], [0], [0], [1], [0, 0, 1, 1], [], []>} : vector<16x512xf32>, vector<512x128xf32>, vector<16x128xf32> -> vector<16x128xf32>
    %c0_62 = arith.constant 0 : index
    %c0_63 = arith.constant 0 : index
    %c0_64 = arith.constant 0 : index
    %135 = vector.load %arg13[%c0_62, %c0_63, %c0_64] : memref<2x1x128xf32, #tpu.memory_space<vmem>>, vector<1x1x128xf32>
    %136 = vector.shape_cast %135 : vector<1x1x128xf32> to vector<1x128xf32>
    %137 = vector.broadcast %136 : vector<1x128xf32> to vector<16x128xf32>
    %138 = arith.addf %134, %137 : vector<16x128xf32>
    %139 = arith.addf %138, %111 : vector<16x128xf32>
    %c0_65 = arith.constant 0 : index
    %c0_66 = arith.constant 0 : index
    %c0_67 = arith.constant 0 : index
    %140 = vector.load %arg14[%c0_65, %c0_66, %c0_67] : memref<2x1x128xf32, #tpu.memory_space<vmem>>, vector<1x1x128xf32>
    %141 = vector.shape_cast %140 : vector<1x1x128xf32> to vector<1x128xf32>
    %c0_68 = arith.constant 0 : index
    %c0_69 = arith.constant 0 : index
    %c0_70 = arith.constant 0 : index
    %142 = vector.load %arg15[%c0_68, %c0_69, %c0_70] : memref<2x1x128xf32, #tpu.memory_space<vmem>>, vector<1x1x128xf32>
    %143 = vector.shape_cast %142 : vector<1x1x128xf32> to vector<1x128xf32>
    %cst_71 = arith.constant dense<0.000000e+00> : vector<16xf32>
    %144 = vector.multi_reduction <add>, %139, %cst_71 [1] : vector<16x128xf32> to vector<16xf32>
    %145 = vector.shape_cast %144 : vector<16xf32> to vector<16x1xf32>
    %cst_72 = arith.constant 1.280000e+02 : f32
    %146 = vector.broadcast %cst_72 : f32 to vector<16x1xf32>
    %147 = arith.divf %145, %146 : vector<16x1xf32>
    %148 = vector.broadcast %147 : vector<16x1xf32> to vector<16x128xf32>
    %149 = arith.subf %139, %148 : vector<16x128xf32>
    %150 = arith.mulf %149, %149 : vector<16x128xf32>
    %cst_73 = arith.constant dense<0.000000e+00> : vector<16xf32>
    %151 = vector.multi_reduction <add>, %150, %cst_73 [1] : vector<16x128xf32> to vector<16xf32>
    %152 = vector.shape_cast %151 : vector<16xf32> to vector<16x1xf32>
    %cst_74 = arith.constant 1.280000e+02 : f32
    %153 = vector.broadcast %cst_74 : f32 to vector<16x1xf32>
    %154 = arith.divf %152, %153 : vector<16x1xf32>
    %155 = vector.broadcast %147 : vector<16x1xf32> to vector<16x128xf32>
    %156 = arith.subf %139, %155 : vector<16x128xf32>
    %cst_75 = arith.constant 9.99999996E-13 : f32
    %157 = vector.broadcast %cst_75 : f32 to vector<16x1xf32>
    %158 = arith.addf %154, %157 : vector<16x1xf32>
    %159 = math.rsqrt %158 : vector<16x1xf32>
    %160 = vector.broadcast %159 : vector<16x1xf32> to vector<16x128xf32>
    %161 = arith.mulf %156, %160 : vector<16x128xf32>
    %162 = vector.broadcast %141 : vector<1x128xf32> to vector<16x128xf32>
    %163 = arith.mulf %161, %162 : vector<16x128xf32>
    %164 = vector.broadcast %143 : vector<1x128xf32> to vector<16x128xf32>
    %165 = arith.addf %163, %164 : vector<16x128xf32>
    %c1 = arith.constant 1 : index
    %c0_76 = arith.constant 0 : index
    %c0_77 = arith.constant 0 : index
    %166 = vector.load %arg4[%c1, %c0_76, %c0_77] : memref<2x128x384xf32, #tpu.memory_space<vmem>>, vector<1x128x384xf32>
    %167 = vector.shape_cast %166 : vector<1x128x384xf32> to vector<128x384xf32>
    %cst_78 = arith.constant dense<0.000000e+00> : vector<16x384xf32>
    %168 = tpu.matmul %165, %167, %cst_78 {dimension_numbers = #tpu.dot_dimension_numbers<[1], [0], [0], [1], [0, 0, 1, 1], [], []>} : vector<16x128xf32>, vector<128x384xf32>, vector<16x384xf32> -> vector<16x384xf32>
    %c1_79 = arith.constant 1 : index
    %c0_80 = arith.constant 0 : index
    %c0_81 = arith.constant 0 : index
    %169 = vector.load %arg5[%c1_79, %c0_80, %c0_81] : memref<2x1x384xf32, #tpu.memory_space<vmem>>, vector<1x1x384xf32>
    %170 = vector.shape_cast %169 : vector<1x1x384xf32> to vector<1x384xf32>
    %171 = vector.broadcast %170 : vector<1x384xf32> to vector<16x384xf32>
    %172 = arith.addf %168, %171 : vector<16x384xf32>
    %173 = vector.extract_strided_slice %172 {offsets = [0, 0], sizes = [16, 64], strides = [1, 1]} : vector<16x384xf32> to vector<16x64xf32>
    %174 = vector.shape_cast %173 : vector<16x64xf32> to vector<2x8x64xf32>
    %175 = vector.extract_strided_slice %172 {offsets = [0, 128], sizes = [16, 64], strides = [1, 1]} : vector<16x384xf32> to vector<16x64xf32>
    %176 = vector.shape_cast %175 : vector<16x64xf32> to vector<2x8x64xf32>
    %177 = vector.extract_strided_slice %172 {offsets = [0, 256], sizes = [16, 64], strides = [1, 1]} : vector<16x384xf32> to vector<16x64xf32>
    %178 = vector.shape_cast %177 : vector<16x64xf32> to vector<2x8x64xf32>
    "tpu.trace_start"() <{level = 10 : i32, message = "bqd,bkd->bqk"}> : () -> ()
    %cst_82 = arith.constant dense<0.000000e+00> : vector<2x8x8xf32>
    %179 = tpu.matmul %174, %176, %cst_82 {dimension_numbers = #tpu.dot_dimension_numbers<[2], [2], [1], [1], [0, 0, 0, 1, 1, 1], [0], [0]>} : vector<2x8x64xf32>, vector<2x8x64xf32>, vector<2x8x8xf32> -> vector<2x8x8xf32>
    "tpu.trace_stop"() : () -> ()
    %cst_83 = arith.constant 1.250000e-01 : f32
    %180 = vector.broadcast %cst_83 : f32 to vector<2x8x8xf32>
    %181 = arith.mulf %179, %180 : vector<2x8x8xf32>
    %182 = arith.addf %181, %27 : vector<2x8x8xf32>
    %cst_84 = arith.constant dense<0xFF800000> : vector<2x8xf32>
    %183 = vector.multi_reduction <maximumf>, %182, %cst_84 [2] : vector<2x8x8xf32> to vector<2x8xf32>
    %184 = vector.shape_cast %183 : vector<2x8xf32> to vector<2x8x1xf32>
    %185 = vector.broadcast %184 : vector<2x8x1xf32> to vector<2x8x8xf32>
    %186 = arith.subf %182, %185 : vector<2x8x8xf32>
    %187 = math.exp %186 : vector<2x8x8xf32>
    %cst_85 = arith.constant dense<0.000000e+00> : vector<2x8xf32>
    %188 = vector.multi_reduction <add>, %187, %cst_85 [2] : vector<2x8x8xf32> to vector<2x8xf32>
    %189 = vector.shape_cast %188 : vector<2x8xf32> to vector<2x8x1xf32>
    %190 = vector.broadcast %189 : vector<2x8x1xf32> to vector<2x8x8xf32>
    %191 = arith.divf %187, %190 : vector<2x8x8xf32>
    "tpu.trace_start"() <{level = 10 : i32, message = "bqk,bkd->bqd"}> : () -> ()
    %cst_86 = arith.constant dense<0.000000e+00> : vector<2x8x64xf32>
    %192 = tpu.matmul %191, %178, %cst_86 {dimension_numbers = #tpu.dot_dimension_numbers<[2], [1], [1], [2], [0, 0, 0, 1, 1, 2], [0], [0]>} : vector<2x8x8xf32>, vector<2x8x64xf32>, vector<2x8x64xf32> -> vector<2x8x64xf32>
    "tpu.trace_stop"() : () -> ()
    %193 = vector.shape_cast %192 : vector<2x8x64xf32> to vector<16x64xf32>
    %194 = vector.extract_strided_slice %172 {offsets = [0, 64], sizes = [16, 64], strides = [1, 1]} : vector<16x384xf32> to vector<16x64xf32>
    %195 = vector.shape_cast %194 : vector<16x64xf32> to vector<2x8x64xf32>
    %196 = vector.extract_strided_slice %172 {offsets = [0, 192], sizes = [16, 64], strides = [1, 1]} : vector<16x384xf32> to vector<16x64xf32>
    %197 = vector.shape_cast %196 : vector<16x64xf32> to vector<2x8x64xf32>
    %198 = vector.extract_strided_slice %172 {offsets = [0, 320], sizes = [16, 64], strides = [1, 1]} : vector<16x384xf32> to vector<16x64xf32>
    %199 = vector.shape_cast %198 : vector<16x64xf32> to vector<2x8x64xf32>
    "tpu.trace_start"() <{level = 10 : i32, message = "bqd,bkd->bqk"}> : () -> ()
    %cst_87 = arith.constant dense<0.000000e+00> : vector<2x8x8xf32>
    %200 = tpu.matmul %195, %197, %cst_87 {dimension_numbers = #tpu.dot_dimension_numbers<[2], [2], [1], [1], [0, 0, 0, 1, 1, 1], [0], [0]>} : vector<2x8x64xf32>, vector<2x8x64xf32>, vector<2x8x8xf32> -> vector<2x8x8xf32>
    "tpu.trace_stop"() : () -> ()
    %cst_88 = arith.constant 1.250000e-01 : f32
    %201 = vector.broadcast %cst_88 : f32 to vector<2x8x8xf32>
    %202 = arith.mulf %200, %201 : vector<2x8x8xf32>
    %203 = arith.addf %202, %27 : vector<2x8x8xf32>
    %cst_89 = arith.constant dense<0xFF800000> : vector<2x8xf32>
    %204 = vector.multi_reduction <maximumf>, %203, %cst_89 [2] : vector<2x8x8xf32> to vector<2x8xf32>
    %205 = vector.shape_cast %204 : vector<2x8xf32> to vector<2x8x1xf32>
    %206 = vector.broadcast %205 : vector<2x8x1xf32> to vector<2x8x8xf32>
    %207 = arith.subf %203, %206 : vector<2x8x8xf32>
    %208 = math.exp %207 : vector<2x8x8xf32>
    %cst_90 = arith.constant dense<0.000000e+00> : vector<2x8xf32>
    %209 = vector.multi_reduction <add>, %208, %cst_90 [2] : vector<2x8x8xf32> to vector<2x8xf32>
    %210 = vector.shape_cast %209 : vector<2x8xf32> to vector<2x8x1xf32>
    %211 = vector.broadcast %210 : vector<2x8x1xf32> to vector<2x8x8xf32>
    %212 = arith.divf %208, %211 : vector<2x8x8xf32>
    "tpu.trace_start"() <{level = 10 : i32, message = "bqk,bkd->bqd"}> : () -> ()
    %cst_91 = arith.constant dense<0.000000e+00> : vector<2x8x64xf32>
    %213 = tpu.matmul %212, %199, %cst_91 {dimension_numbers = #tpu.dot_dimension_numbers<[2], [1], [1], [2], [0, 0, 0, 1, 1, 2], [0], [0]>} : vector<2x8x8xf32>, vector<2x8x64xf32>, vector<2x8x64xf32> -> vector<2x8x64xf32>
    "tpu.trace_stop"() : () -> ()
    %214 = vector.shape_cast %213 : vector<2x8x64xf32> to vector<16x64xf32>
    %215 = tpu.concatenate %193, %214 in 1 : vector<16x64xf32>, vector<16x64xf32> -> vector<16x128xf32>
    %c1_92 = arith.constant 1 : index
    %c0_93 = arith.constant 0 : index
    %c0_94 = arith.constant 0 : index
    %216 = vector.load %arg6[%c1_92, %c0_93, %c0_94] : memref<2x128x128xf32, #tpu.memory_space<vmem>>, vector<1x128x128xf32>
    %217 = vector.shape_cast %216 : vector<1x128x128xf32> to vector<128x128xf32>
    %cst_95 = arith.constant dense<0.000000e+00> : vector<16x128xf32>
    %218 = tpu.matmul %215, %217, %cst_95 {dimension_numbers = #tpu.dot_dimension_numbers<[1], [0], [0], [1], [0, 0, 1, 1], [], []>} : vector<16x128xf32>, vector<128x128xf32>, vector<16x128xf32> -> vector<16x128xf32>
    %c1_96 = arith.constant 1 : index
    %c0_97 = arith.constant 0 : index
    %c0_98 = arith.constant 0 : index
    %219 = vector.load %arg7[%c1_96, %c0_97, %c0_98] : memref<2x1x128xf32, #tpu.memory_space<vmem>>, vector<1x1x128xf32>
    %220 = vector.shape_cast %219 : vector<1x1x128xf32> to vector<1x128xf32>
    %221 = vector.broadcast %220 : vector<1x128xf32> to vector<16x128xf32>
    %222 = arith.addf %218, %221 : vector<16x128xf32>
    %223 = arith.addf %222, %165 : vector<16x128xf32>
    %c1_99 = arith.constant 1 : index
    %c0_100 = arith.constant 0 : index
    %c0_101 = arith.constant 0 : index
    %224 = vector.load %arg8[%c1_99, %c0_100, %c0_101] : memref<2x1x128xf32, #tpu.memory_space<vmem>>, vector<1x1x128xf32>
    %225 = vector.shape_cast %224 : vector<1x1x128xf32> to vector<1x128xf32>
    %c1_102 = arith.constant 1 : index
    %c0_103 = arith.constant 0 : index
    %c0_104 = arith.constant 0 : index
    %226 = vector.load %arg9[%c1_102, %c0_103, %c0_104] : memref<2x1x128xf32, #tpu.memory_space<vmem>>, vector<1x1x128xf32>
    %227 = vector.shape_cast %226 : vector<1x1x128xf32> to vector<1x128xf32>
    %cst_105 = arith.constant dense<0.000000e+00> : vector<16xf32>
    %228 = vector.multi_reduction <add>, %223, %cst_105 [1] : vector<16x128xf32> to vector<16xf32>
    %229 = vector.shape_cast %228 : vector<16xf32> to vector<16x1xf32>
    %cst_106 = arith.constant 1.280000e+02 : f32
    %230 = vector.broadcast %cst_106 : f32 to vector<16x1xf32>
    %231 = arith.divf %229, %230 : vector<16x1xf32>
    %232 = vector.broadcast %231 : vector<16x1xf32> to vector<16x128xf32>
    %233 = arith.subf %223, %232 : vector<16x128xf32>
    %234 = arith.mulf %233, %233 : vector<16x128xf32>
    %cst_107 = arith.constant dense<0.000000e+00> : vector<16xf32>
    %235 = vector.multi_reduction <add>, %234, %cst_107 [1] : vector<16x128xf32> to vector<16xf32>
    %236 = vector.shape_cast %235 : vector<16xf32> to vector<16x1xf32>
    %cst_108 = arith.constant 1.280000e+02 : f32
    %237 = vector.broadcast %cst_108 : f32 to vector<16x1xf32>
    %238 = arith.divf %236, %237 : vector<16x1xf32>
    %239 = vector.broadcast %231 : vector<16x1xf32> to vector<16x128xf32>
    %240 = arith.subf %223, %239 : vector<16x128xf32>
    %cst_109 = arith.constant 9.99999996E-13 : f32
    %241 = vector.broadcast %cst_109 : f32 to vector<16x1xf32>
    %242 = arith.addf %238, %241 : vector<16x1xf32>
    %243 = math.rsqrt %242 : vector<16x1xf32>
    %244 = vector.broadcast %243 : vector<16x1xf32> to vector<16x128xf32>
    %245 = arith.mulf %240, %244 : vector<16x128xf32>
    %246 = vector.broadcast %225 : vector<1x128xf32> to vector<16x128xf32>
    %247 = arith.mulf %245, %246 : vector<16x128xf32>
    %248 = vector.broadcast %227 : vector<1x128xf32> to vector<16x128xf32>
    %249 = arith.addf %247, %248 : vector<16x128xf32>
    %c1_110 = arith.constant 1 : index
    %c0_111 = arith.constant 0 : index
    %c0_112 = arith.constant 0 : index
    %250 = vector.load %arg10[%c1_110, %c0_111, %c0_112] : memref<2x128x512xf32, #tpu.memory_space<vmem>>, vector<1x128x512xf32>
    %251 = vector.shape_cast %250 : vector<1x128x512xf32> to vector<128x512xf32>
    %cst_113 = arith.constant dense<0.000000e+00> : vector<16x512xf32>
    %252 = tpu.matmul %249, %251, %cst_113 {dimension_numbers = #tpu.dot_dimension_numbers<[1], [0], [0], [1], [0, 0, 1, 1], [], []>} : vector<16x128xf32>, vector<128x512xf32>, vector<16x512xf32> -> vector<16x512xf32>
    %c1_114 = arith.constant 1 : index
    %c0_115 = arith.constant 0 : index
    %c0_116 = arith.constant 0 : index
    %253 = vector.load %arg11[%c1_114, %c0_115, %c0_116] : memref<2x1x512xf32, #tpu.memory_space<vmem>>, vector<1x1x512xf32>
    %254 = vector.shape_cast %253 : vector<1x1x512xf32> to vector<1x512xf32>
    %255 = vector.broadcast %254 : vector<1x512xf32> to vector<16x512xf32>
    %256 = arith.addf %252, %255 : vector<16x512xf32>
    %cst_117 = arith.constant 5.000000e-01 : f32
    %257 = vector.broadcast %cst_117 : f32 to vector<16x512xf32>
    %258 = arith.mulf %257, %256 : vector<16x512xf32>
    %cst_118 = arith.constant 4.471500e-02 : f32
    %259 = vector.broadcast %cst_118 : f32 to vector<16x512xf32>
    %260 = arith.mulf %259, %256 : vector<16x512xf32>
    %261 = arith.mulf %260, %256 : vector<16x512xf32>
    %262 = arith.mulf %261, %256 : vector<16x512xf32>
    %263 = arith.addf %256, %262 : vector<16x512xf32>
    %cst_119 = arith.constant 0.797884583 : f32
    %264 = vector.broadcast %cst_119 : f32 to vector<16x512xf32>
    %265 = arith.mulf %264, %263 : vector<16x512xf32>
    %266 = math.tanh %265 : vector<16x512xf32>
    %cst_120 = arith.constant 1.000000e+00 : f32
    %267 = vector.broadcast %cst_120 : f32 to vector<16x512xf32>
    %268 = arith.addf %267, %266 : vector<16x512xf32>
    %269 = arith.mulf %258, %268 : vector<16x512xf32>
    %c1_121 = arith.constant 1 : index
    %c0_122 = arith.constant 0 : index
    %c0_123 = arith.constant 0 : index
    %270 = vector.load %arg12[%c1_121, %c0_122, %c0_123] : memref<2x512x128xf32, #tpu.memory_space<vmem>>, vector<1x512x128xf32>
    %271 = vector.shape_cast %270 : vector<1x512x128xf32> to vector<512x128xf32>
    %cst_124 = arith.constant dense<0.000000e+00> : vector<16x128xf32>
    %272 = tpu.matmul %269, %271, %cst_124 {dimension_numbers = #tpu.dot_dimension_numbers<[1], [0], [0], [1], [0, 0, 1, 1], [], []>} : vector<16x512xf32>, vector<512x128xf32>, vector<16x128xf32> -> vector<16x128xf32>
    %c1_125 = arith.constant 1 : index
    %c0_126 = arith.constant 0 : index
    %c0_127 = arith.constant 0 : index
    %273 = vector.load %arg13[%c1_125, %c0_126, %c0_127] : memref<2x1x128xf32, #tpu.memory_space<vmem>>, vector<1x1x128xf32>
    %274 = vector.shape_cast %273 : vector<1x1x128xf32> to vector<1x128xf32>
    %275 = vector.broadcast %274 : vector<1x128xf32> to vector<16x128xf32>
    %276 = arith.addf %272, %275 : vector<16x128xf32>
    %277 = arith.addf %276, %249 : vector<16x128xf32>
    %c1_128 = arith.constant 1 : index
    %c0_129 = arith.constant 0 : index
    %c0_130 = arith.constant 0 : index
    %278 = vector.load %arg14[%c1_128, %c0_129, %c0_130] : memref<2x1x128xf32, #tpu.memory_space<vmem>>, vector<1x1x128xf32>
    %279 = vector.shape_cast %278 : vector<1x1x128xf32> to vector<1x128xf32>
    %c1_131 = arith.constant 1 : index
    %c0_132 = arith.constant 0 : index
    %c0_133 = arith.constant 0 : index
    %280 = vector.load %arg15[%c1_131, %c0_132, %c0_133] : memref<2x1x128xf32, #tpu.memory_space<vmem>>, vector<1x1x128xf32>
    %281 = vector.shape_cast %280 : vector<1x1x128xf32> to vector<1x128xf32>
    %cst_134 = arith.constant dense<0.000000e+00> : vector<16xf32>
    %282 = vector.multi_reduction <add>, %277, %cst_134 [1] : vector<16x128xf32> to vector<16xf32>
    %283 = vector.shape_cast %282 : vector<16xf32> to vector<16x1xf32>
    %cst_135 = arith.constant 1.280000e+02 : f32
    %284 = vector.broadcast %cst_135 : f32 to vector<16x1xf32>
    %285 = arith.divf %283, %284 : vector<16x1xf32>
    %286 = vector.broadcast %285 : vector<16x1xf32> to vector<16x128xf32>
    %287 = arith.subf %277, %286 : vector<16x128xf32>
    %288 = arith.mulf %287, %287 : vector<16x128xf32>
    %cst_136 = arith.constant dense<0.000000e+00> : vector<16xf32>
    %289 = vector.multi_reduction <add>, %288, %cst_136 [1] : vector<16x128xf32> to vector<16xf32>
    %290 = vector.shape_cast %289 : vector<16xf32> to vector<16x1xf32>
    %cst_137 = arith.constant 1.280000e+02 : f32
    %291 = vector.broadcast %cst_137 : f32 to vector<16x1xf32>
    %292 = arith.divf %290, %291 : vector<16x1xf32>
    %293 = vector.broadcast %285 : vector<16x1xf32> to vector<16x128xf32>
    %294 = arith.subf %277, %293 : vector<16x128xf32>
    %cst_138 = arith.constant 9.99999996E-13 : f32
    %295 = vector.broadcast %cst_138 : f32 to vector<16x1xf32>
    %296 = arith.addf %292, %295 : vector<16x1xf32>
    %297 = math.rsqrt %296 : vector<16x1xf32>
    %298 = vector.broadcast %297 : vector<16x1xf32> to vector<16x128xf32>
    %299 = arith.mulf %294, %298 : vector<16x128xf32>
    %300 = vector.broadcast %279 : vector<1x128xf32> to vector<16x128xf32>
    %301 = arith.mulf %299, %300 : vector<16x128xf32>
    %302 = vector.broadcast %281 : vector<1x128xf32> to vector<16x128xf32>
    %303 = arith.addf %301, %302 : vector<16x128xf32>
    %304 = vector.extract_strided_slice %303 {offsets = [0, 0], sizes = [1, 128], strides = [1, 1]} : vector<16x128xf32> to vector<1x128xf32>
    %305 = vector.extract_strided_slice %303 {offsets = [8, 0], sizes = [1, 128], strides = [1, 1]} : vector<16x128xf32> to vector<1x128xf32>
    %306 = tpu.concatenate %304, %305 in 0 : vector<1x128xf32>, vector<1x128xf32> -> vector<2x128xf32>
    %c0_139 = arith.constant 0 : index
    %c0_140 = arith.constant 0 : index
    %307 = vector.load %arg16[%c0_139, %c0_140] : memref<128x128xf32, #tpu.memory_space<vmem>>, vector<128x128xf32>
    %cst_141 = arith.constant dense<0.000000e+00> : vector<2x128xf32>
    %308 = tpu.matmul %306, %307, %cst_141 {dimension_numbers = #tpu.dot_dimension_numbers<[1], [0], [0], [1], [0, 0, 1, 1], [], []>} : vector<2x128xf32>, vector<128x128xf32>, vector<2x128xf32> -> vector<2x128xf32>
    %c0_142 = arith.constant 0 : index
    %c0_143 = arith.constant 0 : index
    %309 = vector.load %arg17[%c0_142, %c0_143] : memref<1x128xf32, #tpu.memory_space<vmem>>, vector<1x128xf32>
    %310 = vector.broadcast %309 : vector<1x128xf32> to vector<2x128xf32>
    %311 = arith.addf %308, %310 : vector<2x128xf32>
    %312 = math.tanh %311 : vector<2x128xf32>
    %c0_144 = arith.constant 0 : index
    %c0_145 = arith.constant 0 : index
    %313 = vector.load %arg18[%c0_144, %c0_145] : memref<128x128xf32, #tpu.memory_space<vmem>>, vector<128x128xf32>
    %cst_146 = arith.constant dense<0.000000e+00> : vector<2x128xf32>
    %314 = tpu.matmul %312, %313, %cst_146 {dimension_numbers = #tpu.dot_dimension_numbers<[1], [0], [0], [1], [0, 0, 1, 1], [], []>} : vector<2x128xf32>, vector<128x128xf32>, vector<2x128xf32> -> vector<2x128xf32>
    %c0_147 = arith.constant 0 : index
    %c0_148 = arith.constant 0 : index
    %315 = vector.load %arg19[%c0_147, %c0_148] : memref<1x128xf32, #tpu.memory_space<vmem>>, vector<1x128xf32>
    %316 = vector.broadcast %315 : vector<1x128xf32> to vector<2x128xf32>
    %317 = arith.addf %314, %316 : vector<2x128xf32>
    %cst_149 = arith.constant 0.000000e+00 : f32
    %318 = vector.broadcast %cst_149 : f32 to vector<2x128xf32>
    %319 = arith.maximumf %317, %318 : vector<2x128xf32>
    %c0_150 = arith.constant 0 : index
    %c0_151 = arith.constant 0 : index
    %320 = vector.load %arg20[%c0_150, %c0_151] : memref<2x128xf32, #tpu.memory_space<vmem>>, vector<2x128xf32>
    tpu.vector_store %arg20[%c0_150, %c0_151], %319 {strides = array<i32>} : memref<2x128xf32, #tpu.memory_space<vmem>>, vector<2x128xf32>,
    return
  }
}

</mosaic_0001>

<bundles_post_ra>
// kernel: model2_forward.1
= control target key start
LH: loop header
LB: loop body
LE: loop exit
PB: predicated region body
PF: predicated region fallthrough
CT: control target
= control target key end

     0   :  { %s5970_s0 = inlined_call_operand.vmem [shape: f32[16,128], index: 0, kind: input, shape index: {}]   ;;  %s5971_s1 = inlined_call_operand.vmem [shape: f32[2,1,8], index: 1, kind: input, shape index: {}]   ;;  %s5972_s2 = inlined_call_operand.vmem [shape: f32[1,128], index: 2, kind: input, shape index: {}]   ;;  %s5973_s3 = inlined_call_operand.vmem [shape: f32[1,128], index: 3, kind: input, shape index: {}]   ;;  %s5974_s4 = inlined_call_operand.hbm [shape: f32[2,128,384], index: 4, kind: input, shape index: {}]   ;;  %s5975_s5 = inlined_call_operand.vmem [shape: f32[2,1,384], index: 5, kind: input, shape index: {}]   ;;  %s5976_s6 = inlined_call_operand.hbm [shape: f32[2,128,128], index: 6, kind: input, shape index: {}]   ;;  %s5977_s7 = inlined_call_operand.vmem [shape: f32[2,1,128], index: 7, kind: input, shape index: {}]   ;;  %s5978_s8 = inlined_call_operand.hbm [shape: f32[2,1,128], index: 8, kind: input, shape index: {}]   ;;  %s5979_s9 = inlined_call_operand.hbm [shape: f32[2,1,128], index: 9, kind: input, shape index: {}]   ;;  %s5980_s10 = inlined_call_operand.hbm [shape: f32[2,128,512], index: 10, kind: input, shape index: {}]   ;;  %s5981_s11 = inlined_call_operand.vmem [shape: f32[2,1,512], index: 11, kind: input, shape index: {}]   ;;  %s5982_s12 = inlined_call_operand.hbm [shape: f32[2,512,128], index: 12, kind: input, shape index: {}]   ;;  %s5983_s13 = inlined_call_operand.vmem [shape: f32[2,1,128], index: 13, kind: input, shape index: {}]   ;;  %s5984_s14 = inlined_call_operand.hbm [shape: f32[2,1,128], index: 14, kind: input, shape index: {}]   ;;  %s5985_s15 = inlined_call_operand.hbm [shape: f32[2,1,128], index: 15, kind: input, shape index: {}]   ;;  %s5986_s16 = inlined_call_operand.vmem [shape: f32[128,128], index: 16, kind: input, shape index: {}]   ;;  %s5987_s17 = inlined_call_operand.hbm [shape: f32[1,128], index: 17, kind: input, shape index: {}]   ;;  %s5988_s18 = inlined_call_operand.vmem [shape: f32[128,128], index: 18, kind: input, shape index: {}]   ;;  %s5989_s19 = inlined_call_operand.hbm [shape: f32[1,128], index: 19, kind: input, shape index: {}]   ;;  %s5990_s20 = inlined_call_operand.hbm [shape: f32[2,128], index: 20, kind: output, shape index: {}]  }
   0x1   :  { %5995 = sst [smem:[#allocation27_spill]] %s5970_s0 }
   0x2   :  { %5996 = sst [smem:[#allocation28_spill]] %s5971_s1 }
   0x3   :  { %5997 = sst [smem:[#allocation29_spill]] %s5972_s2 }
   0x4   :  { %5998 = sst [smem:[#allocation30_spill]] %s5973_s3 }
   0x5   :  { %5999 = sst [smem:[#allocation31_spill]] %s5974_s4 }
   0x6   :  { %6000 = sst [smem:[#allocation32_spill]] %s5990_s20 }
   0x7   :  { %25 = vsyncpa [#allocation3], 0 }
   0x8   :  { %26 = vsyncpa [#allocation6], 0 }
   0x9   :  { %27 = vsyncpa [#allocation9], 0 }
   0xa   :  { %28 = vsyncpa [#allocation12], 0 }
   0xb   :  { %29 = vsyncpa [#allocation15], 0 }
   0xc   :  { %30 = vsyncpa [#allocation18], 0 }
   0xd   :  { %31 = vsyncpa [#allocation4], 0  ;;  %s5186_s1 = smov [#allocation5]   ;;  %s4930_s2 = scalar_lea.hbm %s5976_s6, 4096 }
   0xe   :  { %s59_s22 = sshll.u32 %s5186_s1, 4  ;;  %p4931_p0 = scmp.ne.s32.totalorder %s5976_s6, %s4930_s2  ;;  %s60_s22 = int_to_ptr.vmem [resolvable:$true] %s59_s22 }
   0xf   :  { %p4934_p1 = scmp.lt.u32.totalorder %s4930_s2, %s5976_s6 }
  0x11   :  { %p4936_p2 = pnand %p4934_p1, %p4931_p0 }
  0x13   :  { %4939 = shalt.err (!%p4936_p2)
}
  0x14   :  { %s4940_s28 = scalar_lea.vmem %s60_s22, 4096  ;;  %p4945_p4 = scmp.lt.s32.totalorder %s60_s22, %s60_s22 }
  0x15   :  { %p4941_p3 = scmp.ne.s32.totalorder %s60_s22, %s4940_s28  ;;  %p4946_p5 = scmp.lt.s32.totalorder %s4940_s28, %s4940_s28 }
  0x17   :  { %p4947_p6 = por %p4946_p5, %p4945_p4 }
  0x19   :  { %p4948_p7 = pnand %p4947_p6, %p4941_p3 }
  0x1b   :  { %4951 = shalt.err (!%p4948_p7)
}
  0x1c   :  { %s5187_s4 = smov 128   ;;  %s5188_s29 = smov 8  }
  0x1d   :  { %65 = dma.hbm_to_vmem [thread:$0]  %s5976_s6, 4096, %s60_s22, [#allocation6], %s5187_s4, %s5187_s4, %s5188_s29  }
  0x1e   :  { %s5189_s21 = smov [#allocation8]   ;;  %s5190_s23 = smov [#allocation11]  }
  0x1f   :  { %s85_s1 = sshll.u32 %s5189_s21, 4  ;;  %s111_s24 = sshll.u32 %s5190_s23, 4  ;;  %s86_s1 = int_to_ptr.vmem [resolvable:$true] %s85_s1  ;;  %s112_s24 = int_to_ptr.vmem [resolvable:$true] %s111_s24 }
  0x20   :  { %s4952_s3 = scalar_lea.hbm %s5979_s9, 32 }
  0x21   :  { %p4953_p8 = scmp.ne.s32.totalorder %s5979_s9, %s4952_s3  ;;  %p4956_p9 = scmp.lt.u32.totalorder %s4952_s3, %s5979_s9 }
  0x23   :  { %p4958_p10 = pnand %p4956_p9, %p4953_p8 }
  0x25   :  { %4961 = shalt.err (!%p4958_p10)
}
  0x26   :  { %s4962_s6 = scalar_lea.vmem %s86_s1, 32  ;;  %p4967_p12 = scmp.lt.s32.totalorder %s86_s1, %s86_s1 }
  0x27   :  { %p4963_p11 = scmp.ne.s32.totalorder %s86_s1, %s4962_s6  ;;  %p4968_p13 = scmp.lt.s32.totalorder %s4962_s6, %s4962_s6 }
  0x29   :  { %p4969_p0 = por %p4968_p13, %p4967_p12 }
  0x2b   :  { %p4970_p1 = pnand %p4969_p0, %p4963_p11 }
  0x2d   :  { %4973 = shalt.err (!%p4970_p1)
}
  0x2e   :  { %s5191_s22 = smov 16   ;;  %s5192_s30 = smov 1  }
  0x2f   :  { %91 = dma.hbm_to_vmem [thread:$0]  %s5979_s9, 32, %s86_s1, [#allocation9], %s5191_s22, %s5191_s22, %s5192_s30  }
  0x30   :  { %s4974_s2 = scalar_lea.hbm %s5982_s12, 16384 }
  0x31   :  { %p4975_p2 = scmp.ne.s32.totalorder %s5982_s12, %s4974_s2  ;;  %p4978_p3 = scmp.lt.u32.totalorder %s4974_s2, %s5982_s12 }
  0x33   :  { %p4980_p4 = pnand %p4978_p3, %p4975_p2 }
  0x35   :  { %4983 = shalt.err (!%p4980_p4)
}
  0x36   :  { %s4984_s28 = scalar_lea.vmem %s112_s24, 16384  ;;  %p4989_p6 = scmp.lt.s32.totalorder %s112_s24, %s112_s24 }
  0x37   :  { %p4985_p5 = scmp.ne.s32.totalorder %s112_s24, %s4984_s28  ;;  %p4990_p7 = scmp.lt.s32.totalorder %s4984_s28, %s4984_s28 }
  0x39   :  { %p4991_p8 = por %p4990_p7, %p4989_p6 }
  0x3b   :  { %p4992_p9 = pnand %p4991_p8, %p4985_p5 }
  0x3d   :  { %4995 = shalt.err (!%p4992_p9)
}
  0x3e   :  { %117 = dma.hbm_to_vmem [thread:$0]  %s5982_s12, 16384, %s112_s24, [#allocation12], %s5187_s4, %s5187_s4, %s5188_s29  }
  0x3f   :  { %s5193_s6 = smov [#allocation14]   ;;  %s5194_s21 = smov [#allocation2]  }
  0x40   :  { %s137_s0 = sshll.u32 %s5193_s6, 4  ;;  %s45_s20 = sshll.u32 %s5194_s21, 4  ;;  %s138_s0 = int_to_ptr.vmem [resolvable:$true] %s137_s0  ;;  %s46_s20 = int_to_ptr.vmem [resolvable:$true] %s45_s20 }
  0x41   :  { %s4996_s25 = scalar_lea.hbm %s5985_s15, 32 }
  0x42   :  { %p4997_p10 = scmp.ne.s32.totalorder %s5985_s15, %s4996_s25  ;;  %p5000_p11 = scmp.lt.u32.totalorder %s4996_s25, %s5985_s15 }
  0x44   :  { %p5002_p12 = pnand %p5000_p11, %p4997_p10 }
  0x46   :  { %5005 = shalt.err (!%p5002_p12)
}
  0x47   :  { %s5006_s12 = scalar_lea.vmem %s138_s0, 32  ;;  %p5011_p0 = scmp.lt.s32.totalorder %s138_s0, %s138_s0 }
  0x48   :  { %p5007_p13 = scmp.ne.s32.totalorder %s138_s0, %s5006_s12  ;;  %p5012_p1 = scmp.lt.s32.totalorder %s5006_s12, %s5006_s12 }
  0x4a   :  { %p5013_p2 = por %p5012_p1, %p5011_p0 }
  0x4c   :  { %p5014_p3 = pnand %p5013_p2, %p5007_p13 }
  0x4e   :  { %5017 = shalt.err (!%p5014_p3)
}
  0x4f   :  { %143 = dma.hbm_to_vmem [thread:$0]  %s5985_s15, 32, %s138_s0, [#allocation15], %s5191_s22, %s5191_s22, %s5192_s30  }
  0x50   :  { %s6001_s1 = sld [smem:[#allocation31_spill]] }
  0x56   :  { %s5018_s6 = scalar_lea.hbm %s6001_s1, 12288 }
  0x57   :  { %p5019_p4 = scmp.ne.s32.totalorder %s6001_s1, %s5018_s6  ;;  %p5022_p5 = scmp.lt.u32.totalorder %s5018_s6, %s6001_s1 }
  0x59   :  { %p5024_p6 = pnand %p5022_p5, %p5019_p4 }
  0x5b   :  { %5027 = shalt.err (!%p5024_p6)
}
  0x5c   :  { %s5028_s3 = scalar_lea.vmem %s46_s20, 12288  ;;  %p5033_p8 = scmp.lt.s32.totalorder %s46_s20, %s46_s20 }
  0x5d   :  { %p5029_p7 = scmp.ne.s32.totalorder %s46_s20, %s5028_s3  ;;  %p5034_p9 = scmp.lt.s32.totalorder %s5028_s3, %s5028_s3 }
  0x5f   :  { %p5035_p10 = por %p5034_p9, %p5033_p8 }
  0x61   :  { %p5036_p11 = pnand %p5035_p10, %p5029_p7 }
  0x63   :  { %5039 = shalt.err (!%p5036_p11)
}
  0x64   :  { %s5195_s15 = smov 384   ;;  %s5196_s0 = smov 24  }
  0x65   :  { %51 = dma.hbm_to_vmem [thread:$0]  %s6001_s1, 12288, %s46_s20, [#allocation3], %s5195_s15, %s5195_s15, %s5196_s0  }
  0x66   :  { %s5197_s28 = smov [#allocation7]   ;;  %s5198_s4 = smov [#allocation10]  }
  0x67   :  { %s73_s12 = sshll.u32 %s5197_s28, 4  ;;  %s97_s29 = sshll.u32 %s5198_s4, 4  ;;  %s74_s12 = int_to_ptr.vmem [resolvable:$true] %s73_s12  ;;  %s98_s29 = int_to_ptr.vmem [resolvable:$true] %s97_s29 }
  0x68   :  { %s5040_s6 = scalar_lea.hbm %s5978_s8, 32 }
  0x69   :  { %p5041_p12 = scmp.ne.s32.totalorder %s5978_s8, %s5040_s6  ;;  %p5044_p13 = scmp.lt.u32.totalorder %s5040_s6, %s5978_s8 }
  0x6b   :  { %p5046_p0 = pnand %p5044_p13, %p5041_p12 }
  0x6d   :  { %5049 = shalt.err (!%p5046_p0)
}
  0x6e   :  { %s5050_s20 = scalar_lea.vmem %s74_s12, 32  ;;  %p5055_p2 = scmp.lt.s32.totalorder %s74_s12, %s74_s12 }
  0x6f   :  { %p5051_p1 = scmp.ne.s32.totalorder %s74_s12, %s5050_s20  ;;  %p5056_p3 = scmp.lt.s32.totalorder %s5050_s20, %s5050_s20 }
  0x71   :  { %p5057_p4 = por %p5056_p3, %p5055_p2 }
  0x73   :  { %p5058_p5 = pnand %p5057_p4, %p5051_p1 }
  0x75   :  { %5061 = shalt.err (!%p5058_p5)
}
  0x76   :  { %79 = dma.hbm_to_vmem [thread:$0]  %s5978_s8, 32, %s74_s12, [#allocation6], %s5191_s22, %s5191_s22, %s5192_s30  }
  0x77   :  { %s5062_s26 = scalar_lea.hbm %s5980_s10, 16384 }
  0x78   :  { %p5063_p6 = scmp.ne.s32.totalorder %s5980_s10, %s5062_s26  ;;  %p5066_p7 = scmp.lt.u32.totalorder %s5062_s26, %s5980_s10 }
  0x7a   :  { %p5068_p8 = pnand %p5066_p7, %p5063_p6 }
  0x7c   :  { %5071 = shalt.err (!%p5068_p8)
}
  0x7d   :  { %s5072_s9 = scalar_lea.vmem %s98_s29, 16384  ;;  %p5077_p10 = scmp.lt.s32.totalorder %s98_s29, %s98_s29 }
  0x7e   :  { %p5073_p9 = scmp.ne.s32.totalorder %s98_s29, %s5072_s9  ;;  %p5078_p11 = scmp.lt.s32.totalorder %s5072_s9, %s5072_s9 }
  0x80   :  { %p5079_p12 = por %p5078_p11, %p5077_p10 }
  0x82   :  { %p5080_p13 = pnand %p5079_p12, %p5073_p9 }
  0x84   :  { %5083 = shalt.err (!%p5080_p13)
}
  0x85   :  { %s5199_s8 = smov 512   ;;  %s5200_s12 = smov 32  }
  0x86   :  { %103 = dma.hbm_to_vmem [thread:$0]  %s5980_s10, 16384, %s98_s29, [#allocation9], %s5199_s8, %s5199_s8, %s5200_s12  }
  0x87   :  { %s5201_s23 = smov [#allocation13]   ;;  %s5202_s25 = smov [#allocation16]  }
  0x88   :  { %s125_s2 = sshll.u32 %s5201_s23, 4  ;;  %s152_s20 = sshll.u32 %s5202_s25, 4  ;;  %s126_s2 = int_to_ptr.vmem [resolvable:$true] %s125_s2  ;;  %s153_s20 = int_to_ptr.vmem [resolvable:$true] %s152_s20 }
  0x89   :  { %s5084_s15 = scalar_lea.hbm %s5984_s14, 32 }
  0x8a   :  { %p5085_p0 = scmp.ne.s32.totalorder %s5984_s14, %s5084_s15  ;;  %p5088_p1 = scmp.lt.u32.totalorder %s5084_s15, %s5984_s14 }
  0x8c   :  { %p5090_p2 = pnand %p5088_p1, %p5085_p0 }
  0x8e   :  { %5093 = shalt.err (!%p5090_p2)
}
  0x8f   :  { %s5094_s10 = scalar_lea.vmem %s126_s2, 32  ;;  %p5099_p4 = scmp.lt.s32.totalorder %s126_s2, %s126_s2 }
  0x90   :  { %p5095_p3 = scmp.ne.s32.totalorder %s126_s2, %s5094_s10  ;;  %p5100_p5 = scmp.lt.s32.totalorder %s5094_s10, %s5094_s10 }
  0x92   :  { %p5101_p6 = por %p5100_p5, %p5099_p4 }
  0x94   :  { %p5102_p7 = pnand %p5101_p6, %p5095_p3 }
  0x96   :  { %5105 = shalt.err (!%p5102_p7)
}
  0x97   :  { %131 = dma.hbm_to_vmem [thread:$0]  %s5984_s14, 32, %s126_s2, [#allocation12], %s5191_s22, %s5191_s22, %s5192_s30  }
  0x98   :  { %s5106_s8 = scalar_lea.hbm %s5987_s17, 16 }
  0x99   :  { %p5107_p8 = scmp.ne.s32.totalorder %s5987_s17, %s5106_s8  ;;  %p5110_p9 = scmp.lt.u32.totalorder %s5106_s8, %s5987_s17 }
  0x9b   :  { %p5112_p10 = pnand %p5110_p9, %p5107_p8 }
  0x9d   :  { %5115 = shalt.err (!%p5112_p10)
}
  0x9e   :  { %s5116_s25 = scalar_lea.vmem %s153_s20, 16  ;;  %s5120_s1 = scalar_lea.vmem %s153_s20, 32 }
  0x9f   :  { %p5117_p11 = scmp.ne.s32.totalorder %s153_s20, %s5116_s25  ;;  %p5121_p12 = scmp.lt.s32.totalorder %s153_s20, %s153_s20 }
  0xa0   :  { %p5122_p13 = scmp.lt.s32.totalorder %s5120_s1, %s5116_s25 }
  0xa2   :  { %p5123_p0 = por %p5122_p13, %p5121_p12 }
  0xa4   :  { %p5124_p1 = pnand %p5123_p0, %p5117_p11 }
  0xa6   :  { %5127 = shalt.err (!%p5124_p1)
}
  0xa7   :  { %155 = dma.hbm_to_vmem [thread:$0]  %s5987_s17, 16, %s153_s20, [#allocation15]  }
  0xa8   :  { %s5203_s30 = smov [#allocation17]   ;;  %s5128_s0 = scalar_lea.hbm %s5989_s19, 16 }
  0xa9   :  { %s164_s2 = sshll.u32 %s5203_s30, 4  ;;  %p5129_p2 = scmp.ne.s32.totalorder %s5989_s19, %s5128_s0  ;;  %s165_s2 = int_to_ptr.vmem [resolvable:$true] %s164_s2 }
  0xaa   :  { %p5132_p3 = scmp.lt.u32.totalorder %s5128_s0, %s5989_s19 }
  0xac   :  { %p5134_p4 = pnand %p5132_p3, %p5129_p2 }
  0xae   :  { %5137 = shalt.err (!%p5134_p4)
}
  0xaf   :  { %s5138_s29 = scalar_lea.vmem %s165_s2, 16  ;;  %s5142_s17 = scalar_lea.vmem %s165_s2, 32 }
  0xb0   :  { %p5139_p5 = scmp.ne.s32.totalorder %s165_s2, %s5138_s29  ;;  %p5143_p6 = scmp.lt.s32.totalorder %s165_s2, %s165_s2 }
  0xb1   :  { %p5144_p7 = scmp.lt.s32.totalorder %s5142_s17, %s5138_s29 }
  0xb3   :  { %p5145_p8 = por %p5144_p7, %p5143_p6 }
  0xb5   :  { %p5146_p9 = pnand %p5145_p8, %p5139_p5 }
  0xb7   :  { %5149 = shalt.err (!%p5146_p9)
}
  0xb8   :  { %167 = dma.hbm_to_vmem [thread:$0]  %s5989_s19, 16, %s165_s2, [#allocation18]  }
  0xb9   :  { %5172 = dma.done.wait [#allocation3], 12288  }
  0xba   :  { %5173 = vsyncadd [#allocation3], 4294955008 }
  0xbb   :  { %5174 = dma.done.wait [#allocation6], 4128  }
  0xbc   :  { %5175 = vsyncadd [#allocation6], 4294963168 }
  0xbd   :  { %5176 = dma.done.wait [#allocation9], 16416  }
  0xbe   :  { %5177 = vsyncadd [#allocation9], 4294950880 }
  0xbf   :  { %5178 = dma.done.wait [#allocation12], 16416  }
  0xc0   :  { %5179 = vsyncadd [#allocation12], 4294950880 }
  0xc1   :  { %5180 = dma.done.wait [#allocation15], 48  }
  0xc2   :  { %5181 = vsyncadd [#allocation15], 4294967248 }
  0xc3   :  { %5182 = dma.done.wait [#allocation18], 16  }
  0xc4   :  { %5183 = vsyncadd [#allocation18], 4294967280  ;;  %s6002_s8 = sld [smem:[#allocation27_spill]]  ;;  %v256_v2 = vld [vmem:[#allocation2 + $0x8] sm:$0xff]  ;;  %v259_v3 = vld [vmem:[#allocation2 + $0x20] sm:$0xff]  ;;  %s6003_s23 = sld [smem:[#allocation29_spill]] }
  0xc5   :  { %v255_v4 = vld [vmem:[#allocation2] sm:$0xff]  ;;  %v4313_v5 = vpack.c.bf16 %v259_v3, %v256_v2  ;;  %v258_v6 = vld [vmem:[#allocation2 + $0x18] sm:$0xff]  ;;  %v265_v8 = vld [vmem:[#allocation2 + $0x50] sm:$0xff]  ;;  %s6004_s14 = sld [smem:[#allocation30_spill]]  ;;  %vm5205_vm0 = vmmov 0   ;;  %vm472_vm1 = vcmask 523264  }
  0xc6   :  { %v262_v7 = vld [vmem:[#allocation2 + $0x38] sm:$0xff]  ;;  %v4315_v9 = vpack.c.bf16 %v258_v6, %v255_v4  ;;  %v257_v11 = vld [vmem:[#allocation2 + $0x10] sm:$0xff]  ;;  %v260_v12 = vld [vmem:[#allocation2 + $0x28] sm:$0xff]  ;;  %v5204_v4 = vmov 0.0   ;;  %s6005_s15 = sld [smem:[#allocation28_spill]]  ;;  %vm629_vm2 = vcmask 64512  }
  0xc7   :  { %v4317_v10 = vpack.c.bf16 %v265_v8, %v262_v7  ;;  %v261_v13 = vld [vmem:[#allocation2 + $0x30] sm:$0xff]  ;;  %4314 = vmatprep.subr.bf16.mxu0 %v4313_v5  ;;  %v4345_v14 = vpack.c.bf16 %v260_v12, %v257_v11  ;;  %v264_v15 = vld [vmem:[#allocation2 + $0x48] sm:$0xff]  ;;  %v271_v17 = vld [vmem:[#allocation2 + $0x80] sm:$0xff]  ;;  %384 = vmatprep.mubr.f32.mxu0 %v5204_v4  ;;  %s5206_s27 = smov 64   ;;  %vm3476_vm3 = vcmask 1040384   ;;  %s5208_s2 = smov [#allocation19]  }
  0xc8   :  { %v268_v16 = vld [vmem:[#allocation2 + $0x68] sm:$0xff]  ;;  %4316 = vmatpush1.bf16.msra.mxu0 %v4315_v9  ;;  %v4319_v18 = vpack.c.bf16 %v264_v15, %v261_v13  ;;  %v263_v19 = vld [vmem:[#allocation2 + $0x40] sm:$0xff]  ;;  %v266_v20 = vld [vmem:[#allocation2 + $0x58] sm:$0xff]  ;;  %s3673_s3 = sshll.u32 %s5208_s2, 4  ;;  %s3674_s3 = int_to_ptr.vmem [resolvable:$true] %s3673_s3 }
  0xc9   :  { %4318 = vmatprep.subr.bf16.mxu0 %v4317_v10  ;;  %4346 = vmatprep.subr.bf16.mxu1 %v4345_v14  ;;  %v4321_v21 = vpack.c.bf16 %v271_v17, %v268_v16  ;;  %v4349_v22 = vpack.c.bf16 %v266_v20, %v263_v19  ;;  %v267_v23 = vld [vmem:[#allocation2 + $0x60] sm:$0xff]  ;;  %v270_v24 = vld [vmem:[#allocation2 + $0x78] sm:$0xff]  ;;  %v277_v35 = vld [vmem:[#allocation2 + $0xb0] sm:$0xff]  ;;  %p5155_p11 = scmp.lt.s32.totalorder %s3674_s3, %s3674_s3 }
  0xca   :  { %v198_v0 = vld [vmem:[%s6002_s8] sm:$0xff]  ;;  %v199_v1 = vld [vmem:[%s6002_s8 + $0x8] sm:$0xff]  ;;  %4348 = vmatpush3.bf16.msra.mxu1 %v4345_v14  ;;  %v4323_v25 = vpack.c.bf16 %v270_v24, %v267_v23  ;;  %v274_v34 = vld [vmem:[#allocation2 + $0x98] sm:$0xff] }
  0xcb   :  { %202 = vadd.xlane.f32.xlu0 %v198_v0  ;;  %4350 = vmatprep.subr.bf16.mxu1 %v4349_v22  ;;  %v269_v36 = vld [vmem:[#allocation2 + $0x70] sm:$0xff]  ;;  %v4325_v37 = vpack.c.bf16 %v277_v35, %v274_v34  ;;  %v272_v38 = vld [vmem:[#allocation2 + $0x88] sm:$0xff]  ;;  %v283_v44 = vld [vmem:[#allocation2 + $0xe0] sm:$0xff] }
  0xcc   :  { %4320 = vmatpush1.bf16.msra.mxu0 %v4319_v18  ;;  %v273_v39 = vld [vmem:[#allocation2 + $0x90] sm:$0xff]  ;;  %v276_v40 = vld [vmem:[#allocation2 + $0xa8] sm:$0xff]  ;;  %v4353_v41 = vpack.c.bf16 %v272_v38, %v269_v36  ;;  %v275_v45 = vld [vmem:[#allocation2 + $0xa0] sm:$0xff] }
  0xcd   :  { %4322 = vmatprep.subr.bf16.mxu0 %v4321_v21  ;;  %v4327_v42 = vpack.c.bf16 %v276_v40, %v273_v39  ;;  %v280_v43 = vld [vmem:[#allocation2 + $0xc8] sm:$0xff]  ;;  %v278_v47 = vld [vmem:[#allocation2 + $0xb8] sm:$0xff]  ;;  %v279_v48 = vld [vmem:[#allocation2 + $0xc0] sm:$0xff] }
  0xce   :  { %4352 = vmatpush3.bf16.msra.mxu1 %v4349_v22  ;;  %v4329_v46 = vpack.c.bf16 %v283_v44, %v280_v43  ;;  %v282_v49 = vld [vmem:[#allocation2 + $0xd8] sm:$0xff]  ;;  %v4357_v50 = vpack.c.bf16 %v278_v47, %v275_v45  ;;  %v289_v53 = vld [vmem:[#allocation2 + $0x110] sm:$0xff]  ;;  %v284_v56 = vld [vmem:[#allocation2 + $0xe8] sm:$0xff] }
  0xcf   :  { %204 = vadd.xlane.f32.xlu0 %v199_v1  ;;  %4354 = vmatprep.subr.bf16.mxu1 %v4353_v41  ;;  %v4331_v51 = vpack.c.bf16 %v282_v49, %v279_v48  ;;  %v286_v52 = vld [vmem:[#allocation2 + $0xf8] sm:$0xff]  ;;  %v281_v54 = vld [vmem:[#allocation2 + $0xd0] sm:$0xff]  ;;  %v288_v58 = vld [vmem:[#allocation2 + $0x108] sm:$0xff] }
  0xd0   :  { %4324 = vmatpush1.bf16.msra.mxu0 %v4323_v25  ;;  %v4333_v55 = vpack.c.bf16 %v289_v53, %v286_v52  ;;  %v285_v57 = vld [vmem:[#allocation2 + $0xf0] sm:$0xff]  ;;  %v4361_v59 = vpack.c.bf16 %v284_v56, %v281_v54  ;;  %v292_v61 = vld [vmem:[#allocation2 + $0x128] sm:$0xff]  ;;  %v295_v62 = vld [vmem:[#allocation2 + $0x140] sm:$0xff] }
  0xd1   :  { %4326 = vmatprep.subr.bf16.mxu0 %v4325_v37  ;;  %v4335_v60 = vpack.c.bf16 %v288_v58, %v285_v57  ;;  %v287_v63 = vld [vmem:[#allocation2 + $0x100] sm:$0xff]  ;;  %v294_v3 = vld [vmem:[#allocation2 + $0x138] sm:$0xff]  ;;  %v301_v8 = vld [vmem:[#allocation2 + $0x170] sm:$0xff] }
  0xd2   :  { %4356 = vmatpush3.bf16.msra.mxu1 %v4353_v41  ;;  %v291_v2 = vld [vmem:[#allocation2 + $0x120] sm:$0xff]  ;;  %v298_v7 = vld [vmem:[#allocation2 + $0x158] sm:$0xff]  ;;  %v293_v9 = vld [vmem:[#allocation2 + $0x130] sm:$0xff] }
  0xd3   :  { %4358 = vmatprep.subr.bf16.mxu1 %v4357_v50  ;;  %v4339_v6 = vpack.c.bf16 %v294_v3, %v291_v2  ;;  %v4341_v10 = vpack.c.bf16 %v301_v8, %v298_v7  ;;  %v296_v11 = vld [vmem:[#allocation2 + $0x148] sm:$0xff]  ;;  %v297_v12 = vld [vmem:[#allocation2 + $0x150] sm:$0xff]  ;;  %v299_v16 = vld [vmem:[#allocation2 + $0x160] sm:$0xff] }
  0xd4   :  { %4328 = vmatpush1.bf16.msra.mxu0 %v4327_v42  ;;  %v300_v13 = vld [vmem:[#allocation2 + $0x168] sm:$0xff]  ;;  %v4369_v14 = vpack.c.bf16 %v296_v11, %v293_v9  ;;  %v302_v17 = vld [vmem:[#allocation2 + $0x178] sm:$0xff]  ;;  %v303_v38 = vld [vmem:[%s5975_s5] sm:$0x7] }
  0xd5   :  { %4330 = vmatprep.subr.bf16.mxu0 %v4329_v46  ;;  %v4343_v15 = vpack.c.bf16 %v300_v13, %v297_v12  ;;  %v4373_v18 = vpack.c.bf16 %v302_v17, %v299_v16  ;;  %v5524_v57 = vld [vmem:[%s6005_s15] ss:$0 sm:$0xff] }
  0xd6   :  { %4360 = vmatpush3.bf16.msra.mxu1 %v4357_v50 }
  0xd7   :  { %4362 = vmatprep.subr.bf16.mxu1 %v4361_v59 }
  0xd8   :  { %4332 = vmatpush1.bf16.msra.mxu0 %v4331_v51 }
  0xd9   :  { %4334 = vmatprep.subr.bf16.mxu0 %v4333_v55 }
  0xda   :  { %4364 = vmatpush3.bf16.msra.mxu1 %v4361_v59 }
  0xdc   :  { %4336 = vmatpush1.bf16.msra.mxu0 %v4335_v60 }
 0x158   :  { %v203_v26 = vpop.xlane.xlu0 %202 }
 0x159   :  { %v207_v27 = vmul.f32 0.0078125, %v203_v26  ;;  %v3687_v26 = vld [vmem:[%s6003_s23] ss:$0 sm:$0xff] }
 0x15b   :  { %v5458_v28 = vsub.f32 %v198_v0, %v207_v27  ;;  %v4337_v0 = vpack.c.bf16 %v295_v62, %v292_v61  ;;  %v5530_v62 = vld [vmem:[%s6005_s15 + $0x1] ss:$0 sm:$0xff] }
 0x15c   :  { %v205_v29 = vpop.xlane.xlu0 %204 }
 0x15d   :  { %v208_v30 = vmul.f32 0.0078125, %v205_v29  ;;  %v211_v31 = vmul.f32 %v5458_v28, %v5458_v28  ;;  %4338 = vmatprep.subr.bf16.mxu0 %v4337_v0  ;;  %v3688_v29 = vld [vmem:[%s6004_s14] ss:$0 sm:$0xff] }
 0x15e   :  { %4340 = vmatpush1.bf16.msra.mxu0 %v4339_v6 }
 0x15f   :  { %v5462_v32 = vsub.f32 %v199_v1, %v208_v30  ;;  %213 = vadd.xlane.f32.xlu1 %v211_v31  ;;  %v290_v1 = vld [vmem:[#allocation2 + $0x118] sm:$0xff]  ;;  %4342 = vmatprep.subr.bf16.mxu0 %v4341_v10 }
 0x160   :  { %v4365_v5 = vpack.c.bf16 %v290_v1, %v287_v63 }
 0x161   :  { %v212_v33 = vmul.f32 %v5462_v32, %v5462_v32 }
 0x162   :  { %4366 = vmatprep.subr.bf16.mxu1 %v4365_v5  ;;  %4344 = vmatpush1.bf16.msra.mxu0 %v4343_v15 }
 0x163   :  { %215 = vadd.xlane.f32.xlu1 %v212_v33  ;;  %4368 = vmatpush3.bf16.msra.mxu1 %v4365_v5 }
 0x164   :  { %4370 = vmatprep.subr.bf16.mxu1 %v4369_v14 }
 0x167   :  { %4372 = vmatpush3.bf16.msra.mxu1 %v4369_v14 }
 0x168   :  { %4374 = vmatprep.subr.bf16.mxu1 %v4373_v18 }
 0x16b   :  { %4376 = vmatpush3.bf16.msra.mxu1 %v4373_v18 }
 0x16c   :  { %4058 = vmatprep.subr.mxu1 %v5204_v4 }
 0x1ec   :  { %v214_v19 = vpop.xlane.xlu1 %213 }
 0x1ed   :  { %v217_v20 = vmul.f32 0.0078125, %v214_v19 }
 0x1ef   :  { %v219_v21 = vadd.f32 1e-12, %v217_v20 }
 0x1f0   :  { %v216_v22 = vpop.xlane.xlu1 %215 }
 0x1f1   :  { %4842 = vrsqrt.f32 %v219_v21  ;;  %v218_v23 = vmul.f32 0.0078125, %v216_v22 }
 0x1f3   :  { %v220_v24 = vadd.f32 1e-12, %v218_v23 }
 0x1f5   :  { %4844 = vrsqrt.f32 %v220_v24 }
 0x1fb   :  { %v4843_v25 = vpop.eup %4842 }
 0x1fc   :  { %v223_v27 = vmul.f32 %v4843_v25, %v5458_v28  ;;  %v305_v28 = vlaneseq }
 0x1fe   :  { %v231_v30 = vmul.f32 %v3687_v26, %v223_v27 }
 0x1ff   :  { %v4845_v31 = vpop.eup %4844 }
 0x200   :  { %v5475_v33 = vadd.f32 %v3688_v29, %v231_v30  ;;  %v224_v34 = vmul.f32 %v4845_v31, %v5462_v32  ;;  %v5488_v32 = vshrl.u32 %v305_v28, 7 }
 0x202   :  { %385 = vmatmul.mubr.f32.vlgmr.msra.gmra.mrb[0].mxu0 %v5475_v33  ;;  %4055 = vmatprep.mubr.f32.mxu1 %v5475_v33  ;;  %v232_v35 = vmul.f32 %v3687_v26, %v224_v34  ;;  %v5491_v37 = vsub.s32 1, %v5488_v32  ;;  %v5497_v39 = vsub.s32 0, %v5488_v32  ;;  %v5500_v40 = vsub.s32 2, %v5488_v32 }
 0x203   :  { %390 = vmatprep.mubr.f32.mxu0 %v5204_v4 }
 0x204   :  { %v5481_v36 = vadd.f32 %v3688_v29, %v232_v35  ;;  %v312_v41 = vrot.slane %v303_v38, %v5491_v37  ;;  %v308_v43 = vrot.slane %v303_v38, %v5497_v39  ;;  %v316_v45 = vrot.slane %v303_v38, %v5500_v40 }
 0x206   :  { %391 = vmatmul.mubr.f32.gmra.mrb[2].mxu0 %v5481_v36  ;;  %4056 = vmatmul.mubr.f32.vlgmr.msra.gmra.mrb[0].mxu1 %v5481_v36 }
 0x207   :  { %1434 = vmatprep.mubr.f32.mxu0 %v5204_v4  ;;  %4060 = vmatprep.mubr.msk.f32.mxu1 %vm5205_vm0, %v5204_v4 }
 0x2d5   :  { %v386_v42 = vpop.f32.mrb[0].mxu0 }
 0x2d6   :  { %v388_v44 = vpop.f32.mrb[1].mxu0  ;;  %v387_v49 = vadd.f32 %v386_v42, %v308_v43 }
 0x2d7   :  { %v389_v46 = vadd.f32 %v388_v44, %v312_v41 }
 0x2d9   :  { %v392_v47 = vpop.f32.mrb[2].mxu0  ;;  %v4057_v48 = vpop.f32.mrb[0].mxu1  ;;  %4059 = vmatpush3.xpose.msk.msra.mxu1 %vm472_vm1, %v389_v46 }
 0x2da   :  { %v5506_v50 = vadd.f32 %v4057_v48, %v316_v45  ;;  %v394_v51 = vpop.f32.mrb[3].mxu0  ;;  %v463_v52 = vpop.f32.mrb[1].mxu1  ;;  %4063 = vmatprep.subr.mxu1 %v5204_v4  ;;  %v393_v54 = vadd.f32 %v392_v47, %v308_v43 }
 0x2db   :  { %v395_v53 = vadd.f32 %v394_v51, %v312_v41  ;;  %v5514_v55 = vadd.f32 %v463_v52, %v316_v45 }
 0x2dc   :  { %4061 = vmatmul.mubr.msk.f32.vlgmr.msra.gmra.mrb[2].mxu1 %vm472_vm1, %v387_v49 }
 0x2dd   :  { %4064 = vmatpush3.xpose.msk.msra.mxu1 %vm472_vm1, %v395_v53  ;;  %4065 = vmatprep.mubr.msk.f32.mxu1 %vm5205_vm0, %v5204_v4 }
 0x2de   :  { %4068 = vmatprep.subr.mxu1 %v5204_v4 }
 0x2e0   :  { %4066 = vmatmul.mubr.msk.f32.vlgmr.msra.gmra.mrb[4].mxu1 %vm472_vm1, %v393_v54 }
 0x2e1   :  { %4069 = vmatpush3.msra.mxu1 %v5514_v55  ;;  %4070 = vmatprep.mubr.msk.f32.mxu1 %vm5205_vm0, %v5204_v4 }
 0x2e2   :  { %4073 = vmatprep.subr.mxu1 %v5204_v4 }
 0x3af   :  { %v545_v56 = vpop.f32.mrb[2].mxu1 }
 0x3b0   :  { %v625_v58 = vmul.f32 0.125, %v545_v56  ;;  %v4062_v59 = vpop.f32.mrb[3].mxu1 }
 0x3b2   :  { %v627_v60 = vadd.f32 %v5524_v57, %v625_v58 }
 0x3b3   :  { %v621_v61 = vpop.f32.mrb[4].mxu1 }
 0x3b4   :  { %v626_v63 = vmul.f32 0.125, %v621_v61  ;;  %v4067_v0 = vpop.f32.mrb[5].mxu1  ;;  %v630_v1 = vsel %vm629_vm2, %v627_v60, -inf }
 0x3b5   :  { %631 = vmax.xlane.f32.xlu0 %v630_v1  ;;  %v1145_v0 = vld [vmem:[#allocation5 + $0x8] sm:$0xff]  ;;  %v1146_v1 = vld [vmem:[#allocation5 + $0x10] sm:$0xff] }
 0x3b6   :  { %v628_v2 = vadd.f32 %v5530_v62, %v626_v63 }
 0x3b8   :  { %v633_v3 = vsel %vm629_vm2, %v628_v2, -inf }
 0x3b9   :  { %634 = vmax.xlane.f32.xlu1 %v633_v3  ;;  %v1147_v3 = vld [vmem:[#allocation5 + $0x18] sm:$0xff] }
 0x3ca   :  { %798 = vrot.lane.b32.xlu1 %v387_v49, %s5206_s27 }
 0x3ce   :  { %878 = vrot.lane.b32.xlu1 %v395_v53, %s5206_s27 }
 0x442   :  { %v632_v5 = vpop.xlane.xlu0 %631 }
 0x443   :  { %v636_v6 = vsub.f32 %v627_v60, %v632_v5  ;;  %v4381_v5 = vpack.c.bf16 %v1147_v3, %v1146_v1  ;;  %v1294_v1 = vld [vmem:[#allocation10 + $0x50] sm:$0xff] }
 0x444   :  { %v1298_v3 = vld [vmem:[#allocation10 + $0x70] sm:$0xff] }
 0x445   :  { %v638_v7 = vmul.f32 1.442695, %v636_v6  ;;  %v1148_v6 = vld [vmem:[#allocation5 + $0x20] sm:$0xff] }
 0x446   :  { %v635_v8 = vpop.xlane.xlu1 %634 }
 0x447   :  { %4846 = vpow2.f32 %v638_v7  ;;  %v637_v9 = vsub.f32 %v628_v2, %v635_v8  ;;  %v1149_v7 = vld [vmem:[#allocation5 + $0x28] sm:$0xff] }
 0x448   :  { %v4385_v8 = vpack.c.bf16 %v1149_v7, %v1148_v6  ;;  %v1305_v6 = vld [vmem:[#allocation10 + $0xa8] sm:$0xff]  ;;  %v4447_v7 = vpack.c.bf16 %v1298_v3, %v1294_v1 }
 0x449   :  { %v640_v10 = vmul.f32 1.442695, %v637_v9  ;;  %v1150_v9 = vld [vmem:[#allocation5 + $0x30] sm:$0xff] }
 0x44a   :  { %v799_v15 = vpop.permute.xlu1 %798  ;;  %v1337_v3 = vld [vmem:[#allocation10 + $0x1a8] sm:$0xff] }
 0x44b   :  { %4848 = vpow2.f32 %v640_v10  ;;  %v1151_v10 = vld [vmem:[#allocation5 + $0x38] sm:$0xff] }
 0x44e   :  { %v879_v16 = vpop.permute.xlu1 %878 }
 0x451   :  { %v4847_v11 = vpop.eup %4846 }
 0x452   :  { %v642_v12 = vsel %vm629_vm2, %v4847_v11, 0.0 }
 0x453   :  { %643 = vadd.xlane.f32.xlu0 %v642_v12  ;;  %v1152_v12 = vld [vmem:[#allocation5 + $0x40] sm:$0xff] }
 0x455   :  { %v4849_v13 = vpop.eup %4848 }
 0x456   :  { %v645_v14 = vsel %vm629_vm2, %v4849_v13, 0.0 }
 0x457   :  { %646 = vadd.xlane.f32.xlu1 %v645_v14 }
 0x468   :  { %876 = vrot.lane.b32.xlu1 %v393_v54, %s5206_s27 }
 0x469   :  { %800 = vrot.lane.b32.xlu0 %v389_v46, %s5206_s27 }
 0x4e0   :  { %v644_v17 = vpop.xlane.xlu0 %643 }
 0x4e1   :  { %4850 = vrcp.f32 %v644_v17 }
 0x4e4   :  { %v647_v18 = vpop.xlane.xlu1 %646  ;;  %v801_v23 = vpop.permute.xlu0 %800 }
 0x4e5   :  { %4852 = vrcp.f32 %v647_v18  ;;  %v1156_v18 = vld [vmem:[#allocation5 + $0x60] sm:$0xff] }
 0x4e8   :  { %v877_v24 = vpop.permute.xlu1 %876 }
 0x4eb   :  { %v4851_v19 = vpop.eup %4850 }
 0x4ec   :  { %v649_v20 = vmul.f32 %v4851_v19, %v4847_v11  ;;  %v4389_v11 = vpack.c.bf16 %v1151_v10, %v1150_v9  ;;  %v1157_v19 = vld [vmem:[#allocation5 + $0x68] sm:$0xff]  ;;  %v1303_v9 = vld [vmem:[#allocation10 + $0x98] sm:$0xff] }
 0x4ed   :  { %v1307_v10 = vld [vmem:[#allocation10 + $0xb8] sm:$0xff] }
 0x4ee   :  { %4071 = vmatmul.mubr.msk.f32.vlgmr.msra.gmra.mrb[6].mxu1 %vm629_vm2, %v649_v20  ;;  %v4401_v20 = vpack.c.bf16 %v1157_v19, %v1156_v18 }
 0x4ef   :  { %v4853_v21 = vpop.eup %4852  ;;  %4074 = vmatpush3.msra.mxu1 %v5506_v50  ;;  %4075 = vmatprep.mubr.msk.f32.mxu1 %vm5205_vm0, %v5204_v4 }
 0x4f0   :  { %v651_v22 = vmul.f32 %v4853_v21, %v4849_v13  ;;  %4078 = vmatprep.subr.mxu1 %v5204_v4  ;;  %v1153_v13 = vld [vmem:[#allocation5 + $0x48] sm:$0xff]  ;;  %v1158_v21 = vld [vmem:[#allocation5 + $0x70] sm:$0xff] }
 0x4f1   :  { %v4393_v14 = vpack.c.bf16 %v1153_v13, %v1152_v12  ;;  %v4449_v12 = vpack.c.bf16 %v1307_v10, %v1303_v9  ;;  %v1304_v13 = vld [vmem:[#allocation10 + $0xa0] sm:$0xff] }
 0x4f2   :  { %4076 = vmatmul.mubr.msk.f32.vlgmr.msra.gmra.mrb[8].mxu1 %vm629_vm2, %v651_v22  ;;  %v1159_v22 = vld [vmem:[#allocation5 + $0x78] sm:$0xff]  ;;  %v1336_v9 = vld [vmem:[#allocation10 + $0x1a0] sm:$0xff] }
 0x4f3   :  { %4080 = vmatprep.mubr.msk.f32.mxu1 %vm5205_vm0, %v5204_v4 }
 0x4f6   :  { %4079 = vmatpush3.xpose.msk.msra.mxu1 %vm472_vm1, %v801_v23  ;;  %v4405_v23 = vpack.c.bf16 %v1159_v22, %v1158_v21 }
 0x4f7   :  { %4083 = vmatprep.subr.mxu1 %v5204_v4 }
 0x4f9   :  { %4081 = vmatmul.mubr.msk.f32.vlgmr.msra.gmra.mrb[10].mxu1 %vm472_vm1, %v799_v15  ;;  %v1154_v15 = vld [vmem:[#allocation5 + $0x50] sm:$0xff] }
 0x4fa   :  { %4084 = vmatpush3.xpose.msk.msra.mxu1 %vm472_vm1, %v879_v16  ;;  %4085 = vmatprep.mubr.msk.f32.mxu1 %vm5205_vm0, %v5204_v4  ;;  %v1155_v16 = vld [vmem:[#allocation5 + $0x58] sm:$0xff] }
 0x4fb   :  { %4088 = vmatprep.subr.mxu1 %v5204_v4  ;;  %v4397_v17 = vpack.c.bf16 %v1155_v16, %v1154_v15  ;;  %v1306_v15 = vld [vmem:[#allocation10 + $0xb0] sm:$0xff] }
 0x4fd   :  { %4086 = vmatmul.mubr.msk.f32.vlgmr.msra.gmra.mrb[12].mxu1 %vm472_vm1, %v877_v24 }
 0x4fe   :  { %4090 = vmatprep.mubr.msk.f32.mxu1 %vm5205_vm0, %v5204_v4 }
 0x5c1   :  { %v5559_v25 = vpop.f32.mrb[6].mxu1 }
 0x5c2   :  { %v4072_v26 = vpop.f32.mrb[7].mxu1 }
 0x5c5   :  { %v5561_v27 = vpop.f32.mrb[8].mxu1 }
 0x5c6   :  { %v4077_v29 = vpop.f32.mrb[9].mxu1 }
 0x5cc   :  { %v872_v30 = vpop.f32.mrb[10].mxu1 }
 0x5cd   :  { %v954_v31 = vmul.f32 0.125, %v872_v30  ;;  %v4082_v34 = vpop.f32.mrb[11].mxu1 }
 0x5cf   :  { %v956_v35 = vadd.f32 %v5524_v57, %v954_v31 }
 0x5d0   :  { %v950_v28 = vpop.f32.mrb[12].mxu1 }
 0x5d1   :  { %v955_v38 = vmul.f32 0.125, %v950_v28  ;;  %v4087_v41 = vpop.f32.mrb[13].mxu1  ;;  %v958_v42 = vsel %vm629_vm2, %v956_v35, -inf }
 0x5d2   :  { %959 = vmax.xlane.f32.xlu0 %v958_v42  ;;  %v3703_v42 = vld [vmem:[%s5977_s7] ss:$0 sm:$0xff] }
 0x5d3   :  { %v957_v43 = vadd.f32 %v5530_v62, %v955_v38 }
 0x5d5   :  { %v961_v44 = vsel %vm629_vm2, %v957_v43, -inf }
 0x5d6   :  { %962 = vmax.xlane.f32.xlu1 %v961_v44 }
 0x5e7   :  { %1058 = vrot.lane.b32.xlu1 %v5506_v50, %s5206_s27 }
 0x65f   :  { %v960_v45 = vpop.xlane.xlu0 %959 }
 0x660   :  { %v964_v46 = vsub.f32 %v956_v35, %v960_v45 }
 0x662   :  { %v966_v47 = vmul.f32 1.442695, %v964_v46 }
 0x663   :  { %v963_v48 = vpop.xlane.xlu1 %962 }
 0x664   :  { %4854 = vpow2.f32 %v966_v47  ;;  %v965_v49 = vsub.f32 %v957_v43, %v963_v48 }
 0x666   :  { %v968_v51 = vmul.f32 1.442695, %v965_v49  ;;  %v1287_v49 = vld [vmem:[#allocation10 + $0x18] sm:$0xff] }
 0x667   :  { %v1059_v61 = vpop.permute.xlu1 %1058 }
 0x668   :  { %4856 = vpow2.f32 %v968_v51 }
 0x66e   :  { %v4855_v52 = vpop.eup %4854 }
 0x66f   :  { %v970_v53 = vsel %vm629_vm2, %v4855_v52, 0.0 }
 0x670   :  { %971 = vadd.xlane.f32.xlu0 %v970_v53  ;;  %v1284_v53 = vld [vmem:[#allocation10] sm:$0xff] }
 0x672   :  { %v4857_v54 = vpop.eup %4856 }
 0x673   :  { %v973_v56 = vsel %vm629_vm2, %v4857_v54, 0.0 }
 0x674   :  { %974 = vadd.xlane.f32.xlu0 %v973_v56 }
 0x68a   :  { %981 = vrot.lane.b32.xlu0 %v5514_v55, %s5206_s27  ;;  %v1144_v55 = vld [vmem:[#allocation5] sm:$0xff] }
 0x68b   :  { %v4377_v2 = vpack.c.bf16 %v1145_v0, %v1144_v55  ;;  %v1292_v55 = vld [vmem:[#allocation10 + $0x40] sm:$0xff] }
 0x68c   :  { %v1296_v0 = vld [vmem:[#allocation10 + $0x60] sm:$0xff] }
 0x6fd   :  { %v972_v50 = vpop.xlane.xlu0 %971 }
 0x6fe   :  { %4858 = vrcp.f32 %v972_v50 }
 0x701   :  { %v975_v57 = vpop.xlane.xlu0 %974 }
 0x702   :  { %4860 = vrcp.f32 %v975_v57  ;;  %v1286_v57 = vld [vmem:[#allocation10 + $0x10] sm:$0xff] }
 0x705   :  { %v982_v58 = vpop.permute.xlu0 %981 }
 0x706   :  { %4089 = vmatpush3.msra.mxu1 %v982_v58  ;;  %v1290_v58 = vld [vmem:[#allocation10 + $0x30] sm:$0xff] }
 0x707   :  { %4093 = vmatprep.subr.mxu1 %v5204_v4 }
 0x708   :  { %v4859_v59 = vpop.eup %4858 }
 0x709   :  { %v977_v60 = vmul.f32 %v4859_v59, %v4855_v52  ;;  %v1291_v52 = vld [vmem:[#allocation10 + $0x38] sm:$0xff]  ;;  %v1293_v59 = vld [vmem:[#allocation10 + $0x48] sm:$0xff] }
 0x70a   :  { %v4441_v56 = vpack.c.bf16 %v1291_v52, %v1287_v49  ;;  %v1316_v49 = vld [vmem:[#allocation10 + $0x100] sm:$0xff] }
 0x70b   :  { %4091 = vmatmul.mubr.msk.f32.vlgmr.msra.gmra.mrb[14].mxu1 %vm629_vm2, %v977_v60  ;;  %v4443_v60 = vpack.c.bf16 %v1290_v58, %v1286_v57  ;;  %v1325_v57 = vld [vmem:[#allocation10 + $0x148] sm:$0xff] }
 0x70c   :  { %v4861_v62 = vpop.eup %4860  ;;  %4094 = vmatpush3.msra.mxu1 %v1059_v61  ;;  %4095 = vmatprep.mubr.msk.f32.mxu1 %vm5205_vm0, %v5204_v4  ;;  %v1297_v61 = vld [vmem:[#allocation10 + $0x68] sm:$0xff] }
 0x70d   :  { %v979_v63 = vmul.f32 %v4861_v62, %v4857_v54  ;;  %4378 = vmatprep.subr.bf16.mxu1 %v4377_v2  ;;  %v1288_v54 = vld [vmem:[#allocation10 + $0x20] sm:$0xff]  ;;  %v1299_v62 = vld [vmem:[#allocation10 + $0x78] sm:$0xff]  ;;  %v1329_v58 = vld [vmem:[#allocation10 + $0x168] sm:$0xff] }
 0x70e   :  { %v4411_v50 = vpack.c.bf16 %v1288_v54, %v1284_v53  ;;  %v1318_v54 = vld [vmem:[#allocation10 + $0x110] sm:$0xff] }
 0x70f   :  { %4096 = vmatmul.mubr.msk.f32.vlgmr.msra.gmra.mrb[16].mxu1 %vm629_vm2, %v979_v63 }
 0x710   :  { %4380 = vmatpush3.bf16.msra.mxu1 %v4377_v2  ;;  %v4415_v2 = vpack.c.bf16 %v1296_v0, %v1292_v55  ;;  %v1326_v55 = vld [vmem:[#allocation10 + $0x150] sm:$0xff] }
 0x711   :  { %4382 = vmatprep.subr.bf16.mxu1 %v4381_v5  ;;  %v1330_v0 = vld [vmem:[#allocation10 + $0x170] sm:$0xff] }
 0x712   :  { %v4463_v1 = vpack.c.bf16 %v1330_v0, %v1326_v55  ;;  %v1647_v55 = vld [vmem:[#allocation11 + $0x198] sm:$0xff]  ;;  %v1598_v0 = vld [vmem:[#allocation11 + $0x10] sm:$0xff] }
 0x714   :  { %4384 = vmatpush3.bf16.msra.mxu1 %v4381_v5  ;;  %v1301_v5 = vld [vmem:[#allocation10 + $0x88] sm:$0xff] }
 0x715   :  { %4386 = vmatprep.subr.bf16.mxu1 %v4385_v8 }
 0x718   :  { %4388 = vmatpush3.bf16.msra.mxu1 %v4385_v8  ;;  %v4417_v8 = vpack.c.bf16 %v1305_v6, %v1301_v5  ;;  %v1335_v5 = vld [vmem:[#allocation10 + $0x198] sm:$0xff] }
 0x719   :  { %4390 = vmatprep.subr.bf16.mxu1 %v4389_v11 }
 0x71c   :  { %4392 = vmatpush3.bf16.msra.mxu1 %v4389_v11  ;;  %v1300_v11 = vld [vmem:[#allocation10 + $0x80] sm:$0xff] }
 0x71d   :  { %4394 = vmatprep.subr.bf16.mxu1 %v4393_v14  ;;  %v4419_v16 = vpack.c.bf16 %v1304_v13, %v1300_v11  ;;  %v1338_v13 = vld [vmem:[#allocation10 + $0x1b0] sm:$0xff] }
 0x720   :  { %4396 = vmatpush3.bf16.msra.mxu1 %v4393_v14  ;;  %v1302_v14 = vld [vmem:[#allocation10 + $0x90] sm:$0xff] }
 0x721   :  { %4398 = vmatprep.subr.bf16.mxu1 %v4397_v17 }
 0x724   :  { %4400 = vmatpush3.bf16.msra.mxu1 %v4397_v17  ;;  %v4451_v17 = vpack.c.bf16 %v1306_v15, %v1302_v14  ;;  %v1341_v15 = vld [vmem:[#allocation10 + $0x1c8] sm:$0xff] }
 0x725   :  { %4402 = vmatprep.subr.bf16.mxu1 %v4401_v20 }
 0x728   :  { %4404 = vmatpush3.bf16.msra.mxu1 %v4401_v20 }
 0x729   :  { %4406 = vmatprep.subr.bf16.mxu1 %v4405_v23 }
 0x72c   :  { %4408 = vmatpush3.bf16.msra.mxu1 %v4405_v23 }
 0x72d   :  { %4442 = vmatprep.subr.bf16.mxu1 %v4441_v56  ;;  %v1322_v56 = vld [vmem:[#allocation10 + $0x130] sm:$0xff] }
 0x7de   :  { %v1053_v24 = vpop.f32.mrb[14].mxu1 }
 0x7df   :  { %v4092_v26 = vpop.f32.mrb[15].mxu1 }
 0x7e2   :  { %v1130_v29 = vpop.f32.mrb[16].mxu1 }
 0x7e3   :  { %v4832_v30 = vpack.i.bf16 %v1130_v29, %v1053_v24  ;;  %v4097_v31 = vpop.f32.mrb[17].mxu1  ;;  %v1309_v29 = vld [vmem:[#allocation10 + $0xc8] sm:$0xff] }
 0x7e4   :  { %v1311_v31 = vld [vmem:[#allocation10 + $0xd8] sm:$0xff] }
 0x7e5   :  { %4833 = vrot.lane.b32.xlu1 %v4832_v30, %s5206_s27  ;;  %v1313_v30 = vld [vmem:[#allocation10 + $0xe8] sm:$0xff] }
 0x857   :  { %v4834_v34 = vpop.permute.xlu1 %4833 }
 0x858   :  { %v4836_v35 = vunpack.i.h.bf16 %v4834_v34  ;;  %v4835_v28 = vunpack.i.l.bf16 %v4834_v34  ;;  %v4421_v34 = vpack.c.bf16 %v1313_v30, %v1309_v29  ;;  %v1342_v29 = vld [vmem:[#allocation10 + $0x1d0] sm:$0xff] }
 0x859   :  { %v1346_v30 = vld [vmem:[#allocation10 + $0x1f0] sm:$0xff] }
 0x85a   :  { %v1142_v38 = vsel %vm472_vm1, %v5559_v25, %v4835_v28  ;;  %v1143_v41 = vsel %vm472_vm1, %v5561_v27, %v4836_v35  ;;  %v1285_v25 = vld [vmem:[#allocation10 + $0x8] sm:$0xff]  ;;  %v1315_v35 = vld [vmem:[#allocation10 + $0xf8] sm:$0xff]  ;;  %v1308_v28 = vld [vmem:[#allocation10 + $0xc0] sm:$0xff] }
 0x85b   :  { %4130 = vmatprep.mubr.f32.mxu1 %v1142_v38  ;;  %v1289_v27 = vld [vmem:[#allocation10 + $0x28] sm:$0xff]  ;;  %v1312_v38 = vld [vmem:[#allocation10 + $0xe0] sm:$0xff] }
 0x85c   :  { %4131 = vmatmul.mubr.f32.vlgmr.msra.gmra.mrb[18].mxu1 %v1143_v41  ;;  %v4409_v51 = vpack.c.bf16 %v1289_v27, %v1285_v25  ;;  %v4453_v41 = vpack.c.bf16 %v1315_v35, %v1311_v31  ;;  %v1323_v27 = vld [vmem:[#allocation10 + $0x138] sm:$0xff]  ;;  %v4471_v31 = vpack.c.bf16 %v1346_v30, %v1342_v29  ;;  %v1613_v35 = vld [vmem:[#allocation11 + $0x88] sm:$0xff]  ;;  %v1602_v30 = vld [vmem:[#allocation11 + $0x30] sm:$0xff] }
 0x85d   :  { %1511 = vmatprep.mubr.f32.mxu1 %v5204_v4  ;;  %4444 = vmatpush1.bf16.msra.mxu1 %v4443_v60  ;;  %v4429_v60 = vpack.c.bf16 %v1329_v58, %v1325_v57  ;;  %v1651_v29 = vld [vmem:[#allocation11 + $0x1b8] sm:$0xff] }
 0x85e   :  { %4410 = vmatprep.subr.bf16.mxu0 %v4409_v51  ;;  %v1320_v51 = vld [vmem:[#allocation10 + $0x120] sm:$0xff] }
 0x85f   :  { %4412 = vmatpush1.bf16.msra.mxu0 %v4411_v50  ;;  %v4427_v53 = vpack.c.bf16 %v1320_v51, %v1316_v49  ;;  %v4459_v50 = vpack.c.bf16 %v1322_v56, %v1318_v54  ;;  %v3705_v51 = vld [vmem:[#allocation8] ss:$0 sm:$0xff]  ;;  %v1628_v54 = vld [vmem:[#allocation11 + $0x100] sm:$0xff]  ;;  %v1629_v56 = vld [vmem:[#allocation11 + $0x108] sm:$0xff] }
 0x92f   :  { %v4132_v43 = vpop.f32.mrb[18].mxu1 }
 0x930   :  { %v1239_v44 = vadd.f32 %v4132_v43, %v3703_v42  ;;  %v1233_v45 = vpop.f32.mrb[19].mxu1  ;;  %v1310_v43 = vld [vmem:[#allocation10 + $0xd0] sm:$0xff] }
 0x931   :  { %v1234_v46 = vadd.f32 %v3703_v42, %v1233_v45  ;;  %v4423_v42 = vpack.c.bf16 %v1312_v38, %v1308_v28  ;;  %v1644_v28 = vld [vmem:[#allocation11 + $0x180] sm:$0xff] }
 0x932   :  { %v1243_v47 = vadd.f32 %v1239_v44, %v5481_v36  ;;  %v1295_v36 = vld [vmem:[#allocation10 + $0x58] sm:$0xff]  ;;  %v1314_v44 = vld [vmem:[#allocation10 + $0xf0] sm:$0xff] }
 0x933   :  { %v1242_v48 = vadd.f32 %v1234_v46, %v5475_v33  ;;  %v4413_v33 = vpack.c.bf16 %v1297_v61, %v1293_v59  ;;  %v4445_v63 = vpack.c.bf16 %v1299_v62, %v1295_v36  ;;  %v4455_v45 = vpack.c.bf16 %v1314_v44, %v1310_v43  ;;  %v1317_v46 = vld [vmem:[#allocation10 + $0x108] sm:$0xff]  ;;  %v1327_v59 = vld [vmem:[#allocation10 + $0x158] sm:$0xff]  ;;  %v1324_v36 = vld [vmem:[#allocation10 + $0x140] sm:$0xff] }
 0x934   :  { %1248 = vadd.xlane.f32.xlu0 %v1243_v47  ;;  %v1331_v61 = vld [vmem:[#allocation10 + $0x178] sm:$0xff]  ;;  %v1328_v62 = vld [vmem:[#allocation10 + $0x160] sm:$0xff] }
 0x935   :  { %1246 = vadd.xlane.f32.xlu1 %v1242_v48  ;;  %4414 = vmatprep.subr.bf16.mxu0 %v4413_v33  ;;  %v4461_v33 = vpack.c.bf16 %v1331_v61, %v1327_v59  ;;  %v4507_v61 = vpack.c.bf16 %v1629_v56, %v1628_v54  ;;  %v1623_v54 = vld [vmem:[#allocation11 + $0xd8] sm:$0xff]  ;;  %v1654_v56 = vld [vmem:[#allocation11 + $0x1d0] sm:$0xff] }
 0x936   :  { %4446 = vmatprep.subr.bf16.mxu1 %v4445_v63  ;;  %4416 = vmatpush1.bf16.msra.mxu0 %v4415_v2  ;;  %v4431_v63 = vpack.c.bf16 %v1328_v62, %v1324_v36  ;;  %v1333_v2 = vld [vmem:[#allocation10 + $0x188] sm:$0xff]  ;;  %v1615_v62 = vld [vmem:[#allocation11 + $0x98] sm:$0xff] }
 0x937   :  { %4448 = vmatpush1.bf16.msra.mxu1 %v4447_v7  ;;  %4418 = vmatprep.subr.bf16.mxu0 %v4417_v8  ;;  %v4433_v6 = vpack.c.bf16 %v1337_v3, %v1333_v2  ;;  %v1339_v7 = vld [vmem:[#allocation10 + $0x1b8] sm:$0xff]  ;;  %v1332_v8 = vld [vmem:[#allocation10 + $0x180] sm:$0xff] }
 0x938   :  { %4450 = vmatprep.subr.bf16.mxu1 %v4449_v12  ;;  %v4465_v10 = vpack.c.bf16 %v1339_v7, %v1335_v5  ;;  %v4435_v11 = vpack.c.bf16 %v1336_v9, %v1332_v8  ;;  %v1334_v12 = vld [vmem:[#allocation10 + $0x190] sm:$0xff]  ;;  %v1616_v8 = vld [vmem:[#allocation11 + $0xa0] sm:$0xff]  ;;  %v1617_v9 = vld [vmem:[#allocation11 + $0xa8] sm:$0xff] }
 0x939   :  { %v4467_v14 = vpack.c.bf16 %v1338_v13, %v1334_v12  ;;  %v1630_v5 = vld [vmem:[#allocation11 + $0x110] sm:$0xff]  ;;  %v1649_v12 = vld [vmem:[#allocation11 + $0x1a8] sm:$0xff]  ;;  %v1600_v13 = vld [vmem:[#allocation11 + $0x20] sm:$0xff] }
 0x93a   :  { %4420 = vmatpush1.bf16.msra.mxu0 %v4419_v16  ;;  %v1345_v16 = vld [vmem:[#allocation10 + $0x1e8] sm:$0xff] }
 0x93b   :  { %4452 = vmatpush1.bf16.msra.mxu1 %v4451_v17  ;;  %4422 = vmatprep.subr.bf16.mxu0 %v4421_v34  ;;  %v1343_v17 = vld [vmem:[#allocation10 + $0x1d8] sm:$0xff]  ;;  %v1612_v34 = vld [vmem:[#allocation11 + $0x80] sm:$0xff] }
 0x93c   :  { %4454 = vmatprep.subr.bf16.mxu1 %v4453_v41  ;;  %v4473_v38 = vpack.c.bf16 %v1613_v35, %v1612_v34  ;;  %v1645_v41 = vld [vmem:[#allocation11 + $0x188] sm:$0xff] }
 0x93e   :  { %4424 = vmatpush1.bf16.msra.mxu0 %v4423_v42  ;;  %v4505_v42 = vpack.c.bf16 %v1645_v41, %v1644_v28  ;;  %v1634_v28 = vld [vmem:[#allocation11 + $0x130] sm:$0xff] }
 0x93f   :  { %4456 = vmatpush1.bf16.msra.mxu1 %v4455_v45 }
 0x9c1   :  { %v1249_v18 = vpop.xlane.xlu0 %1248 }
 0x9c2   :  { %v1247_v19 = vpop.xlane.xlu1 %1246  ;;  %v1251_v20 = vmul.f32 0.0078125, %v1249_v18  ;;  %v4437_v18 = vpack.c.bf16 %v1345_v16, %v1341_v15 }
 0x9c3   :  { %v1250_v21 = vmul.f32 0.0078125, %v1247_v19  ;;  %v1347_v19 = vld [vmem:[#allocation10 + $0x1f8] sm:$0xff] }
 0x9c4   :  { %v5591_v23 = vsub.f32 %v1243_v47, %v1251_v20  ;;  %v1321_v47 = vld [vmem:[#allocation10 + $0x128] sm:$0xff]  ;;  %v1340_v20 = vld [vmem:[#allocation10 + $0x1c0] sm:$0xff] }
 0x9c5   :  { %v5589_v22 = vsub.f32 %v1242_v48, %v1250_v21  ;;  %v1319_v48 = vld [vmem:[#allocation10 + $0x118] sm:$0xff]  ;;  %v4425_v25 = vpack.c.bf16 %v1321_v47, %v1317_v46  ;;  %v1344_v21 = vld [vmem:[#allocation10 + $0x1e0] sm:$0xff] }
 0x9c6   :  { %v1255_v26 = vmul.f32 %v5591_v23, %v5591_v23  ;;  %v4457_v52 = vpack.c.bf16 %v1323_v27, %v1319_v48  ;;  %v3704_v27 = vld [vmem:[#allocation7] ss:$0 sm:$0xff] }
 0x9c7   :  { %v1254_v24 = vmul.f32 %v5589_v22, %v5589_v22  ;;  %4426 = vmatprep.subr.bf16.mxu0 %v4425_v25 }
 0x9c8   :  { %4458 = vmatprep.subr.bf16.mxu1 %v4457_v52  ;;  %4428 = vmatpush1.bf16.msra.mxu0 %v4427_v53  ;;  %v1596_v52 = vld [vmem:[#allocation11] sm:$0xff]  ;;  %v1597_v53 = vld [vmem:[#allocation11 + $0x8] sm:$0xff] }
 0x9c9   :  { %1256 = vadd.xlane.f32.xlu0 %v1254_v24  ;;  %4460 = vmatpush1.bf16.msra.mxu1 %v4459_v50  ;;  %v4469_v24 = vpack.c.bf16 %v1347_v19, %v1343_v17  ;;  %v1632_v17 = vld [vmem:[#allocation11 + $0x120] sm:$0xff] }
 0x9ca   :  { %4430 = vmatprep.subr.bf16.mxu0 %v4429_v60  ;;  %4462 = vmatprep.subr.bf16.mxu1 %v4461_v33  ;;  %v4475_v60 = vpack.c.bf16 %v1597_v53, %v1596_v52  ;;  %v1646_v33 = vld [vmem:[#allocation11 + $0x190] sm:$0xff] }
 0x9cb   :  { %v4509_v2 = vpack.c.bf16 %v1647_v55, %v1646_v33  ;;  %v1622_v52 = vld [vmem:[#allocation11 + $0xd0] sm:$0xff]  ;;  %v1624_v33 = vld [vmem:[#allocation11 + $0xe0] sm:$0xff] }
 0x9cc   :  { %4432 = vmatpush1.bf16.msra.mxu0 %v4431_v63 }
 0x9cd   :  { %1258 = vadd.xlane.f32.xlu0 %v1255_v26  ;;  %4464 = vmatpush1.bf16.msra.mxu1 %v4463_v1  ;;  %v4439_v26 = vpack.c.bf16 %v1344_v21, %v1340_v20  ;;  %v1599_v1 = vld [vmem:[#allocation11 + $0x18] sm:$0xff]  ;;  %v1618_v20 = vld [vmem:[#allocation11 + $0xb0] sm:$0xff] }
 0x9ce   :  { %4434 = vmatprep.subr.bf16.mxu0 %v4433_v6  ;;  %4466 = vmatprep.subr.bf16.mxu1 %v4465_v10  ;;  %v4479_v3 = vpack.c.bf16 %v1599_v1, %v1598_v0  ;;  %v1631_v6 = vld [vmem:[#allocation11 + $0x118] sm:$0xff]  ;;  %v1648_v10 = vld [vmem:[#allocation11 + $0x1a0] sm:$0xff] }
 0x9cf   :  { %v4511_v7 = vpack.c.bf16 %v1631_v6, %v1630_v5  ;;  %v4513_v15 = vpack.c.bf16 %v1649_v12, %v1648_v10  ;;  %v1619_v21 = vld [vmem:[#allocation11 + $0xb8] sm:$0xff]  ;;  %v1656_v1 = vld [vmem:[#allocation11 + $0x1e0] sm:$0xff]  ;;  %v1609_v6 = vld [vmem:[#allocation11 + $0x68] sm:$0xff] }
 0x9d0   :  { %4436 = vmatpush1.bf16.msra.mxu0 %v4435_v11  ;;  %v4481_v11 = vpack.c.bf16 %v1617_v9, %v1616_v8  ;;  %v1641_v8 = vld [vmem:[#allocation11 + $0x168] sm:$0xff]  ;;  %v1626_v10 = vld [vmem:[#allocation11 + $0xf0] sm:$0xff] }
 0x9d1   :  { %4468 = vmatpush1.bf16.msra.mxu1 %v4467_v14  ;;  %4438 = vmatprep.subr.bf16.mxu0 %v4437_v18  ;;  %v1601_v14 = vld [vmem:[#allocation11 + $0x28] sm:$0xff]  ;;  %v1658_v12 = vld [vmem:[#allocation11 + $0x1f0] sm:$0xff] }
 0x9d2   :  { %4470 = vmatprep.subr.bf16.mxu1 %v4469_v24  ;;  %v4483_v16 = vpack.c.bf16 %v1601_v14, %v1600_v13  ;;  %v1633_v18 = vld [vmem:[#allocation11 + $0x128] sm:$0xff]  ;;  %v1650_v24 = vld [vmem:[#allocation11 + $0x1b0] sm:$0xff] }
 0x9d3   :  { %v4515_v19 = vpack.c.bf16 %v1633_v18, %v1632_v17  ;;  %v4517_v34 = vpack.c.bf16 %v1651_v29, %v1650_v24  ;;  %v1611_v17 = vld [vmem:[#allocation11 + $0x78] sm:$0xff]  ;;  %v1364_v29 = vsub.s32 3, %v5488_v32 }
 0x9d4   :  { %4440 = vmatpush1.bf16.msra.mxu0 %v4439_v26  ;;  %v4485_v26 = vpack.c.bf16 %v1619_v21, %v1618_v20  ;;  %v1643_v20 = vld [vmem:[#allocation11 + $0x178] sm:$0xff] }
 0x9d5   :  { %4472 = vmatpush1.bf16.msra.mxu1 %v4471_v31  ;;  %4474 = vmatprep.subr.bf16.mxu0 %v4473_v38  ;;  %v1603_v31 = vld [vmem:[#allocation11 + $0x38] sm:$0xff] }
 0x9d6   :  { %4506 = vmatprep.subr.bf16.mxu1 %v4505_v42  ;;  %v4487_v35 = vpack.c.bf16 %v1603_v31, %v1602_v30  ;;  %v1635_v38 = vld [vmem:[#allocation11 + $0x138] sm:$0xff]  ;;  %v1620_v42 = vld [vmem:[#allocation11 + $0xc0] sm:$0xff] }
 0x9d7   :  { %v4519_v41 = vpack.c.bf16 %v1635_v38, %v1634_v28 }
 0xa56   :  { %v1257_v43 = vpop.xlane.xlu0 %1256 }
 0xa57   :  { %v1260_v44 = vmul.f32 0.0078125, %v1257_v43  ;;  %v1621_v43 = vld [vmem:[#allocation11 + $0xc8] sm:$0xff] }
 0xa59   :  { %v1262_v45 = vadd.f32 1e-12, %v1260_v44  ;;  %v1652_v44 = vld [vmem:[#allocation11 + $0x1c0] sm:$0xff] }
 0xa5a   :  { %v1259_v46 = vpop.xlane.xlu0 %1258 }
 0xa5b   :  { %4862 = vrsqrt.f32 %v1262_v45  ;;  %v1261_v47 = vmul.f32 0.0078125, %v1259_v46  ;;  %v4489_v45 = vpack.c.bf16 %v1621_v43, %v1620_v42  ;;  %v1653_v46 = vld [vmem:[#allocation11 + $0x1c8] sm:$0xff] }
 0xa5d   :  { %v1263_v48 = vadd.f32 1e-12, %v1261_v47  ;;  %v1604_v47 = vld [vmem:[#allocation11 + $0x40] sm:$0xff] }
 0xa5f   :  { %4864 = vrsqrt.f32 %v1263_v48  ;;  %v1605_v48 = vld [vmem:[#allocation11 + $0x48] sm:$0xff] }
 0xa65   :  { %v4863_v25 = vpop.eup %4862 }
 0xa66   :  { %v1266_v49 = vmul.f32 %v4863_v25, %v5589_v22  ;;  %v4521_v25 = vpack.c.bf16 %v1653_v46, %v1652_v44 }
 0xa68   :  { %v1274_v50 = vmul.f32 %v3704_v27, %v1266_v49  ;;  %v1636_v49 = vld [vmem:[#allocation11 + $0x140] sm:$0xff] }
 0xa69   :  { %v4865_v57 = vpop.eup %4864 }
 0xa6a   :  { %v5598_v58 = vadd.f32 %v3705_v51, %v1274_v50  ;;  %v1267_v59 = vmul.f32 %v4865_v57, %v5591_v23  ;;  %v1614_v23 = vld [vmem:[#allocation11 + $0x90] sm:$0xff]  ;;  %v1655_v50 = vld [vmem:[#allocation11 + $0x1d8] sm:$0xff]  ;;  %v4493_v57 = vpack.c.bf16 %v1623_v54, %v1622_v52 }
 0xa6b   :  { %v4477_v63 = vpack.c.bf16 %v1615_v62, %v1614_v23  ;;  %v1639_v62 = vld [vmem:[#allocation11 + $0x158] sm:$0xff] }
 0xa6c   :  { %1435 = vmatmul.mubr.f32.vlgmr.msra.gmra.mrb[4].mxu0 %v5598_v58  ;;  %1512 = vmatmul.mubr.f32.vlgmr.msra.gmra.mrb[20].mxu1 %v5598_v58  ;;  %v1275_v36 = vmul.f32 %v3704_v27, %v1267_v59  ;;  %v4491_v27 = vpack.c.bf16 %v1605_v48, %v1604_v47  ;;  %v4525_v59 = vpack.c.bf16 %v1655_v50, %v1654_v56 }
 0xa6d   :  { %1440 = vmatprep.mubr.f32.mxu0 %v5204_v4  ;;  %1517 = vmatprep.mubr.f32.mxu1 %v5204_v4 }
 0xa6e   :  { %v5605_v22 = vadd.f32 %v3705_v51, %v1275_v36  ;;  %4476 = vmatpush3.bf16.msra.mxu0 %v4475_v60  ;;  %4508 = vmatpush3.bf16.msra.mxu1 %v4507_v61  ;;  %v1637_v51 = vld [vmem:[#allocation11 + $0x148] sm:$0xff]  ;;  %v1606_v60 = vld [vmem:[#allocation11 + $0x50] sm:$0xff]  ;;  %v1607_v61 = vld [vmem:[#allocation11 + $0x58] sm:$0xff] }
 0xa6f   :  { %4478 = vmatprep.subr.bf16.mxu0 %v4477_v63  ;;  %4510 = vmatprep.subr.bf16.mxu1 %v4509_v2  ;;  %v4523_v53 = vpack.c.bf16 %v1637_v51, %v1636_v49  ;;  %v1638_v36 = vld [vmem:[#allocation11 + $0x150] sm:$0xff]  ;;  %v4495_v23 = vpack.c.bf16 %v1607_v61, %v1606_v60  ;;  %v1625_v63 = vld [vmem:[#allocation11 + $0xe8] sm:$0xff] }
 0xa70   :  { %1441 = vmatmul.mubr.f32.gmra.mrb[6].mxu0 %v5605_v22  ;;  %1518 = vmatmul.mubr.f32.gmra.mrb[22].mxu1 %v5605_v22  ;;  %v4527_v55 = vpack.c.bf16 %v1639_v62, %v1638_v36  ;;  %v4497_v0 = vpack.c.bf16 %v1625_v63, %v1624_v33  ;;  %v1657_v2 = vld [vmem:[#allocation11 + $0x1e8] sm:$0xff] }
 0xa71   :  { %v4529_v5 = vpack.c.bf16 %v1657_v2, %v1656_v1 }
 0xa72   :  { %4480 = vmatpush3.bf16.msra.mxu0 %v4479_v3  ;;  %4512 = vmatpush3.bf16.msra.mxu1 %v4511_v7  ;;  %v1608_v3 = vld [vmem:[#allocation11 + $0x60] sm:$0xff] }
 0xa73   :  { %4482 = vmatprep.subr.bf16.mxu0 %v4481_v11  ;;  %4514 = vmatprep.subr.bf16.mxu1 %v4513_v15  ;;  %v1640_v7 = vld [vmem:[#allocation11 + $0x160] sm:$0xff]  ;;  %v4499_v9 = vpack.c.bf16 %v1609_v6, %v1608_v3  ;;  %v1627_v11 = vld [vmem:[#allocation11 + $0xf8] sm:$0xff] }
 0xa74   :  { %v4531_v13 = vpack.c.bf16 %v1641_v8, %v1640_v7  ;;  %v4501_v14 = vpack.c.bf16 %v1627_v11, %v1626_v10  ;;  %v1659_v15 = vld [vmem:[#allocation11 + $0x1f8] sm:$0xff] }
 0xa75   :  { %v4533_v18 = vpack.c.bf16 %v1659_v15, %v1658_v12 }
 0xa76   :  { %4484 = vmatpush3.bf16.msra.mxu0 %v4483_v16  ;;  %4516 = vmatpush3.bf16.msra.mxu1 %v4515_v19  ;;  %v1610_v16 = vld [vmem:[#allocation11 + $0x70] sm:$0xff] }
 0xa77   :  { %4486 = vmatprep.subr.bf16.mxu0 %v4485_v26  ;;  %4518 = vmatprep.subr.bf16.mxu1 %v4517_v34  ;;  %v1642_v19 = vld [vmem:[#allocation11 + $0x170] sm:$0xff]  ;;  %v4503_v21 = vpack.c.bf16 %v1611_v17, %v1610_v16  ;;  %v1348_v26 = vld [vmem:[%s5981_s11] sm:$0xf] }
 0xa78   :  { %v4535_v24 = vpack.c.bf16 %v1643_v20, %v1642_v19  ;;  %v1353_v30 = vrot.slane %v1348_v26, %v5497_v39  ;;  %v1361_v31 = vrot.slane %v1348_v26, %v5500_v40  ;;  %v1357_v34 = vrot.slane %v1348_v26, %v5491_v37 }
 0xa7a   :  { %4488 = vmatpush3.bf16.msra.mxu0 %v4487_v35  ;;  %4520 = vmatpush3.bf16.msra.mxu1 %v4519_v41  ;;  %v1365_v35 = vrot.slane %v1348_v26, %v1364_v29 }
 0xa7b   :  { %4490 = vmatprep.subr.bf16.mxu0 %v4489_v45  ;;  %4522 = vmatprep.subr.bf16.mxu1 %v4521_v25 }
 0xa7e   :  { %4492 = vmatpush3.bf16.msra.mxu0 %v4491_v27  ;;  %4524 = vmatpush3.bf16.msra.mxu1 %v4523_v53 }
 0xa7f   :  { %4494 = vmatprep.subr.bf16.mxu0 %v4493_v57  ;;  %4526 = vmatprep.subr.bf16.mxu1 %v4525_v59 }
 0xa82   :  { %4496 = vmatpush3.bf16.msra.mxu0 %v4495_v23  ;;  %4528 = vmatpush3.bf16.msra.mxu1 %v4527_v55 }
 0xa83   :  { %4498 = vmatprep.subr.bf16.mxu0 %v4497_v0  ;;  %4530 = vmatprep.subr.bf16.mxu1 %v4529_v5 }
 0xa86   :  { %4500 = vmatpush3.bf16.msra.mxu0 %v4499_v9  ;;  %4532 = vmatpush3.bf16.msra.mxu1 %v4531_v13 }
 0xa87   :  { %4502 = vmatprep.subr.bf16.mxu0 %v4501_v14  ;;  %4534 = vmatprep.subr.bf16.mxu1 %v4533_v18 }
 0xa8a   :  { %4504 = vmatpush3.bf16.msra.mxu0 %v4503_v21  ;;  %4536 = vmatpush3.bf16.msra.mxu1 %v4535_v24 }
 0xb3f   :  { %v1436_v28 = vpop.f32.mrb[4].mxu0  ;;  %v1513_v38 = vpop.f32.mrb[20].mxu1 }
 0xb40   :  { %v5618_v41 = vadd.f32 %v1436_v28, %v1353_v30  ;;  %v5620_v42 = vadd.f32 %v1513_v38, %v1361_v31  ;;  %v1438_v43 = vpop.f32.mrb[5].mxu0  ;;  %v1515_v44 = vpop.f32.mrb[21].mxu1 }
 0xb41   :  { %v1439_v45 = vadd.f32 %v1438_v43, %v1357_v34  ;;  %v5622_v46 = vadd.f32 %v1515_v44, %v1365_v35 }
 0xb42   :  { %v1532_v47 = vmul.f32 0.044715, %v5618_v41  ;;  %v1534_v48 = vmul.f32 0.044715, %v5620_v42 }
 0xb43   :  { %v1533_v25 = vmul.f32 0.044715, %v1439_v45  ;;  %v1535_v27 = vmul.f32 0.044715, %v5622_v46  ;;  %v1442_v49 = vpop.f32.mrb[6].mxu0  ;;  %v1519_v51 = vpop.f32.mrb[22].mxu1 }
 0xb44   :  { %v1540_v52 = vmul.f32 %v1532_v47, %v5618_v41  ;;  %v1542_v53 = vmul.f32 %v1534_v48, %v5620_v42  ;;  %v5629_v54 = vadd.f32 %v1442_v49, %v1353_v30  ;;  %v5631_v56 = vadd.f32 %v1519_v51, %v1361_v31  ;;  %v1444_v50 = vpop.f32.mrb[7].mxu0  ;;  %v1521_v57 = vpop.f32.mrb[23].mxu1 }
 0xb45   :  { %v1541_v59 = vmul.f32 %v1533_v25, %v1439_v45  ;;  %v1543_v60 = vmul.f32 %v1535_v27, %v5622_v46  ;;  %v1445_v61 = vadd.f32 %v1444_v50, %v1357_v34  ;;  %v1522_v36 = vadd.f32 %v1521_v57, %v1365_v35 }
 0xb46   :  { %v1548_v23 = vmul.f32 %v1540_v52, %v5618_v41  ;;  %v1550_v62 = vmul.f32 %v1542_v53, %v5620_v42  ;;  %v1536_v33 = vmul.f32 0.044715, %v5629_v54  ;;  %v1538_v63 = vmul.f32 0.044715, %v5631_v56 }
 0xb47   :  { %v1537_v55 = vmul.f32 0.044715, %v1445_v61  ;;  %v1539_v0 = vmul.f32 0.044715, %v1522_v36  ;;  %v1549_v1 = vmul.f32 %v1541_v59, %v1439_v45  ;;  %v1551_v12 = vmul.f32 %v1543_v60, %v5622_v46 }
 0xb48   :  { %v1556_v2 = vadd.f32 %v1548_v23, %v5618_v41  ;;  %v1558_v3 = vadd.f32 %v1550_v62, %v5620_v42  ;;  %v1544_v5 = vmul.f32 %v1536_v33, %v5629_v54  ;;  %v1546_v11 = vmul.f32 %v1538_v63, %v5631_v56 }
 0xb49   :  { %v1545_v6 = vmul.f32 %v1537_v55, %v1445_v61  ;;  %v1547_v7 = vmul.f32 %v1539_v0, %v1522_v36  ;;  %v1557_v8 = vadd.f32 %v1549_v1, %v1439_v45  ;;  %v1559_v16 = vadd.f32 %v1551_v12, %v5622_v46 }
 0xb4a   :  { %v1564_v9 = vmul.f32 0.7978846, %v1556_v2  ;;  %v1566_v10 = vmul.f32 0.7978846, %v1558_v3  ;;  %v1552_v17 = vmul.f32 %v1544_v5, %v5629_v54  ;;  %v1554_v24 = vmul.f32 %v1546_v11, %v5631_v56 }
 0xb4b   :  { %v1565_v13 = vmul.f32 0.7978846, %v1557_v8  ;;  %v1553_v14 = vmul.f32 %v1545_v6, %v1445_v61  ;;  %v1555_v15 = vmul.f32 %v1547_v7, %v1522_v36  ;;  %v1567_v20 = vmul.f32 0.7978846, %v1559_v16 }
 0xb4c   :  { %4866 = vtanh.f32 %v1564_v9  ;;  %v1560_v21 = vadd.f32 %v1552_v17, %v5629_v54  ;;  %v1562_v34 = vadd.f32 %v1554_v24, %v5631_v56  ;;  %v1525_v47 = vmul.f32 0.5, %v1439_v45 }
 0xb4d   :  { %4868 = vtanh.f32 %v1566_v10  ;;  %v1561_v18 = vadd.f32 %v1553_v14, %v1445_v61  ;;  %v1563_v19 = vadd.f32 %v1555_v15, %v1522_v36  ;;  %v1524_v27 = vmul.f32 0.5, %v5618_v41 }
 0xb4e   :  { %4870 = vtanh.f32 %v1565_v13  ;;  %v1568_v31 = vmul.f32 0.7978846, %v1560_v21  ;;  %v1570_v35 = vmul.f32 0.7978846, %v1562_v34  ;;  %v1527_v53 = vmul.f32 0.5, %v5622_v46 }
 0xb4f   :  { %v1569_v26 = vmul.f32 0.7978846, %v1561_v18  ;;  %v1571_v30 = vmul.f32 0.7978846, %v1563_v19  ;;  %4872 = vtanh.f32 %v1567_v20  ;;  %v1526_v59 = vmul.f32 0.5, %v5620_v42 }
 0xb50   :  { %v1529_v23 = vmul.f32 0.5, %v1445_v61  ;;  %v1531_v45 = vmul.f32 0.5, %v1522_v36  ;;  %v1528_v2 = vmul.f32 0.5, %v5629_v54  ;;  %v1530_v61 = vmul.f32 0.5, %v5631_v56  ;;  %v3706_v54 = vld [vmem:[%s5983_s13] ss:$0 sm:$0xff] }
 0xb51   :  { %4874 = vtanh.f32 %v1569_v26  ;;  %v1861_v26 = vld [vmem:[#allocation2 + $0x188] sm:$0xff] }
 0xb52   :  { %4876 = vtanh.f32 %v1571_v30  ;;  %v1864_v30 = vld [vmem:[#allocation2 + $0x1a0] sm:$0xff] }
 0xb53   :  { %4878 = vtanh.f32 %v1568_v31  ;;  %v1860_v31 = vld [vmem:[#allocation2 + $0x180] sm:$0xff]  ;;  %v4537_v34 = vpack.c.bf16 %v1864_v30, %v1861_v26  ;;  %v1897_v30 = vld [vmem:[#allocation2 + $0x2a8] sm:$0xff] }
 0xb54   :  { %4880 = vtanh.f32 %v1570_v35  ;;  %v1863_v35 = vld [vmem:[#allocation2 + $0x198] sm:$0xff] }
 0xb55   :  { %4538 = vmatprep.subr.bf16.mxu0 %v4537_v34  ;;  %v1892_v34 = vld [vmem:[#allocation2 + $0x280] sm:$0xff] }
 0xb56   :  { %v4867_v28 = vpop.eup %4866 }
 0xb57   :  { %v4869_v38 = vpop.eup %4868  ;;  %v1580_v44 = vadd.f32 1.0, %v4867_v28  ;;  %v1867_v28 = vld [vmem:[#allocation2 + $0x1b8] sm:$0xff] }
 0xb58   :  { %v4871_v43 = vpop.eup %4870  ;;  %v1582_v49 = vadd.f32 1.0, %v4869_v38  ;;  %v1870_v38 = vld [vmem:[#allocation2 + $0x1d0] sm:$0xff] }
 0xb59   :  { %v1581_v48 = vadd.f32 1.0, %v4871_v43  ;;  %v4873_v25 = vpop.eup %4872  ;;  %v1588_v60 = vmul.f32 %v1580_v44, %v1524_v27  ;;  %v4539_v43 = vpack.c.bf16 %v1863_v35, %v1860_v31  ;;  %v4541_v44 = vpack.c.bf16 %v1870_v38, %v1867_v28  ;;  %v1900_v31 = vld [vmem:[#allocation2 + $0x2c0] sm:$0xff]  ;;  %v1895_v28 = vld [vmem:[#allocation2 + $0x298] sm:$0xff] }
 0xb5a   :  { %v1583_v50 = vadd.f32 1.0, %v4873_v25  ;;  %v1590_v41 = vmul.f32 %v1582_v49, %v1526_v59  ;;  %v1866_v25 = vld [vmem:[#allocation2 + $0x1b0] sm:$0xff]  ;;  %v1873_v49 = vld [vmem:[#allocation2 + $0x1e8] sm:$0xff]  ;;  %v1872_v59 = vld [vmem:[#allocation2 + $0x1e0] sm:$0xff]  ;;  %v4561_v35 = vpack.c.bf16 %v1900_v31, %v1897_v30 }
 0xb5b   :  { %v4875_v51 = vpop.eup %4874  ;;  %v1589_v52 = vmul.f32 %v1581_v48, %v1525_v47  ;;  %v1862_v47 = vld [vmem:[#allocation2 + $0x190] sm:$0xff]  ;;  %v1865_v48 = vld [vmem:[#allocation2 + $0x1a8] sm:$0xff]  ;;  %v1896_v38 = vld [vmem:[#allocation2 + $0x2a0] sm:$0xff] }
 0xb5c   :  { %v4877_v57 = vpop.eup %4876  ;;  %v1585_v62 = vadd.f32 1.0, %v4875_v51  ;;  %v1591_v63 = vmul.f32 %v1583_v50, %v1527_v53  ;;  %v4569_v27 = vpack.c.bf16 %v1865_v48, %v1862_v47  ;;  %v1876_v51 = vld [vmem:[#allocation2 + $0x200] sm:$0xff]  ;;  %v1871_v53 = vld [vmem:[#allocation2 + $0x1d8] sm:$0xff] }
 0xb5d   :  { %v4879_v33 = vpop.eup %4878  ;;  %1731 = vmatprep.mubr.f32.mxu0 %v1589_v52  ;;  %v1587_v55 = vadd.f32 1.0, %v4877_v57  ;;  %v1868_v52 = vld [vmem:[#allocation2 + $0x1c0] sm:$0xff]  ;;  %v4545_v50 = vpack.c.bf16 %v1876_v51, %v1873_v49  ;;  %v1903_v48 = vld [vmem:[#allocation2 + $0x2d8] sm:$0xff]  ;;  %v1901_v49 = vld [vmem:[#allocation2 + $0x2c8] sm:$0xff] }
 0xb5e   :  { %v4881_v0 = vpop.eup %4880  ;;  %1732 = vmatmul.mubr.f32.vlgmr.msra.gmra.mrb[8].mxu0 %v1588_v60  ;;  %v1593_v1 = vmul.f32 %v1585_v62, %v1529_v23  ;;  %v1584_v3 = vadd.f32 1.0, %v4879_v33  ;;  %1806 = vmatprep.mubr.f32.mxu1 %v1591_v63  ;;  %v4573_v57 = vpack.c.bf16 %v1871_v53, %v1868_v52  ;;  %v1875_v60 = vld [vmem:[#allocation2 + $0x1f8] sm:$0xff]  ;;  %v1902_v51 = vld [vmem:[#allocation2 + $0x2d0] sm:$0xff] }
 0xb5f   :  { %v1595_v46 = vmul.f32 %v1587_v55, %v1531_v45  ;;  %v1586_v5 = vadd.f32 1.0, %v4881_v0  ;;  %1807 = vmatmul.mubr.f32.vlgmr.msra.gmra.mrb[24].mxu1 %v1590_v41  ;;  %4540 = vmatpush1.bf16.msra.mxu0 %v4539_v43  ;;  %v4547_v23 = vpack.c.bf16 %v1875_v60, %v1872_v59  ;;  %v1899_v43 = vld [vmem:[#allocation2 + $0x2b8] sm:$0xff] }
 0xb60   :  { %1736 = vmatprep.mubr.f32.mxu0 %v1593_v1  ;;  %v1592_v42 = vmul.f32 %v1584_v3, %v1528_v2  ;;  %4542 = vmatprep.subr.bf16.mxu0 %v4541_v44  ;;  %v1879_v2 = vld [vmem:[#allocation2 + $0x218] sm:$0xff]  ;;  %v1882_v3 = vld [vmem:[#allocation2 + $0x230] sm:$0xff]  ;;  %v4589_v44 = vpack.c.bf16 %v1895_v28, %v1892_v34  ;;  %v4563_v47 = vpack.c.bf16 %v1899_v43, %v1896_v38  ;;  %v4929_v28 = vld [vmem:[%s6005_s15 + $0x1] ss:$0 sm:$0xff] }
 0xb61   :  { %1811 = vmatprep.mubr.f32.mxu1 %v1595_v46  ;;  %v1594_v6 = vmul.f32 %v1586_v5, %v1530_v61  ;;  %4570 = vmatprep.subr.bf16.mxu1 %v4569_v27  ;;  %v1874_v46 = vld [vmem:[#allocation2 + $0x1f0] sm:$0xff]  ;;  %v4549_v5 = vpack.c.bf16 %v1882_v3, %v1879_v2  ;;  %v3708_v3 = vld [vmem:[#allocation14] ss:$0 sm:$0xff] }
 0xb62   :  { %1737 = vmatmul.mubr.f32.gmra.mrb[10].mxu0 %v1592_v42  ;;  %4572 = vmatpush3.bf16.msra.mxu1 %v4569_v27  ;;  %v1877_v42 = vld [vmem:[#allocation2 + $0x208] sm:$0xff]  ;;  %v1878_v61 = vld [vmem:[#allocation2 + $0x210] sm:$0xff] }
 0xb63   :  { %1990 = vmatprep.mubr.f32.mxu0 %v5204_v4  ;;  %1812 = vmatmul.mubr.f32.gmra.mrb[26].mxu1 %v1594_v6  ;;  %v1881_v6 = vld [vmem:[#allocation2 + $0x228] sm:$0xff]  ;;  %v1898_v27 = vld [vmem:[#allocation2 + $0x2b0] sm:$0xff] }
 0xb64   :  { %4574 = vmatprep.subr.bf16.mxu1 %v4573_v57  ;;  %v4593_v52 = vpack.c.bf16 %v1901_v49, %v1898_v27 }
 0xb66   :  { %4576 = vmatpush3.bf16.msra.mxu1 %v4573_v57  ;;  %v1907_v57 = vld [vmem:[#allocation2 + $0x2f8] sm:$0xff] }
 0xc31   :  { %v3817_v36 = vpop.f32.mrb[8].mxu0 }
 0xc32   :  { %v3818_v7 = vpop.f32.mrb[9].mxu0  ;;  %v3855_v8 = vpop.f32.mrb[24].mxu1 }
 0xc33   :  { %v3819_v9 = vadd.f32 %v3818_v7, %v3817_v36  ;;  %v3856_v10 = vpop.f32.mrb[25].mxu1  ;;  %v4577_v36 = vpack.c.bf16 %v1877_v42, %v1874_v46  ;;  %v1885_v7 = vld [vmem:[#allocation2 + $0x248] sm:$0xff] }
 0xc34   :  { %v3857_v12 = vadd.f32 %v3856_v10, %v3855_v8  ;;  %v1888_v8 = vld [vmem:[#allocation2 + $0x260] sm:$0xff] }
 0xc35   :  { %v1734_v11 = vadd.f32 %v3819_v9, %v3706_v54  ;;  %v3820_v13 = vpop.f32.mrb[10].mxu0  ;;  %4578 = vmatprep.subr.bf16.mxu1 %v4577_v36  ;;  %v1880_v9 = vld [vmem:[#allocation2 + $0x220] sm:$0xff]  ;;  %v4553_v10 = vpack.c.bf16 %v1888_v8, %v1885_v7 }
 0xc36   :  { %v3821_v14 = vpop.f32.mrb[11].mxu0  ;;  %v3858_v15 = vpop.f32.mrb[26].mxu1  ;;  %4580 = vmatpush3.bf16.msra.mxu1 %v4577_v36 }
 0xc37   :  { %v1809_v56 = vadd.f32 %v3857_v12, %v1734_v11  ;;  %v3822_v16 = vadd.f32 %v3821_v14, %v3820_v13  ;;  %v3859_v17 = vpop.f32.mrb[27].mxu1  ;;  %v1883_v11 = vld [vmem:[#allocation2 + $0x238] sm:$0xff]  ;;  %v1884_v12 = vld [vmem:[#allocation2 + $0x240] sm:$0xff] }
 0xc38   :  { %v3860_v19 = vadd.f32 %v3859_v17, %v3858_v15  ;;  %v1887_v13 = vld [vmem:[#allocation2 + $0x258] sm:$0xff]  ;;  %v4581_v14 = vpack.c.bf16 %v1883_v11, %v1880_v9  ;;  %v1886_v17 = vld [vmem:[#allocation2 + $0x250] sm:$0xff] }
 0xc39   :  { %v1739_v18 = vadd.f32 %v3822_v16, %v3706_v54  ;;  %v1817_v20 = vadd.f32 %v1809_v56, %v5598_v58  ;;  %v1869_v58 = vld [vmem:[#allocation2 + $0x1c8] sm:$0xff]  ;;  %v4551_v54 = vpack.c.bf16 %v1881_v6, %v1878_v61  ;;  %v4555_v56 = vpack.c.bf16 %v1887_v13, %v1884_v12  ;;  %v1891_v15 = vld [vmem:[#allocation2 + $0x278] sm:$0xff]  ;;  %v1894_v16 = vld [vmem:[#allocation2 + $0x290] sm:$0xff] }
 0xc3a   :  { %4582 = vmatprep.subr.bf16.mxu1 %v4581_v14 }
 0xc3b   :  { %v1814_v21 = vadd.f32 %v3860_v19, %v1739_v18  ;;  %1821 = vadd.xlane.f32.xlu1 %v1817_v20  ;;  %4584 = vmatpush3.bf16.msra.mxu1 %v4581_v14  ;;  %v4557_v18 = vpack.c.bf16 %v1894_v16, %v1891_v15  ;;  %v1889_v19 = vld [vmem:[#allocation2 + $0x268] sm:$0xff] }
 0xc3d   :  { %v1818_v24 = vadd.f32 %v1814_v21, %v5605_v22  ;;  %v4543_v22 = vpack.c.bf16 %v1869_v58, %v1866_v25  ;;  %v1893_v21 = vld [vmem:[#allocation2 + $0x288] sm:$0xff]  ;;  %v1906_v25 = vld [vmem:[#allocation2 + $0x2f0] sm:$0xff] }
 0xc3e   :  { %v4565_v58 = vpack.c.bf16 %v1906_v25, %v1903_v48 }
 0xc3f   :  { %1823 = vadd.xlane.f32.xlu0 %v1818_v24  ;;  %4544 = vmatpush1.bf16.msra.mxu0 %v4543_v22  ;;  %v1905_v22 = vld [vmem:[#allocation2 + $0x2e8] sm:$0xff] }
 0xc40   :  { %4546 = vmatprep.subr.bf16.mxu0 %v4545_v50  ;;  %v4567_v53 = vpack.c.bf16 %v1905_v22, %v1902_v51  ;;  %v1904_v50 = vld [vmem:[#allocation2 + $0x2e0] sm:$0xff] }
 0xc41   :  { %v4597_v59 = vpack.c.bf16 %v1907_v57, %v1904_v50 }
 0xc43   :  { %4548 = vmatpush1.bf16.msra.mxu0 %v4547_v23 }
 0xc44   :  { %4550 = vmatprep.subr.bf16.mxu0 %v4549_v5 }
 0xc47   :  { %4552 = vmatpush1.bf16.msra.mxu0 %v4551_v54 }
 0xc48   :  { %4554 = vmatprep.subr.bf16.mxu0 %v4553_v10 }
 0xc4b   :  { %4556 = vmatpush1.bf16.msra.mxu0 %v4555_v56 }
 0xc4c   :  { %4558 = vmatprep.subr.bf16.mxu0 %v4557_v18 }
 0xcc8   :  { %v1822_v62 = vpop.xlane.xlu1 %1821 }
 0xcc9   :  { %v1825_v33 = vmul.f32 0.0078125, %v1822_v62 }
 0xccb   :  { %v5659_v63 = vsub.f32 %v1817_v20, %v1825_v33  ;;  %v1890_v20 = vld [vmem:[#allocation2 + $0x270] sm:$0xff] }
 0xccc   :  { %v1824_v45 = vpop.xlane.xlu0 %1823  ;;  %v4559_v26 = vpack.c.bf16 %v1893_v21, %v1890_v20 }
 0xccd   :  { %v1826_v55 = vmul.f32 0.0078125, %v1824_v45  ;;  %v1829_v0 = vmul.f32 %v5659_v63, %v5659_v63 }
 0xcce   :  { %4560 = vmatpush1.bf16.msra.mxu0 %v4559_v26 }
 0xccf   :  { %v5663_v41 = vsub.f32 %v1818_v24, %v1826_v55  ;;  %1831 = vadd.xlane.f32.xlu1 %v1829_v0  ;;  %v4585_v24 = vpack.c.bf16 %v1889_v19, %v1886_v17  ;;  %4562 = vmatprep.subr.bf16.mxu0 %v4561_v35 }
 0xcd1   :  { %v1830_v1 = vmul.f32 %v5663_v41, %v5663_v41  ;;  %4586 = vmatprep.subr.bf16.mxu1 %v4585_v24 }
 0xcd2   :  { %4588 = vmatpush3.bf16.msra.mxu1 %v4585_v24  ;;  %4564 = vmatpush1.bf16.msra.mxu0 %v4563_v47  ;;  %v4928_v24 = vld [vmem:[%s6005_s15] ss:$0 sm:$0xff] }
 0xcd3   :  { %1833 = vadd.xlane.f32.xlu0 %v1830_v1  ;;  %4590 = vmatprep.subr.bf16.mxu1 %v4589_v44  ;;  %v3707_v1 = vld [vmem:[#allocation13] ss:$0 sm:$0xff] }
 0xcd4   :  { %4566 = vmatprep.subr.bf16.mxu0 %v4565_v58 }
 0xcd6   :  { %4592 = vmatpush3.bf16.msra.mxu1 %v4589_v44  ;;  %4568 = vmatpush1.bf16.msra.mxu0 %v4567_v53 }
 0xcd7   :  { %4594 = vmatprep.subr.bf16.mxu1 %v4593_v52  ;;  %4168 = vmatprep.subr.mxu0 %v5204_v4 }
 0xcda   :  { %4596 = vmatpush3.bf16.msra.mxu1 %v4593_v52 }
 0xcdb   :  { %4598 = vmatprep.subr.bf16.mxu1 %v4597_v59 }
 0xcde   :  { %4600 = vmatpush3.bf16.msra.mxu1 %v4597_v59 }
 0xcdf   :  { %4203 = vmatprep.subr.mxu1 %v5204_v4 }
 0xd5c   :  { %v1832_v60 = vpop.xlane.xlu1 %1831 }
 0xd5d   :  { %v1835_v23 = vmul.f32 0.0078125, %v1832_v60 }
 0xd5f   :  { %v1837_v62 = vadd.f32 1e-12, %v1835_v23 }
 0xd60   :  { %v1834_v33 = vpop.xlane.xlu0 %1833 }
 0xd61   :  { %4882 = vrsqrt.f32 %v1837_v62  ;;  %v1836_v45 = vmul.f32 0.0078125, %v1834_v33 }
 0xd63   :  { %v1838_v55 = vadd.f32 1e-12, %v1836_v45 }
 0xd65   :  { %4884 = vrsqrt.f32 %v1838_v55 }
 0xd6b   :  { %v4883_v0 = vpop.eup %4882 }
 0xd6c   :  { %v1841_v2 = vmul.f32 %v4883_v0, %v5659_v63  ;;  %v3709_v63 = vld [vmem:[%s5975_s5 + $0x3] sm:$0x7] }
 0xd6d   :  { %v1914_v7 = vrot.slane %v3709_v63, %v5497_v39  ;;  %v1922_v9 = vrot.slane %v3709_v63, %v5500_v40 }
 0xd6e   :  { %v1849_v46 = vmul.f32 %v3707_v1, %v1841_v2 }
 0xd6f   :  { %v4885_v5 = vpop.eup %4884 }
 0xd70   :  { %v5670_v42 = vadd.f32 %v3708_v3, %v1849_v46  ;;  %v1842_v61 = vmul.f32 %v4885_v5, %v5663_v41  ;;  %v1918_v41 = vrot.slane %v3709_v63, %v5491_v37 }
 0xd72   :  { %1991 = vmatmul.mubr.f32.vlgmr.msra.gmra.mrb[12].mxu0 %v5670_v42  ;;  %4165 = vmatprep.mubr.f32.mxu1 %v5670_v42  ;;  %v1850_v6 = vmul.f32 %v3707_v1, %v1842_v61 }
 0xd73   :  { %1996 = vmatprep.mubr.f32.mxu0 %v5204_v4 }
 0xd74   :  { %v5676_v36 = vadd.f32 %v3708_v3, %v1850_v6 }
 0xd76   :  { %1997 = vmatmul.mubr.f32.gmra.mrb[14].mxu0 %v5676_v36  ;;  %4166 = vmatmul.mubr.f32.vlgmr.msra.gmra.mrb[28].mxu1 %v5676_v36 }
 0xd77   :  { %4170 = vmatprep.mubr.msk.f32.mxu0 %vm5205_vm0, %v5204_v4  ;;  %4205 = vmatprep.mubr.msk.f32.mxu1 %vm5205_vm0, %v5204_v4 }
 0xe45   :  { %v1992_v54 = vpop.f32.mrb[12].mxu0 }
 0xe46   :  { %v1994_v8 = vpop.f32.mrb[13].mxu0  ;;  %v1993_v13 = vadd.f32 %v1992_v54, %v1914_v7 }
 0xe47   :  { %v1995_v10 = vadd.f32 %v1994_v8, %v1918_v41 }
 0xe49   :  { %v1998_v11 = vpop.f32.mrb[14].mxu0  ;;  %v4167_v12 = vpop.f32.mrb[28].mxu1  ;;  %4169 = vmatpush3.xpose.msk.msra.mxu0 %vm472_vm1, %v1995_v10 }
 0xe4a   :  { %v5691_v14 = vadd.f32 %v4167_v12, %v1922_v9  ;;  %v2000_v56 = vpop.f32.mrb[15].mxu0  ;;  %v2069_v15 = vpop.f32.mrb[29].mxu1  ;;  %4173 = vmatprep.subr.mxu0 %v5204_v4  ;;  %v1999_v17 = vadd.f32 %v1998_v11, %v1914_v7 }
 0xe4b   :  { %v2001_v16 = vadd.f32 %v2000_v56, %v1918_v41  ;;  %v5699_v18 = vadd.f32 %v2069_v15, %v1922_v9 }
 0xe4c   :  { %4171 = vmatmul.mubr.msk.f32.vlgmr.msra.gmra.mrb[16].mxu0 %vm472_vm1, %v1993_v13 }
 0xe4d   :  { %4174 = vmatpush3.xpose.msk.msra.mxu0 %vm472_vm1, %v2001_v16  ;;  %4175 = vmatprep.mubr.msk.f32.mxu0 %vm5205_vm0, %v5204_v4 }
 0xe4e   :  { %4178 = vmatprep.subr.mxu0 %v5204_v4 }
 0xe50   :  { %4176 = vmatmul.mubr.msk.f32.vlgmr.msra.gmra.mrb[18].mxu0 %vm472_vm1, %v1999_v17 }
 0xe51   :  { %4179 = vmatpush3.msra.mxu0 %v5699_v18  ;;  %4180 = vmatprep.mubr.msk.f32.mxu0 %vm5205_vm0, %v5204_v4 }
 0xe52   :  { %4183 = vmatprep.subr.mxu0 %v5204_v4 }
 0xf1f   :  { %v2150_v19 = vpop.f32.mrb[16].mxu0 }
 0xf20   :  { %v2230_v20 = vmul.f32 0.125, %v2150_v19  ;;  %v4172_v21 = vpop.f32.mrb[17].mxu0 }
 0xf22   :  { %v2232_v26 = vadd.f32 %v4928_v24, %v2230_v20 }
 0xf23   :  { %v2226_v30 = vpop.f32.mrb[18].mxu0 }
 0xf24   :  { %v2231_v31 = vmul.f32 0.125, %v2226_v30  ;;  %v4177_v34 = vpop.f32.mrb[19].mxu0  ;;  %v2234_v35 = vsel %vm629_vm2, %v2232_v26, -inf }
 0xf25   :  { %2235 = vmax.xlane.f32.xlu1 %v2234_v35 }
 0xf26   :  { %v2233_v38 = vadd.f32 %v4929_v28, %v2231_v31 }
 0xf28   :  { %v2237_v43 = vsel %vm629_vm2, %v2233_v38, -inf }
 0xf29   :  { %2238 = vmax.xlane.f32.xlu0 %v2237_v43  ;;  %v2751_v43 = vld [vmem:[#allocation5 + $0x90] sm:$0xff] }
 0xfb2   :  { %v2236_v44 = vpop.xlane.xlu1 %2235 }
 0xfb3   :  { %v2240_v47 = vsub.f32 %v2232_v26, %v2236_v44  ;;  %v2752_v44 = vld [vmem:[#allocation5 + $0x98] sm:$0xff] }
 0xfb5   :  { %v2242_v48 = vmul.f32 1.442695, %v2240_v47  ;;  %v4605_v47 = vpack.c.bf16 %v2752_v44, %v2751_v43  ;;  %v2905_v43 = vld [vmem:[#allocation10 + $0x260] sm:$0xff] }
 0xfb6   :  { %v2239_v25 = vpop.xlane.xlu0 %2238 }
 0xfb7   :  { %4886 = vpow2.f32 %v2242_v48  ;;  %v2241_v27 = vsub.f32 %v2233_v38, %v2239_v25  ;;  %v2750_v38 = vld [vmem:[#allocation5 + $0x88] sm:$0xff]  ;;  %v2753_v48 = vld [vmem:[#allocation5 + $0xa0] sm:$0xff] }
 0xfb8   :  { %v2754_v25 = vld [vmem:[#allocation5 + $0xa8] sm:$0xff] }
 0xfb9   :  { %v2244_v58 = vmul.f32 1.442695, %v2241_v27  ;;  %v4609_v27 = vpack.c.bf16 %v2754_v25, %v2753_v48  ;;  %v2910_v48 = vld [vmem:[#allocation10 + $0x288] sm:$0xff] }
 0xfba   :  { %v2914_v25 = vld [vmem:[#allocation10 + $0x2a8] sm:$0xff] }
 0xfbb   :  { %4888 = vpow2.f32 %v2244_v58  ;;  %v2755_v58 = vld [vmem:[#allocation5 + $0xb0] sm:$0xff] }
 0xfc1   :  { %v4887_v49 = vpop.eup %4886 }
 0xfc2   :  { %v2246_v51 = vsel %vm629_vm2, %v4887_v49, 0.0 }
 0xfc3   :  { %2247 = vadd.xlane.f32.xlu1 %v2246_v51 }
 0xfc5   :  { %v4889_v22 = vpop.eup %4888 }
 0xfc6   :  { %v2249_v52 = vsel %vm629_vm2, %v4889_v22, 0.0 }
 0xfc7   :  { %2250 = vadd.xlane.f32.xlu0 %v2249_v52  ;;  %v2758_v52 = vld [vmem:[#allocation5 + $0xc8] sm:$0xff] }
 0xfd4   :  { %2404 = vrot.lane.b32.xlu1 %v1995_v10, %s5206_s27 }
 0xfd8   :  { %2482 = vrot.lane.b32.xlu1 %v2001_v16, %s5206_s27 }
 0xfdc   :  { %2480 = vrot.lane.b32.xlu1 %v1999_v17, %s5206_s27 }
 0xfdd   :  { %2402 = vrot.lane.b32.xlu0 %v1993_v13, %s5206_s27 }
0x1050   :  { %v2248_v53 = vpop.xlane.xlu1 %2247 }
0x1051   :  { %4890 = vrcp.f32 %v2248_v53 }
0x1054   :  { %v2251_v50 = vpop.xlane.xlu0 %2250  ;;  %v2405_v23 = vpop.permute.xlu1 %2404 }
0x1055   :  { %4892 = vrcp.f32 %v2251_v50  ;;  %v2759_v50 = vld [vmem:[#allocation5 + $0xd0] sm:$0xff] }
0x1058   :  { %v2483_v33 = vpop.permute.xlu1 %2482  ;;  %v2403_v45 = vpop.permute.xlu0 %2402 }
0x105b   :  { %v4891_v57 = vpop.eup %4890 }
0x105c   :  { %v2253_v59 = vmul.f32 %v4891_v57, %v4887_v49  ;;  %v2481_v55 = vpop.permute.xlu1 %2480  ;;  %v2756_v49 = vld [vmem:[#allocation5 + $0xb8] sm:$0xff] }
0x105d   :  { %v4613_v51 = vpack.c.bf16 %v2756_v49, %v2755_v58  ;;  %v2760_v57 = vld [vmem:[#allocation5 + $0xd8] sm:$0xff]  ;;  %v4641_v58 = vpack.c.bf16 %v2914_v25, %v2910_v48 }
0x105e   :  { %4181 = vmatmul.mubr.msk.f32.vlgmr.msra.gmra.mrb[20].mxu0 %vm629_vm2, %v2253_v59  ;;  %v4621_v59 = vpack.c.bf16 %v2760_v57, %v2759_v50  ;;  %v2912_v49 = vld [vmem:[#allocation10 + $0x298] sm:$0xff]  ;;  %v2911_v50 = vld [vmem:[#allocation10 + $0x290] sm:$0xff] }
0x105f   :  { %v4893_v60 = vpop.eup %4892  ;;  %4184 = vmatpush3.msra.mxu0 %v5691_v14  ;;  %4185 = vmatprep.mubr.msk.f32.mxu0 %vm5205_vm0, %v5204_v4  ;;  %v2915_v57 = vld [vmem:[#allocation10 + $0x2b0] sm:$0xff]  ;;  %v2944_v48 = vld [vmem:[#allocation10 + $0x398] sm:$0xff] }
0x1060   :  { %v2255_v62 = vmul.f32 %v4893_v60, %v4889_v22  ;;  %4188 = vmatprep.subr.mxu0 %v5204_v4  ;;  %v2757_v22 = vld [vmem:[#allocation5 + $0xc0] sm:$0xff] }
0x1061   :  { %v4617_v53 = vpack.c.bf16 %v2758_v52, %v2757_v22  ;;  %v2761_v60 = vld [vmem:[#allocation5 + $0xe0] sm:$0xff] }
0x1062   :  { %4186 = vmatmul.mubr.msk.f32.vlgmr.msra.gmra.mrb[22].mxu0 %vm629_vm2, %v2255_v62  ;;  %v2909_v22 = vld [vmem:[#allocation10 + $0x280] sm:$0xff] }
0x1063   :  { %4190 = vmatprep.mubr.msk.f32.mxu0 %vm5205_vm0, %v5204_v4 }
0x1066   :  { %4189 = vmatpush3.xpose.msk.msra.mxu0 %vm472_vm1, %v2405_v23  ;;  %v2762_v23 = vld [vmem:[#allocation5 + $0xe8] sm:$0xff] }
0x1067   :  { %4193 = vmatprep.subr.mxu0 %v5204_v4  ;;  %v4625_v62 = vpack.c.bf16 %v2762_v23, %v2761_v60  ;;  %v4675_v60 = vpack.c.bf16 %v2915_v57, %v2911_v50  ;;  %v2950_v50 = vld [vmem:[#allocation10 + $0x3c8] sm:$0xff] }
0x1068   :  { %v2954_v57 = vld [vmem:[#allocation10 + $0x3e8] sm:$0xff] }
0x1069   :  { %4191 = vmatmul.mubr.msk.f32.vlgmr.msra.gmra.mrb[24].mxu0 %vm472_vm1, %v2403_v45  ;;  %v2764_v45 = vld [vmem:[#allocation5 + $0xf8] sm:$0xff] }
0x106a   :  { %4194 = vmatpush3.xpose.msk.msra.mxu0 %vm472_vm1, %v2483_v33  ;;  %4195 = vmatprep.mubr.msk.f32.mxu0 %vm5205_vm0, %v5204_v4  ;;  %v2763_v33 = vld [vmem:[#allocation5 + $0xf0] sm:$0xff] }
0x106b   :  { %4198 = vmatprep.subr.mxu0 %v5204_v4 }
0x106d   :  { %4196 = vmatmul.mubr.msk.f32.vlgmr.msra.gmra.mrb[26].mxu0 %vm472_vm1, %v2481_v55  ;;  %v4629_v55 = vpack.c.bf16 %v2764_v45, %v2763_v33 }
0x106e   :  { %4200 = vmatprep.mubr.msk.f32.mxu0 %vm5205_vm0, %v5204_v4 }
0x1131   :  { %v5738_v0 = vpop.f32.mrb[20].mxu0 }
0x1132   :  { %v4182_v1 = vpop.f32.mrb[21].mxu0 }
0x1135   :  { %v5740_v2 = vpop.f32.mrb[22].mxu0 }
0x1136   :  { %v4187_v3 = vpop.f32.mrb[23].mxu0 }
0x113c   :  { %v2476_v46 = vpop.f32.mrb[24].mxu0 }
0x113d   :  { %v2558_v5 = vmul.f32 0.125, %v2476_v46  ;;  %v4192_v61 = vpop.f32.mrb[25].mxu0 }
0x113f   :  { %v2560_v6 = vadd.f32 %v4928_v24, %v2558_v5 }
0x1140   :  { %v2554_v63 = vpop.f32.mrb[26].mxu0 }
0x1141   :  { %v2559_v41 = vmul.f32 0.125, %v2554_v63  ;;  %v4197_v54 = vpop.f32.mrb[27].mxu0  ;;  %v2562_v7 = vsel %vm629_vm2, %v2560_v6, -inf }
0x1142   :  { %2563 = vmax.xlane.f32.xlu1 %v2562_v7 }
0x1143   :  { %v2561_v8 = vadd.f32 %v4929_v28, %v2559_v41  ;;  %v2749_v28 = vld [vmem:[#allocation5 + $0x80] sm:$0xff] }
0x1145   :  { %v2565_v9 = vsel %vm629_vm2, %v2561_v8, -inf }
0x1146   :  { %2566 = vmax.xlane.f32.xlu0 %v2565_v9 }
0x1153   :  { %2585 = vrot.lane.b32.xlu1 %v5699_v18, %s5206_s27 }
0x11cf   :  { %v2564_v10 = vpop.xlane.xlu1 %2563 }
0x11d0   :  { %v2568_v11 = vsub.f32 %v2560_v6, %v2564_v10 }
0x11d2   :  { %v2570_v12 = vmul.f32 1.442695, %v2568_v11 }
0x11d3   :  { %v2586_v13 = vpop.permute.xlu1 %2585  ;;  %v2567_v56 = vpop.xlane.xlu0 %2566 }
0x11d4   :  { %4894 = vpow2.f32 %v2570_v12  ;;  %v2569_v15 = vsub.f32 %v2561_v8, %v2567_v56  ;;  %4199 = vmatpush3.msra.mxu0 %v2586_v13  ;;  %v3723_v8 = vld [vmem:[%s5977_s7 + $0x1] ss:$0 sm:$0xff] }
0x11d6   :  { %v2572_v16 = vmul.f32 1.442695, %v2569_v15  ;;  %v2896_v15 = vld [vmem:[#allocation10 + $0x218] sm:$0xff] }
0x11d8   :  { %4896 = vpow2.f32 %v2572_v16 }
0x11de   :  { %v4895_v17 = vpop.eup %4894 }
0x11df   :  { %v2574_v19 = vsel %vm629_vm2, %v4895_v17, 0.0 }
0x11e0   :  { %2575 = vadd.xlane.f32.xlu0 %v2574_v19  ;;  %v2893_v19 = vld [vmem:[#allocation10 + $0x200] sm:$0xff] }
0x11e2   :  { %v4897_v20 = vpop.eup %4896 }
0x11e3   :  { %v2577_v21 = vsel %vm629_vm2, %v4897_v20, 0.0 }
0x11e4   :  { %2578 = vadd.xlane.f32.xlu0 %v2577_v21 }
0x11fa   :  { %2662 = vrot.lane.b32.xlu0 %v5691_v14, %s5206_s27  ;;  %v4601_v14 = vpack.c.bf16 %v2750_v38, %v2749_v28  ;;  %v2901_v38 = vld [vmem:[#allocation10 + $0x240] sm:$0xff] }
0x11fb   :  { %v4639_v44 = vpack.c.bf16 %v2905_v43, %v2901_v38  ;;  %v2935_v38 = vld [vmem:[#allocation10 + $0x350] sm:$0xff] }
0x11fc   :  { %4602 = vmatprep.subr.bf16.mxu0 %v4601_v14  ;;  %v2939_v43 = vld [vmem:[#allocation10 + $0x370] sm:$0xff] }
0x11fd   :  { %v4687_v25 = vpack.c.bf16 %v2939_v43, %v2935_v38  ;;  %v3257_v38 = vld [vmem:[#allocation11 + $0x390] sm:$0xff] }
0x126d   :  { %v2576_v18 = vpop.xlane.xlu0 %2575 }
0x126e   :  { %4898 = vrcp.f32 %v2576_v18 }
0x1271   :  { %v2579_v24 = vpop.xlane.xlu0 %2578 }
0x1272   :  { %4900 = vrcp.f32 %v2579_v24  ;;  %v2895_v24 = vld [vmem:[#allocation10 + $0x210] sm:$0xff] }
0x1275   :  { %v2663_v26 = vpop.permute.xlu0 %2662 }
0x1276   :  { %4204 = vmatpush3.msra.mxu1 %v2663_v26  ;;  %v2899_v26 = vld [vmem:[#allocation10 + $0x230] sm:$0xff] }
0x1278   :  { %v4899_v30 = vpop.eup %4898 }
0x1279   :  { %v2581_v31 = vmul.f32 %v4899_v30, %v4895_v17  ;;  %v2900_v17 = vld [vmem:[#allocation10 + $0x238] sm:$0xff]  ;;  %v2902_v30 = vld [vmem:[#allocation10 + $0x248] sm:$0xff] }
0x127a   :  { %v4665_v21 = vpack.c.bf16 %v2900_v17, %v2896_v15  ;;  %v2925_v17 = vld [vmem:[#allocation10 + $0x300] sm:$0xff] }
0x127b   :  { %4201 = vmatmul.mubr.msk.f32.vlgmr.msra.gmra.mrb[28].mxu0 %vm629_vm2, %v2581_v31  ;;  %v4667_v31 = vpack.c.bf16 %v2899_v26, %v2895_v24  ;;  %v2934_v24 = vld [vmem:[#allocation10 + $0x348] sm:$0xff] }
0x127c   :  { %v4901_v34 = vpop.eup %4900  ;;  %4604 = vmatpush3.bf16.msra.mxu0 %v4601_v14  ;;  %v2903_v14 = vld [vmem:[#allocation10 + $0x250] sm:$0xff]  ;;  %v2938_v26 = vld [vmem:[#allocation10 + $0x368] sm:$0xff] }
0x127d   :  { %v2583_v35 = vmul.f32 %v4901_v34, %v4897_v20  ;;  %4606 = vmatprep.subr.bf16.mxu0 %v4605_v47  ;;  %v2897_v20 = vld [vmem:[#allocation10 + $0x220] sm:$0xff]  ;;  %v2906_v34 = vld [vmem:[#allocation10 + $0x268] sm:$0xff] }
0x127e   :  { %v4635_v18 = vpack.c.bf16 %v2897_v20, %v2893_v19  ;;  %v2929_v19 = vld [vmem:[#allocation10 + $0x320] sm:$0xff]  ;;  %v2927_v20 = vld [vmem:[#allocation10 + $0x310] sm:$0xff] }
0x127f   :  { %4206 = vmatmul.mubr.msk.f32.vlgmr.msra.gmra.mrb[30].mxu1 %vm629_vm2, %v2583_v35  ;;  %v2908_v35 = vld [vmem:[#allocation10 + $0x278] sm:$0xff] }
0x1280   :  { %3044 = vmatprep.mubr.f32.mxu1 %v5204_v4  ;;  %4608 = vmatpush3.bf16.msra.mxu0 %v4605_v47  ;;  %v2907_v47 = vld [vmem:[#allocation10 + $0x270] sm:$0xff] }
0x1281   :  { %4610 = vmatprep.subr.bf16.mxu0 %v4609_v27 }
0x1284   :  { %4612 = vmatpush3.bf16.msra.mxu0 %v4609_v27  ;;  %v4671_v27 = vpack.c.bf16 %v2907_v47, %v2903_v14  ;;  %v2946_v47 = vld [vmem:[#allocation10 + $0x3a8] sm:$0xff] }
0x1285   :  { %4614 = vmatprep.subr.bf16.mxu0 %v4613_v51 }
0x1288   :  { %4616 = vmatpush3.bf16.msra.mxu0 %v4613_v51  ;;  %v2916_v51 = vld [vmem:[#allocation10 + $0x2b8] sm:$0xff] }
0x1289   :  { %4618 = vmatprep.subr.bf16.mxu0 %v4617_v53  ;;  %v4673_v52 = vpack.c.bf16 %v2916_v51, %v2912_v49  ;;  %v2941_v49 = vld [vmem:[#allocation10 + $0x380] sm:$0xff] }
0x128a   :  { %v2945_v51 = vld [vmem:[#allocation10 + $0x3a0] sm:$0xff] }
0x128c   :  { %4620 = vmatpush3.bf16.msra.mxu0 %v4617_v53  ;;  %v2913_v53 = vld [vmem:[#allocation10 + $0x2a0] sm:$0xff] }
0x128d   :  { %4622 = vmatprep.subr.bf16.mxu0 %v4621_v59 }
0x1290   :  { %4624 = vmatpush3.bf16.msra.mxu0 %v4621_v59  ;;  %v4643_v59 = vpack.c.bf16 %v2913_v53, %v2909_v22  ;;  %v2947_v53 = vld [vmem:[#allocation10 + $0x3b0] sm:$0xff] }
0x1291   :  { %4626 = vmatprep.subr.bf16.mxu0 %v4625_v62 }
0x1294   :  { %4628 = vmatpush3.bf16.msra.mxu0 %v4625_v62 }
0x1295   :  { %4630 = vmatprep.subr.bf16.mxu0 %v4629_v55 }
0x1298   :  { %4632 = vmatpush3.bf16.msra.mxu0 %v4629_v55 }
0x1299   :  { %4666 = vmatprep.subr.bf16.mxu0 %v4665_v21  ;;  %v4651_v21 = vpack.c.bf16 %v2929_v19, %v2925_v17  ;;  %v3724_v17 = vld [vmem:[#allocation7 + $0x1] ss:$0 sm:$0xff]  ;;  %v3725_v19 = vld [vmem:[#allocation8 + $0x1] ss:$0 sm:$0xff] }
0x134e   :  { %v2657_v1 = vpop.f32.mrb[28].mxu0 }
0x134f   :  { %v4202_v3 = vpop.f32.mrb[29].mxu0 }
0x1352   :  { %v2734_v46 = vpop.f32.mrb[30].mxu1 }
0x1353   :  { %v4837_v5 = vpack.i.bf16 %v2734_v46, %v2657_v1  ;;  %v4207_v61 = vpop.f32.mrb[31].mxu1 }
0x1354   :  { %v2922_v61 = vld [vmem:[#allocation10 + $0x2e8] sm:$0xff] }
0x1355   :  { %4838 = vrot.lane.b32.xlu1 %v4837_v5, %s5206_s27  ;;  %v2918_v5 = vld [vmem:[#allocation10 + $0x2c8] sm:$0xff] }
0x13c7   :  { %v4839_v6 = vpop.permute.xlu1 %4838 }
0x13c8   :  { %v4841_v63 = vunpack.i.h.bf16 %v4839_v6  ;;  %v4840_v41 = vunpack.i.l.bf16 %v4839_v6  ;;  %v2920_v6 = vld [vmem:[#allocation10 + $0x2d8] sm:$0xff] }
0x13ca   :  { %v2746_v54 = vsel %vm472_vm1, %v5738_v0, %v4840_v41  ;;  %v2747_v7 = vsel %vm472_vm1, %v5740_v2, %v4841_v63  ;;  %v2894_v0 = vld [vmem:[#allocation10 + $0x208] sm:$0xff]  ;;  %v4645_v63 = vpack.c.bf16 %v2922_v61, %v2918_v5  ;;  %v2924_v41 = vld [vmem:[#allocation10 + $0x2f8] sm:$0xff]  ;;  %v2951_v5 = vld [vmem:[#allocation10 + $0x3d0] sm:$0xff] }
0x13cb   :  { %4240 = vmatprep.mubr.f32.mxu0 %v2746_v54  ;;  %v2898_v2 = vld [vmem:[#allocation10 + $0x228] sm:$0xff]  ;;  %v2917_v54 = vld [vmem:[#allocation10 + $0x2c0] sm:$0xff]  ;;  %v2955_v61 = vld [vmem:[#allocation10 + $0x3f0] sm:$0xff] }
0x13cc   :  { %4241 = vmatmul.mubr.f32.vlgmr.msra.gmra.mrb[30].mxu0 %v2747_v7  ;;  %v4633_v16 = vpack.c.bf16 %v2898_v2, %v2894_v0  ;;  %v2921_v7 = vld [vmem:[#allocation10 + $0x2e0] sm:$0xff]  ;;  %v2928_v0 = vld [vmem:[#allocation10 + $0x318] sm:$0xff] }
0x13cd   :  { %3121 = vmatprep.mubr.f32.mxu0 %v5204_v4  ;;  %4668 = vmatpush1.bf16.msra.mxu0 %v4667_v31  ;;  %v2932_v2 = vld [vmem:[#allocation10 + $0x338] sm:$0xff]  ;;  %v4653_v31 = vpack.c.bf16 %v2938_v26, %v2934_v24  ;;  %v3208_v24 = vld [vmem:[#allocation11 + $0x208] sm:$0xff]  ;;  %v3239_v26 = vld [vmem:[#allocation11 + $0x300] sm:$0xff] }
0x13ce   :  { %4634 = vmatprep.subr.bf16.mxu1 %v4633_v16  ;;  %v4681_v16 = vpack.c.bf16 %v2932_v2, %v2928_v0 }
0x13cf   :  { %4636 = vmatpush1.bf16.msra.mxu1 %v4635_v18  ;;  %v2931_v18 = vld [vmem:[#allocation10 + $0x330] sm:$0xff] }
0x149f   :  { %v4242_v9 = vpop.f32.mrb[30].mxu0 }
0x14a0   :  { %v2845_v10 = vadd.f32 %v4242_v9, %v3723_v8  ;;  %v2839_v11 = vpop.f32.mrb[31].mxu0  ;;  %v4647_v9 = vpack.c.bf16 %v2921_v7, %v2917_v54  ;;  %v3224_v54 = vld [vmem:[#allocation11 + $0x288] sm:$0xff]  ;;  %v3255_v7 = vld [vmem:[#allocation11 + $0x380] sm:$0xff] }
0x14a1   :  { %v2840_v12 = vadd.f32 %v3723_v8, %v2839_v11  ;;  %v4677_v8 = vpack.c.bf16 %v2924_v41, %v2920_v6  ;;  %v2923_v11 = vld [vmem:[#allocation10 + $0x2f0] sm:$0xff]  ;;  %v3223_v41 = vld [vmem:[#allocation11 + $0x280] sm:$0xff] }
0x14a2   :  { %v2849_v13 = vadd.f32 %v2845_v10, %v5676_v36  ;;  %v2904_v36 = vld [vmem:[#allocation10 + $0x258] sm:$0xff]  ;;  %v2919_v10 = vld [vmem:[#allocation10 + $0x2d0] sm:$0xff] }
0x14a3   :  { %v2848_v56 = vadd.f32 %v2840_v12, %v5670_v42  ;;  %v4637_v42 = vpack.c.bf16 %v2906_v34, %v2902_v30  ;;  %v4669_v28 = vpack.c.bf16 %v2908_v35, %v2904_v36  ;;  %v2926_v12 = vld [vmem:[#allocation10 + $0x308] sm:$0xff]  ;;  %v4683_v30 = vpack.c.bf16 %v2931_v18, %v2927_v20  ;;  %v2936_v34 = vld [vmem:[#allocation10 + $0x358] sm:$0xff]  ;;  %v2933_v35 = vld [vmem:[#allocation10 + $0x340] sm:$0xff] }
0x14a4   :  { %2856 = vadd.xlane.f32.xlu0 %v2849_v13  ;;  %v2940_v36 = vld [vmem:[#allocation10 + $0x378] sm:$0xff]  ;;  %v3207_v18 = vld [vmem:[#allocation11 + $0x200] sm:$0xff] }
0x14a5   :  { %2854 = vadd.xlane.f32.xlu1 %v2848_v56  ;;  %4638 = vmatprep.subr.bf16.mxu1 %v4637_v42  ;;  %v4685_v42 = vpack.c.bf16 %v2940_v36, %v2936_v34 }
0x14a6   :  { %4670 = vmatprep.subr.bf16.mxu0 %v4669_v28  ;;  %4640 = vmatpush1.bf16.msra.mxu1 %v4639_v44  ;;  %v2937_v28 = vld [vmem:[#allocation10 + $0x360] sm:$0xff]  ;;  %v2942_v44 = vld [vmem:[#allocation10 + $0x388] sm:$0xff] }
0x14a7   :  { %4672 = vmatpush1.bf16.msra.mxu0 %v4671_v27  ;;  %4642 = vmatprep.subr.bf16.mxu1 %v4641_v58  ;;  %v4655_v14 = vpack.c.bf16 %v2937_v28, %v2933_v35  ;;  %v4657_v27 = vpack.c.bf16 %v2946_v47, %v2942_v44  ;;  %v2948_v58 = vld [vmem:[#allocation10 + $0x3b8] sm:$0xff]  ;;  %v4699_v35 = vpack.c.bf16 %v3208_v24, %v3207_v18  ;;  %v3209_v44 = vld [vmem:[#allocation11 + $0x210] sm:$0xff] }
0x14a8   :  { %4674 = vmatprep.subr.bf16.mxu0 %v4673_v52  ;;  %v4689_v22 = vpack.c.bf16 %v2948_v58, %v2944_v48  ;;  %v2943_v52 = vld [vmem:[#allocation10 + $0x390] sm:$0xff]  ;;  %v3226_v28 = vld [vmem:[#allocation11 + $0x298] sm:$0xff] }
0x14a9   :  { %v3210_v47 = vld [vmem:[#allocation11 + $0x218] sm:$0xff] }
0x14aa   :  { %4644 = vmatpush1.bf16.msra.mxu1 %v4643_v59  ;;  %v2952_v59 = vld [vmem:[#allocation10 + $0x3d8] sm:$0xff] }
0x14ab   :  { %4676 = vmatpush1.bf16.msra.mxu0 %v4675_v60  ;;  %4646 = vmatprep.subr.bf16.mxu1 %v4645_v63  ;;  %v2956_v60 = vld [vmem:[#allocation10 + $0x3f8] sm:$0xff]  ;;  %v4695_v63 = vpack.c.bf16 %v2955_v61, %v2951_v5  ;;  %v3261_v5 = vld [vmem:[#allocation11 + $0x3b0] sm:$0xff] }
0x14ac   :  { %4678 = vmatprep.subr.bf16.mxu0 %v4677_v8  ;;  %v4697_v8 = vpack.c.bf16 %v3224_v54, %v3223_v41  ;;  %v3242_v58 = vld [vmem:[#allocation11 + $0x318] sm:$0xff] }
0x14ad   :  { %v3214_v41 = vld [vmem:[#allocation11 + $0x238] sm:$0xff] }
0x14ae   :  { %4648 = vmatpush1.bf16.msra.mxu1 %v4647_v9  ;;  %v3256_v9 = vld [vmem:[#allocation11 + $0x388] sm:$0xff]  ;;  %v3234_v18 = vld [vmem:[#allocation11 + $0x2d8] sm:$0xff] }
0x1531   :  { %v2857_v23 = vpop.xlane.xlu0 %2856 }
0x1532   :  { %v2859_v62 = vmul.f32 0.0078125, %v2857_v23  ;;  %v2855_v33 = vpop.xlane.xlu1 %2854  ;;  %v4659_v23 = vpack.c.bf16 %v2945_v51, %v2941_v49  ;;  %v3227_v51 = vld [vmem:[#allocation11 + $0x2a0] sm:$0xff] }
0x1533   :  { %v2858_v45 = vmul.f32 0.0078125, %v2855_v33  ;;  %v4661_v33 = vpack.c.bf16 %v2954_v57, %v2950_v50  ;;  %v3260_v50 = vld [vmem:[#allocation11 + $0x3a8] sm:$0xff]  ;;  %v3211_v57 = vld [vmem:[#allocation11 + $0x220] sm:$0xff] }
0x1534   :  { %v5764_v55 = vsub.f32 %v2849_v13, %v2859_v62  ;;  %v4679_v13 = vpack.c.bf16 %v2923_v11, %v2919_v10  ;;  %v4691_v62 = vpack.c.bf16 %v2947_v53, %v2943_v52  ;;  %v4729_v10 = vpack.c.bf16 %v3256_v9, %v3255_v7  ;;  %v3259_v52 = vld [vmem:[#allocation11 + $0x3a0] sm:$0xff]  ;;  %v3246_v9 = vld [vmem:[#allocation11 + $0x338] sm:$0xff] }
0x1535   :  { %v5766_v1 = vsub.f32 %v2848_v56, %v2858_v45  ;;  %v2930_v56 = vld [vmem:[#allocation10 + $0x328] sm:$0xff]  ;;  %v2949_v45 = vld [vmem:[#allocation10 + $0x3c0] sm:$0xff] }
0x1536   :  { %v2863_v3 = vmul.f32 %v5764_v55, %v5764_v55  ;;  %v4649_v15 = vpack.c.bf16 %v2930_v56, %v2926_v12  ;;  %4680 = vmatpush1.bf16.msra.mxu0 %v4679_v13 }
0x1537   :  { %v2862_v46 = vmul.f32 %v5766_v1, %v5766_v1  ;;  %4682 = vmatprep.subr.bf16.mxu0 %v4681_v16 }
0x1538   :  { %2866 = vadd.xlane.f32.xlu1 %v2863_v3  ;;  %4650 = vmatprep.subr.bf16.mxu1 %v4649_v15  ;;  %v2953_v3 = vld [vmem:[#allocation10 + $0x3e0] sm:$0xff] }
0x1539   :  { %2864 = vadd.xlane.f32.xlu0 %v2862_v46  ;;  %4652 = vmatpush1.bf16.msra.mxu1 %v4651_v21  ;;  %v4693_v46 = vpack.c.bf16 %v2956_v60, %v2952_v59  ;;  %v4663_v6 = vpack.c.bf16 %v2953_v3, %v2949_v45  ;;  %v3212_v59 = vld [vmem:[#allocation11 + $0x228] sm:$0xff]  ;;  %v4737_v60 = vpack.c.bf16 %v3260_v50, %v3259_v52  ;;  %v3229_v3 = vld [vmem:[#allocation11 + $0x2b0] sm:$0xff] }
0x153a   :  { %4684 = vmatpush1.bf16.msra.mxu0 %v4683_v30  ;;  %4654 = vmatprep.subr.bf16.mxu1 %v4653_v31  ;;  %v3240_v30 = vld [vmem:[#allocation11 + $0x308] sm:$0xff]  ;;  %v3237_v52 = vld [vmem:[#allocation11 + $0x2f0] sm:$0xff] }
0x153b   :  { %4686 = vmatprep.subr.bf16.mxu0 %v4685_v42  ;;  %v4731_v42 = vpack.c.bf16 %v3240_v30, %v3239_v26  ;;  %v3265_v30 = vld [vmem:[#allocation11 + $0x3d0] sm:$0xff] }
0x153c   :  { %v3269_v50 = vld [vmem:[#allocation11 + $0x3f0] sm:$0xff] }
0x153d   :  { %4656 = vmatpush1.bf16.msra.mxu1 %v4655_v14  ;;  %v3258_v14 = vld [vmem:[#allocation11 + $0x398] sm:$0xff] }
0x153e   :  { %4688 = vmatpush1.bf16.msra.mxu0 %v4687_v25  ;;  %4658 = vmatprep.subr.bf16.mxu1 %v4657_v27  ;;  %v4733_v48 = vpack.c.bf16 %v3258_v14, %v3257_v38  ;;  %v4703_v25 = vpack.c.bf16 %v3210_v47, %v3209_v44  ;;  %v3241_v27 = vld [vmem:[#allocation11 + $0x310] sm:$0xff]  ;;  %v3236_v14 = vld [vmem:[#allocation11 + $0x2e8] sm:$0xff]  ;;  %v3267_v44 = vld [vmem:[#allocation11 + $0x3e0] sm:$0xff] }
0x153f   :  { %4690 = vmatprep.subr.bf16.mxu0 %v4689_v22  ;;  %v4735_v49 = vpack.c.bf16 %v3242_v58, %v3241_v27  ;;  %v3228_v22 = vld [vmem:[#allocation11 + $0x2a8] sm:$0xff]  ;;  %v3219_v27 = vld [vmem:[#allocation11 + $0x260] sm:$0xff] }
0x1540   :  { %v4705_v53 = vpack.c.bf16 %v3228_v22, %v3227_v51  ;;  %v3220_v58 = vld [vmem:[#allocation11 + $0x268] sm:$0xff]  ;;  %v3251_v51 = vld [vmem:[#allocation11 + $0x360] sm:$0xff] }
0x1541   :  { %4660 = vmatpush1.bf16.msra.mxu1 %v4659_v23  ;;  %v4707_v23 = vpack.c.bf16 %v3212_v59, %v3211_v57  ;;  %v3252_v22 = vld [vmem:[#allocation11 + $0x368] sm:$0xff]  ;;  %v3270_v57 = vld [vmem:[#allocation11 + $0x3f8] sm:$0xff]  ;;  %v4723_v59 = vpack.c.bf16 %v3220_v58, %v3219_v27 }
0x1542   :  { %4692 = vmatpush1.bf16.msra.mxu0 %v4691_v62  ;;  %4662 = vmatprep.subr.bf16.mxu1 %v4661_v33  ;;  %v3243_v62 = vld [vmem:[#allocation11 + $0x320] sm:$0xff]  ;;  %v3244_v33 = vld [vmem:[#allocation11 + $0x328] sm:$0xff] }
0x1543   :  { %4694 = vmatprep.subr.bf16.mxu0 %v4693_v46  ;;  %v4739_v45 = vpack.c.bf16 %v3244_v33, %v3243_v62  ;;  %v3230_v46 = vld [vmem:[#allocation11 + $0x2b8] sm:$0xff]  ;;  %v3221_v62 = vld [vmem:[#allocation11 + $0x270] sm:$0xff] }
0x1544   :  { %v4709_v61 = vpack.c.bf16 %v3230_v46, %v3229_v3  ;;  %v3222_v33 = vld [vmem:[#allocation11 + $0x278] sm:$0xff]  ;;  %v3253_v3 = vld [vmem:[#allocation11 + $0x370] sm:$0xff] }
0x1545   :  { %4664 = vmatpush1.bf16.msra.mxu1 %v4663_v6  ;;  %v3262_v6 = vld [vmem:[#allocation11 + $0x3b8] sm:$0xff] }
0x1546   :  { %4696 = vmatpush1.bf16.msra.mxu0 %v4695_v63  ;;  %4698 = vmatprep.subr.bf16.mxu1 %v4697_v8  ;;  %v3213_v63 = vld [vmem:[#allocation11 + $0x230] sm:$0xff]  ;;  %v4741_v54 = vpack.c.bf16 %v3262_v6, %v3261_v5  ;;  %v3254_v46 = vld [vmem:[#allocation11 + $0x378] sm:$0xff]  ;;  %v4727_v5 = vpack.c.bf16 %v3222_v33, %v3221_v62  ;;  %v3726_v6 = vld [vmem:[%s5981_s11 + $0x4] sm:$0xf] }
0x1547   :  { %4730 = vmatprep.subr.bf16.mxu0 %v4729_v10  ;;  %v4711_v7 = vpack.c.bf16 %v3214_v41, %v3213_v63  ;;  %v3245_v8 = vld [vmem:[#allocation11 + $0x330] sm:$0xff]  ;;  %v3231_v10 = vld [vmem:[#allocation11 + $0x2c0] sm:$0xff]  ;;  %v2963_v63 = vrot.slane %v3726_v6, %v5497_v39  ;;  %v2971_v41 = vrot.slane %v3726_v6, %v5500_v40 }
0x15c5   :  { %v2867_v11 = vpop.xlane.xlu1 %2866 }
0x15c6   :  { %v2869_v12 = vmul.f32 0.0078125, %v2867_v11  ;;  %v2865_v13 = vpop.xlane.xlu0 %2864  ;;  %v4743_v11 = vpack.c.bf16 %v3246_v9, %v3245_v8 }
0x15c7   :  { %v2868_v56 = vmul.f32 0.0078125, %v2865_v13  ;;  %v3263_v13 = vld [vmem:[#allocation11 + $0x3c0] sm:$0xff] }
0x15c8   :  { %v2871_v0 = vadd.f32 1e-12, %v2869_v12  ;;  %v3232_v12 = vld [vmem:[#allocation11 + $0x2c8] sm:$0xff] }
0x15c9   :  { %v2870_v2 = vadd.f32 1e-12, %v2868_v56  ;;  %v3264_v56 = vld [vmem:[#allocation11 + $0x3c8] sm:$0xff] }
0x15ca   :  { %4902 = vrsqrt.f32 %v2871_v0  ;;  %v4713_v0 = vpack.c.bf16 %v3232_v12, %v3231_v10 }
0x15cb   :  { %4904 = vrsqrt.f32 %v2870_v2  ;;  %v4745_v2 = vpack.c.bf16 %v3264_v56, %v3263_v13 }
0x15d4   :  { %v4903_v15 = vpop.eup %4902 }
0x15d5   :  { %v4905_v16 = vpop.eup %4904  ;;  %v2875_v21 = vmul.f32 %v4903_v15, %v5764_v55  ;;  %v3225_v55 = vld [vmem:[#allocation11 + $0x290] sm:$0xff]  ;;  %v3215_v15 = vld [vmem:[#allocation11 + $0x240] sm:$0xff] }
0x15d6   :  { %v2874_v20 = vmul.f32 %v4905_v16, %v5766_v1  ;;  %v4701_v43 = vpack.c.bf16 %v3226_v28, %v3225_v55  ;;  %v3216_v16 = vld [vmem:[#allocation11 + $0x248] sm:$0xff]  ;;  %v3249_v55 = vld [vmem:[#allocation11 + $0x350] sm:$0xff]  ;;  %v3250_v28 = vld [vmem:[#allocation11 + $0x358] sm:$0xff] }
0x15d7   :  { %v2883_v36 = vmul.f32 %v3724_v17, %v2875_v21  ;;  %v3233_v21 = vld [vmem:[#allocation11 + $0x2d0] sm:$0xff]  ;;  %v4751_v47 = vpack.c.bf16 %v3250_v28, %v3249_v55 }
0x15d8   :  { %v2882_v31 = vmul.f32 %v3724_v17, %v2874_v20  ;;  %v3247_v17 = vld [vmem:[#allocation11 + $0x340] sm:$0xff]  ;;  %v3248_v20 = vld [vmem:[#allocation11 + $0x348] sm:$0xff]  ;;  %v4717_v26 = vpack.c.bf16 %v3234_v18, %v3233_v21 }
0x15d9   :  { %v5780_v1 = vadd.f32 %v3725_v19, %v2883_v36  ;;  %v4747_v24 = vpack.c.bf16 %v3248_v20, %v3247_v17  ;;  %v3217_v36 = vld [vmem:[#allocation11 + $0x250] sm:$0xff] }
0x15da   :  { %v5774_v34 = vadd.f32 %v3725_v19, %v2882_v31  ;;  %v4715_v19 = vpack.c.bf16 %v3216_v16, %v3215_v15  ;;  %v3266_v31 = vld [vmem:[#allocation11 + $0x3d8] sm:$0xff] }
0x15dc   :  { %3045 = vmatmul.mubr.f32.vlgmr.msra.gmra.mrb[32].mxu1 %v5774_v34  ;;  %3122 = vmatmul.mubr.f32.vlgmr.msra.gmra.mrb[32].mxu0 %v5774_v34 }
0x15dd   :  { %3050 = vmatprep.mubr.f32.mxu1 %v5204_v4  ;;  %3127 = vmatprep.mubr.f32.mxu0 %v5204_v4 }
0x15de   :  { %4700 = vmatpush3.bf16.msra.mxu1 %v4699_v35  ;;  %4732 = vmatpush3.bf16.msra.mxu0 %v4731_v42  ;;  %v4749_v35 = vpack.c.bf16 %v3266_v31, %v3265_v30  ;;  %v3218_v42 = vld [vmem:[#allocation11 + $0x258] sm:$0xff] }
0x15df   :  { %4702 = vmatprep.subr.bf16.mxu1 %v4701_v43  ;;  %4734 = vmatprep.subr.bf16.mxu0 %v4733_v48  ;;  %v4719_v38 = vpack.c.bf16 %v3218_v42, %v3217_v36  ;;  %v3235_v43 = vld [vmem:[#allocation11 + $0x2e0] sm:$0xff] }
0x15e0   :  { %3051 = vmatmul.mubr.f32.gmra.mrb[34].mxu1 %v5780_v1  ;;  %3128 = vmatmul.mubr.f32.gmra.mrb[34].mxu0 %v5780_v1  ;;  %v4721_v48 = vpack.c.bf16 %v3236_v14, %v3235_v43 }
0x15e2   :  { %4704 = vmatpush3.bf16.msra.mxu1 %v4703_v25  ;;  %4736 = vmatpush3.bf16.msra.mxu0 %v4735_v49  ;;  %v3268_v25 = vld [vmem:[#allocation11 + $0x3e8] sm:$0xff] }
0x15e3   :  { %4706 = vmatprep.subr.bf16.mxu1 %v4705_v53  ;;  %4738 = vmatprep.subr.bf16.mxu0 %v4737_v60  ;;  %v4753_v49 = vpack.c.bf16 %v3268_v25, %v3267_v44  ;;  %v3238_v53 = vld [vmem:[#allocation11 + $0x2f8] sm:$0xff]  ;;  %v4755_v60 = vpack.c.bf16 %v3252_v22, %v3251_v51 }
0x15e6   :  { %4708 = vmatpush3.bf16.msra.mxu1 %v4707_v23  ;;  %4740 = vmatpush3.bf16.msra.mxu0 %v4739_v45  ;;  %v4725_v23 = vpack.c.bf16 %v3238_v53, %v3237_v52  ;;  %v4757_v45 = vpack.c.bf16 %v3270_v57, %v3269_v50 }
0x15e7   :  { %4710 = vmatprep.subr.bf16.mxu1 %v4709_v61  ;;  %4742 = vmatprep.subr.bf16.mxu0 %v4741_v54  ;;  %v4759_v61 = vpack.c.bf16 %v3254_v46, %v3253_v3  ;;  %v2967_v54 = vrot.slane %v3726_v6, %v5491_v37 }
0x15ea   :  { %4712 = vmatpush3.bf16.msra.mxu1 %v4711_v7  ;;  %4744 = vmatpush3.bf16.msra.mxu0 %v4743_v11  ;;  %v2975_v7 = vrot.slane %v3726_v6, %v1364_v29 }
0x15eb   :  { %4714 = vmatprep.subr.bf16.mxu1 %v4713_v0  ;;  %4746 = vmatprep.subr.bf16.mxu0 %v4745_v2 }
0x15ee   :  { %4716 = vmatpush3.bf16.msra.mxu1 %v4715_v19  ;;  %4748 = vmatpush3.bf16.msra.mxu0 %v4747_v24 }
0x15ef   :  { %4718 = vmatprep.subr.bf16.mxu1 %v4717_v26  ;;  %4750 = vmatprep.subr.bf16.mxu0 %v4749_v35 }
0x15f2   :  { %4720 = vmatpush3.bf16.msra.mxu1 %v4719_v38  ;;  %4752 = vmatpush3.bf16.msra.mxu0 %v4751_v47 }
0x15f3   :  { %4722 = vmatprep.subr.bf16.mxu1 %v4721_v48  ;;  %4754 = vmatprep.subr.bf16.mxu0 %v4753_v49 }
0x15f6   :  { %4724 = vmatpush3.bf16.msra.mxu1 %v4723_v59  ;;  %4756 = vmatpush3.bf16.msra.mxu0 %v4755_v60 }
0x15f7   :  { %4726 = vmatprep.subr.bf16.mxu1 %v4725_v23  ;;  %4758 = vmatprep.subr.bf16.mxu0 %v4757_v45 }
0x15fa   :  { %4728 = vmatpush3.bf16.msra.mxu1 %v4727_v5  ;;  %4760 = vmatpush3.bf16.msra.mxu0 %v4759_v61 }
0x16af   :  { %v3046_v8 = vpop.f32.mrb[32].mxu1  ;;  %v3123_v9 = vpop.f32.mrb[32].mxu0 }
0x16b0   :  { %v5792_v10 = vadd.f32 %v3046_v8, %v2963_v63  ;;  %v5794_v11 = vadd.f32 %v3123_v9, %v2971_v41  ;;  %v3048_v12 = vpop.f32.mrb[33].mxu1  ;;  %v3125_v13 = vpop.f32.mrb[33].mxu0 }
0x16b1   :  { %v3049_v56 = vadd.f32 %v3048_v12, %v2967_v54  ;;  %v5796_v0 = vadd.f32 %v3125_v13, %v2975_v7 }
0x16b2   :  { %v3142_v39 = vmul.f32 0.044715, %v5792_v10  ;;  %v3144_v40 = vmul.f32 0.044715, %v5794_v11  ;;  %v3134_v12 = vmul.f32 0.5, %v5792_v10 }
0x16b3   :  { %v3143_v2 = vmul.f32 0.044715, %v3049_v56  ;;  %v3145_v37 = vmul.f32 0.044715, %v5796_v0  ;;  %v3052_v32 = vpop.f32.mrb[34].mxu1  ;;  %v3129_v29 = vpop.f32.mrb[34].mxu0 }
0x16b4   :  { %v3150_v15 = vmul.f32 %v3142_v39, %v5792_v10  ;;  %v3152_v16 = vmul.f32 %v3144_v40, %v5794_v11  ;;  %v5803_v17 = vadd.f32 %v3052_v32, %v2963_v63  ;;  %v5805_v19 = vadd.f32 %v3129_v29, %v2971_v41  ;;  %v3054_v20 = vpop.f32.mrb[35].mxu1  ;;  %v3131_v21 = vpop.f32.mrb[35].mxu0 }
0x16b5   :  { %v3151_v18 = vmul.f32 %v3143_v2, %v3049_v56  ;;  %v3153_v24 = vmul.f32 %v3145_v37, %v5796_v0  ;;  %v3055_v26 = vadd.f32 %v3054_v20, %v2967_v54  ;;  %v3132_v30 = vadd.f32 %v3131_v21, %v2975_v7 }
0x16b6   :  { %v3158_v31 = vmul.f32 %v3150_v15, %v5792_v10  ;;  %v3160_v36 = vmul.f32 %v3152_v16, %v5794_v11  ;;  %v3146_v35 = vmul.f32 0.044715, %v5803_v17  ;;  %v3148_v42 = vmul.f32 0.044715, %v5805_v19 }
0x16b7   :  { %v3147_v55 = vmul.f32 0.044715, %v3055_v26  ;;  %v3149_v28 = vmul.f32 0.044715, %v3132_v30  ;;  %v3159_v38 = vmul.f32 %v3151_v18, %v3049_v56  ;;  %v3161_v51 = vmul.f32 %v3153_v24, %v5796_v0 }
0x16b8   :  { %v3166_v43 = vadd.f32 %v3158_v31, %v5792_v10  ;;  %v3168_v14 = vadd.f32 %v3160_v36, %v5794_v11  ;;  %v3154_v44 = vmul.f32 %v3146_v35, %v5803_v17  ;;  %v3156_v49 = vmul.f32 %v3148_v42, %v5805_v19 }
0x16b9   :  { %v3155_v47 = vmul.f32 %v3147_v55, %v3055_v26  ;;  %v3157_v48 = vmul.f32 %v3149_v28, %v3132_v30  ;;  %v3167_v25 = vadd.f32 %v3159_v38, %v3049_v56  ;;  %v3169_v50 = vadd.f32 %v3161_v51, %v5796_v0 }
0x16ba   :  { %v3174_v27 = vmul.f32 0.7978846, %v3166_v43  ;;  %v3176_v58 = vmul.f32 0.7978846, %v3168_v14  ;;  %v3162_v57 = vmul.f32 %v3154_v44, %v5803_v17  ;;  %v3164_v33 = vmul.f32 %v3156_v49, %v5805_v19 }
0x16bb   :  { %v3175_v22 = vmul.f32 0.7978846, %v3167_v25  ;;  %v3163_v52 = vmul.f32 %v3155_v47, %v3055_v26  ;;  %v3165_v53 = vmul.f32 %v3157_v48, %v3132_v30  ;;  %v3177_v23 = vmul.f32 0.7978846, %v3169_v50 }
0x16bc   :  { %4906 = vtanh.f32 %v3174_v27  ;;  %v3170_v62 = vadd.f32 %v3162_v57, %v5803_v17  ;;  %v3172_v5 = vadd.f32 %v3164_v33, %v5805_v19  ;;  %v3135_v7 = vmul.f32 0.5, %v3049_v56  ;;  %v3478_v57 = vld [vmem:[%s5986_s16] sm:$0xff] }
0x16bd   :  { %4908 = vtanh.f32 %v3176_v58  ;;  %v3171_v59 = vadd.f32 %v3163_v52, %v3055_v26  ;;  %v3173_v60 = vadd.f32 %v3165_v53, %v3132_v30  ;;  %v3137_v2 = vmul.f32 0.5, %v5796_v0 }
0x16be   :  { %4910 = vtanh.f32 %v3175_v22  ;;  %v3178_v46 = vmul.f32 0.7978846, %v3170_v62  ;;  %v3180_v61 = vmul.f32 0.7978846, %v3172_v5  ;;  %v3136_v29 = vmul.f32 0.5, %v5794_v11 }
0x16bf   :  { %v3179_v45 = vmul.f32 0.7978846, %v3171_v59  ;;  %v3181_v3 = vmul.f32 0.7978846, %v3173_v60  ;;  %4912 = vtanh.f32 %v3177_v23  ;;  %v3139_v16 = vmul.f32 0.5, %v3055_v26  ;;  %v3479_v59 = vld [vmem:[%s5986_s16 + $0x8] sm:$0xff] }
0x16c0   :  { %v3141_v56 = vmul.f32 0.5, %v3132_v30  ;;  %v3138_v35 = vmul.f32 0.5, %v5803_v17  ;;  %v3140_v26 = vmul.f32 0.5, %v5805_v19  ;;  %v3728_v30 = vld [vmem:[%s5983_s13 + $0x1] ss:$0 sm:$0xff]  ;;  %v5207_v60 = vmov 0.0|0.0  }
0x16c1   :  { %4914 = vtanh.f32 %v3179_v45  ;;  %4761 = vmatprep.subr.bf16.mxu1 %v5207_v60  ;;  %v4762_v23 = vpack.c.bf16 %v3479_v59, %v3478_v57  ;;  %4785 = vmatprep.subr.bf16.mxu0 %v5207_v60 }
0x16c2   :  { %4916 = vtanh.f32 %v3181_v3 }
0x16c3   :  { %4918 = vtanh.f32 %v3178_v46 }
0x16c4   :  { %4920 = vtanh.f32 %v3180_v61  ;;  %v3480_v61 = vld [vmem:[%s5986_s16 + $0x10] sm:$0xff] }
0x16c6   :  { %v4907_v6 = vpop.eup %4906 }
0x16c7   :  { %v4909_v63 = vpop.eup %4908  ;;  %v3190_v54 = vadd.f32 1.0, %v4907_v6  ;;  %v3481_v6 = vld [vmem:[%s5986_s16 + $0x18] sm:$0xff] }
0x16c8   :  { %v4911_v41 = vpop.eup %4910  ;;  %v3192_v13 = vadd.f32 1.0, %v4909_v63  ;;  %v4765_v63 = vpack.c.bf16 %v3481_v6, %v3480_v61  ;;  %v3731_v61 = vld [vmem:[#allocation16] ss:$0 sm:$0xff] }
0x16c9   :  { %v3191_v8 = vadd.f32 1.0, %v4911_v41  ;;  %v4913_v9 = vpop.eup %4912  ;;  %v3198_v15 = vmul.f32 %v3190_v54, %v3134_v12  ;;  %v3482_v41 = vld [vmem:[%s5986_s16 + $0x20] sm:$0xff]  ;;  %v3483_v54 = vld [vmem:[%s5986_s16 + $0x28] sm:$0xff] }
0x16ca   :  { %v3193_v37 = vadd.f32 1.0, %v4913_v9  ;;  %v3200_v10 = vmul.f32 %v3192_v13, %v3136_v29  ;;  %v3485_v9 = vld [vmem:[%s5986_s16 + $0x38] sm:$0xff]  ;;  %v3486_v13 = vld [vmem:[%s5986_s16 + $0x40] sm:$0xff] }
0x16cb   :  { %v4915_v39 = vpop.eup %4914  ;;  %v3199_v40 = vmul.f32 %v3191_v8, %v3135_v7  ;;  %v4768_v7 = vpack.c.bf16 %v3483_v54, %v3482_v41  ;;  %v3484_v8 = vld [vmem:[%s5986_s16 + $0x30] sm:$0xff]  ;;  %v3490_v29 = vld [vmem:[%s5986_s16 + $0x60] sm:$0xff] }
0x16cc   :  { %v4917_v32 = vpop.eup %4916  ;;  %v3195_v20 = vadd.f32 1.0, %v4915_v39  ;;  %v3201_v18 = vmul.f32 %v3193_v37, %v3137_v2  ;;  %v4771_v12 = vpack.c.bf16 %v3485_v9, %v3484_v8  ;;  %v3487_v39 = vld [vmem:[%s5986_s16 + $0x48] sm:$0xff]  ;;  %v3488_v2 = vld [vmem:[%s5986_s16 + $0x50] sm:$0xff]  ;;  %v3489_v37 = vld [vmem:[%s5986_s16 + $0x58] sm:$0xff] }
0x16cd   :  { %v4919_v21 = vpop.eup %4918  ;;  %3343 = vmatprep.mubr.f32.mxu1 %v3199_v40  ;;  %v3197_v24 = vadd.f32 1.0, %v4917_v32  ;;  %v4774_v40 = vpack.c.bf16 %v3487_v39, %v3486_v13  ;;  %v4777_v32 = vpack.c.bf16 %v3489_v37, %v3488_v2 }
0x16ce   :  { %v4921_v31 = vpop.eup %4920  ;;  %3344 = vmatmul.mubr.f32.vlgmr.msra.gmra.mrb[36].mxu1 %v3198_v15  ;;  %v3203_v36 = vmul.f32 %v3195_v20, %v3139_v16  ;;  %v3194_v42 = vadd.f32 1.0, %v4919_v21  ;;  %3418 = vmatprep.mubr.f32.mxu0 %v3201_v18  ;;  %v3491_v15 = vld [vmem:[%s5986_s16 + $0x68] sm:$0xff]  ;;  %v3492_v20 = vld [vmem:[%s5986_s16 + $0x70] sm:$0xff]  ;;  %v3493_v21 = vld [vmem:[%s5986_s16 + $0x78] sm:$0xff] }
0x16cf   :  { %v3205_v0 = vmul.f32 %v3197_v24, %v3141_v56  ;;  %v3196_v55 = vadd.f32 1.0, %v4921_v31  ;;  %3419 = vmatmul.mubr.f32.vlgmr.msra.gmra.mrb[36].mxu0 %v3200_v10  ;;  %4763 = vmatpush3.bf16.msra.mxu1 %v4762_v23  ;;  %v4780_v16 = vpack.c.bf16 %v3491_v15, %v3490_v29  ;;  %v4783_v18 = vpack.c.bf16 %v3493_v21, %v3492_v20  ;;  %v3572_v56 = vld [vmem:[%s5988_s18] sm:$0xff]  ;;  %v3573_v24 = vld [vmem:[%s5988_s18 + $0x8] sm:$0xff]  ;;  %v3574_v31 = vld [vmem:[%s5988_s18 + $0x10] sm:$0xff] }
0x16d0   :  { %3348 = vmatprep.mubr.f32.mxu1 %v3203_v36  ;;  %v3202_v11 = vmul.f32 %v3194_v42, %v3138_v35  ;;  %4764 = vmatprep.subr.bf16.mxu1 %v5207_v60  ;;  %v4786_v10 = vpack.c.bf16 %v3573_v24, %v3572_v56  ;;  %v3575_v36 = vld [vmem:[%s5988_s18 + $0x18] sm:$0xff]  ;;  %v3576_v42 = vld [vmem:[%s5988_s18 + $0x20] sm:$0xff]  ;;  %v3582_v23 = vld [vmem:[%s5988_s18 + $0x50] sm:$0xff] }
0x16d1   :  { %3423 = vmatprep.mubr.f32.mxu0 %v3205_v0  ;;  %v3204_v28 = vmul.f32 %v3196_v55, %v3140_v26  ;;  %v4789_v35 = vpack.c.bf16 %v3575_v36, %v3574_v31  ;;  %v3577_v0 = vld [vmem:[%s5988_s18 + $0x28] sm:$0xff]  ;;  %v3579_v26 = vld [vmem:[%s5988_s18 + $0x38] sm:$0xff] }
0x16d2   :  { %3349 = vmatmul.mubr.f32.gmra.mrb[38].mxu1 %v3202_v11  ;;  %4787 = vmatpush3.bf16.msra.mxu0 %v4786_v10  ;;  %v4792_v55 = vpack.c.bf16 %v3577_v0, %v3576_v42  ;;  %v3578_v11 = vld [vmem:[%s5988_s18 + $0x30] sm:$0xff] }
0x16d3   :  { %4275 = vmatprep.mubr.msk.f32.mxu1 %vm5205_vm0, %v5204_v4  ;;  %3424 = vmatmul.mubr.f32.gmra.mrb[38].mxu0 %v3204_v28  ;;  %v4795_v28 = vpack.c.bf16 %v3579_v26, %v3578_v11 }
0x16d4   :  { %4310 = vmatprep.mubr.msk.f32.mxu0 %vm5205_vm0, %v5204_v4  ;;  %4766 = vmatpush3.bf16.msra.mxu1 %v4765_v63 }
0x16d5   :  { %4767 = vmatprep.subr.bf16.mxu1 %v5207_v60  ;;  %4788 = vmatprep.subr.bf16.mxu0 %v5207_v60 }
0x16d6   :  { %4790 = vmatpush3.bf16.msra.mxu0 %v4789_v35 }
0x16d7   :  { %4791 = vmatprep.subr.bf16.mxu0 %v5207_v60 }
0x16d8   :  { %4769 = vmatpush3.bf16.msra.mxu1 %v4768_v7  ;;  %v3732_v7 = vld [vmem:[#allocation17] ss:$0 sm:$0xff] }
0x16d9   :  { %4770 = vmatprep.subr.bf16.mxu1 %v5207_v60 }
0x16da   :  { %4793 = vmatpush3.bf16.msra.mxu0 %v4792_v55 }
0x16db   :  { %4794 = vmatprep.subr.bf16.mxu0 %v5207_v60 }
0x16dc   :  { %4772 = vmatpush3.bf16.msra.mxu1 %v4771_v12 }
0x16dd   :  { %4773 = vmatprep.subr.bf16.mxu1 %v5207_v60 }
0x16de   :  { %4796 = vmatpush3.bf16.msra.mxu0 %v4795_v28 }
0x16df   :  { %4797 = vmatprep.subr.bf16.mxu0 %v5207_v60 }
0x16e0   :  { %4775 = vmatpush3.bf16.msra.mxu1 %v4774_v40 }
0x16e1   :  { %4776 = vmatprep.subr.bf16.mxu1 %v5207_v60 }
0x16e4   :  { %4778 = vmatpush3.bf16.msra.mxu1 %v4777_v32 }
0x16e5   :  { %4779 = vmatprep.subr.bf16.mxu1 %v5207_v60 }
0x16e8   :  { %4781 = vmatpush3.bf16.msra.mxu1 %v4780_v16 }
0x16e9   :  { %4782 = vmatprep.subr.bf16.mxu1 %v5207_v60 }
0x16ec   :  { %4784 = vmatpush3.bf16.msra.mxu1 %v4783_v18 }
0x17a1   :  { %v3945_v17 = vpop.f32.mrb[36].mxu1 }
0x17a2   :  { %v3946_v38 = vpop.f32.mrb[37].mxu1  ;;  %v3983_v43 = vpop.f32.mrb[36].mxu0 }
0x17a3   :  { %v3947_v14 = vadd.f32 %v3946_v38, %v3945_v17  ;;  %v3984_v44 = vpop.f32.mrb[37].mxu0  ;;  %v3580_v17 = vld [vmem:[%s5988_s18 + $0x40] sm:$0xff] }
0x17a4   :  { %v3985_v47 = vadd.f32 %v3984_v44, %v3983_v43 }
0x17a5   :  { %v3346_v19 = vadd.f32 %v3947_v14, %v3728_v30  ;;  %v3948_v48 = vpop.f32.mrb[38].mxu1 }
0x17a6   :  { %v3949_v25 = vpop.f32.mrb[39].mxu1  ;;  %v3986_v58 = vpop.f32.mrb[38].mxu0 }
0x17a7   :  { %v3421_v27 = vadd.f32 %v3985_v47, %v3346_v19  ;;  %v3950_v49 = vadd.f32 %v3949_v25, %v3948_v48  ;;  %v3987_v51 = vpop.f32.mrb[39].mxu0 }
0x17a8   :  { %v3988_v52 = vadd.f32 %v3987_v51, %v3986_v58 }
0x17a9   :  { %v3351_v22 = vadd.f32 %v3950_v49, %v3728_v30  ;;  %v3429_v4 = vadd.f32 %v3421_v27, %v5774_v34  ;;  %v3581_v30 = vld [vmem:[%s5988_s18 + $0x48] sm:$0xff]  ;;  %v3729_v49 = vld [vmem:[#allocation13 + $0x1] ss:$0 sm:$0xff] }
0x17aa   :  { %v4798_v38 = vpack.c.bf16 %v3581_v30, %v3580_v17 }
0x17ab   :  { %v3426_v53 = vadd.f32 %v3988_v52, %v3351_v22  ;;  %3435 = vadd.xlane.f32.xlu1 %v3429_v4 }
0x17ac   :  { %4799 = vmatpush3.bf16.msra.mxu0 %v4798_v38 }
0x17ad   :  { %v3430_v50 = vadd.f32 %v3426_v53, %v5780_v1  ;;  %4800 = vmatprep.subr.bf16.mxu0 %v5207_v60 }
0x17af   :  { %3437 = vadd.xlane.f32.xlu0 %v3430_v50 }
0x1838   :  { %v3436_v34 = vpop.xlane.xlu1 %3435 }
0x1839   :  { %v3439_v1 = vmul.f32 0.0078125, %v3436_v34  ;;  %v3583_v34 = vld [vmem:[%s5988_s18 + $0x58] sm:$0xff] }
0x183b   :  { %v5845_v62 = vsub.f32 %v3429_v4, %v3439_v1  ;;  %v3730_v4 = vld [vmem:[#allocation14 + $0x1] ss:$0 sm:$0xff] }
0x183c   :  { %v3438_v33 = vpop.xlane.xlu0 %3437  ;;  %v3584_v1 = vld [vmem:[%s5988_s18 + $0x60] sm:$0xff] }
0x183d   :  { %v3440_v45 = vmul.f32 0.0078125, %v3438_v33  ;;  %v3443_v3 = vmul.f32 %v5845_v62, %v5845_v62  ;;  %v3585_v33 = vld [vmem:[%s5988_s18 + $0x68] sm:$0xff] }
0x183f   :  { %v5849_v46 = vsub.f32 %v3430_v50, %v3440_v45  ;;  %3445 = vadd.xlane.f32.xlu1 %v3443_v3  ;;  %v4804_v45 = vpack.c.bf16 %v3585_v33, %v3584_v1  ;;  %v3586_v3 = vld [vmem:[%s5988_s18 + $0x70] sm:$0xff] }
0x1841   :  { %v3444_v5 = vmul.f32 %v5849_v46, %v5849_v46 }
0x1843   :  { %3447 = vadd.xlane.f32.xlu0 %v3444_v5 }
0x18cc   :  { %v3446_v43 = vpop.xlane.xlu1 %3445 }
0x18cd   :  { %v3449_v14 = vmul.f32 0.0078125, %v3446_v43 }
0x18cf   :  { %v3451_v44 = vadd.f32 1e-12, %v3449_v14 }
0x18d0   :  { %v3448_v19 = vpop.xlane.xlu0 %3447 }
0x18d1   :  { %4922 = vrsqrt.f32 %v3451_v44  ;;  %v3450_v47 = vmul.f32 0.0078125, %v3448_v19 }
0x18d3   :  { %v3452_v48 = vadd.f32 1e-12, %v3450_v47 }
0x18d5   :  { %4924 = vrsqrt.f32 %v3452_v48 }
0x18db   :  { %v4923_v25 = vpop.eup %4922 }
0x18dc   :  { %v3455_v27 = vmul.f32 %v4923_v25, %v5845_v62  ;;  %v4801_v62 = vpack.c.bf16 %v3583_v34, %v3582_v23 }
0x18de   :  { %v3463_v22 = vmul.f32 %v3729_v49, %v3455_v27  ;;  %4802 = vmatpush3.bf16.msra.mxu0 %v4801_v62 }
0x18df   :  { %v4925_v58 = vpop.eup %4924  ;;  %4803 = vmatprep.subr.bf16.mxu0 %v5207_v60 }
0x18e0   :  { %v3456_v51 = vmul.f32 %v4925_v58, %v5849_v46  ;;  %v3471_v50 = vadd.f32 %v3730_v4, %v3463_v22  ;;  %v3587_v46 = vld [vmem:[%s5988_s18 + $0x78] sm:$0xff]  ;;  %s5150_s18 = scalar_lea.vmem %s3674_s3, 32 }
0x18e1   :  { %v4807_v5 = vpack.c.bf16 %v3587_v46, %v3586_v3  ;;  %p5151_p10 = scmp.ne.s32.totalorder %s3674_s3, %s5150_s18  ;;  %p5156_p12 = scmp.lt.s32.totalorder %s5150_s18, %s5150_s18 }
0x18e2   :  { %v3464_v52 = vmul.f32 %v3729_v49, %v3456_v51  ;;  %4805 = vmatpush3.bf16.msra.mxu0 %v4804_v45 }
0x18e3   :  { %4806 = vmatprep.subr.bf16.mxu0 %v5207_v60  ;;  %p5157_p13 = por %p5156_p12, %p5155_p11 }
0x18e4   :  { %v3472_v53 = vadd.f32 %v3730_v4, %v3464_v52 }
0x18e5   :  { %p5158_p0 = pnand %p5157_p13, %p5151_p10 }
0x18e6   :  { %v3474_v57 = vrot.slane %v3472_v53, 7  ;;  %4808 = vmatpush3.bf16.msra.mxu0 %v4807_v5 }
0x18e8   :  { %v3477_v59 = vsel %vm3476_vm3, %v3471_v50, %v3474_v57 }
0x18e9   :  { %4276 = vmatmul.mubr.f32.vlgmr.msra.gmra.mrb[40].mxu1 %v3477_v59 }
0x19bc   :  { %v3567_v6 = vpop.f32.mrb[40].mxu1 }
0x19bd   :  { %v3568_v63 = vadd.f32 %v3731_v61, %v3567_v6  ;;  %v4277_v41 = vpop.f32.mrb[41].mxu1 }
0x19bf   :  { %4926 = vtanh.f32 %v3568_v63 }
0x19c9   :  { %v4927_v54 = vpop.eup %4926 }
0x19ca   :  { %4311 = vmatmul.mubr.f32.vlgmr.msra.gmra.mrb[40].mxu0 %v4927_v54 }
0x1a9d   :  { %v3661_v8 = vpop.f32.mrb[40].mxu0 }
0x1a9e   :  { %v3662_v9 = vadd.f32 %v3732_v7, %v3661_v8  ;;  %v4312_v12 = vpop.f32.mrb[41].mxu0 }
0x1aa0   :  { %v3665_v13 = vmax.f32 %v3662_v9, 0.0 }
0x1aa2   :  { %3666 = vst [vmem:[#allocation19] sm:$0x3] %v3665_v13 }
0x1aa3   :  { %5161 = shalt.err (!%p5158_p0)
}
0x1aa4   :  { %s6006_s26 = sld [smem:[#allocation32_spill]] }
0x1aaa   :  { %s5162_s27 = scalar_lea.hbm %s6006_s26, 32 }
0x1aab   :  { %p5163_p1 = scmp.ne.s32.totalorder %s6006_s26, %s5162_s27  ;;  %p5166_p2 = scmp.lt.u32.totalorder %s5162_s27, %s6006_s26 }
0x1aad   :  { %p5168_p3 = pnand %p5166_p2, %p5163_p1 }
0x1aaf   :  { %5171 = shalt.err (!%p5168_p3)
}
0x1ab0   :  { %3676 = dma.vmem_to_hbm [thread:$0]  %s3674_s3, 32, %s6006_s26, [#allocation4]  }
0x1ab1   :  { %5184 = dma.done.wait [#allocation4], 32  }
0x1ab2   :  { %5185 = vsyncadd [#allocation4], 4294967264 }
0x1ab3   :  { %3680 = vsyncpa [#allocation3], 1 }
0x1ab4   :  { %3681 = vsyncpa [#allocation6], 1 }
0x1ab5   :  { %3682 = vsyncpa [#allocation9], 1 }
0x1ab6   :  { %3683 = vsyncpa [#allocation12], 1 }
0x1ab7   :  { %3684 = vsyncpa [#allocation15], 1 }
0x1ab8   :  { %3685 = vsyncpa [#allocation18], 1 }
0x1ab9   :  { %3686 = vsyncpa [#allocation4], 1 }

</bundles_post_ra>
